<compile_context>
chip_gen: v5e
topology: v5e:2x2
jax: 0.10.0
libtpu: 0.0.40
codegen_flags: <defaults>
</compile_context>

<pallas_src>
import jax
import jax.numpy as jnp
from jax.experimental import pallas as pl
from jax.experimental.pallas import tpu as pltpu

EPS = 1e-5  # PyTorch BatchNorm2d default eps


# --------------------------------------------------------------------------
# In-kernel helpers
# --------------------------------------------------------------------------
def _pad_hw1(x):
    """Zero-pad a (H, W, C) tile by 1 on H and W (concat-based, in-kernel)."""
    H, W, C = x.shape
    zrow = jnp.zeros((1, W, C), x.dtype)
    x = jnp.concatenate([zrow, x, zrow], axis=0)        # (H+2, W, C)
    zcol = jnp.zeros((H + 2, 1, C), x.dtype)
    return jnp.concatenate([zcol, x, zcol], axis=1)     # (H+2, W+2, C)


def _conv3x3_fused(x_bf16, w_ref):
    """3x3 conv (padding=1, no bias) on one (H, W, Cin) tile as one im2col matmul.

    x_bf16 : (H, W, Cin) bf16 activation tile
    w_ref  : (9*Cin, Cout) bf16 weights, tap-major (tap = ky*3 + kx, Cin fastest)
    returns: (H*W, Cout) f32
    """
    H, W, C = x_bf16.shape
    xp = _pad_hw1(x_bf16)                                               # (H+2, W+2, C)
    taps = [xp[dy:dy + H, dx:dx + W, :] for dy in range(3) for dx in range(3)]
    patches = jnp.concatenate(taps, axis=-1).reshape(H * W, 9 * C)      # (H*W, 9C)
    return jnp.dot(patches, w_ref[...], preferred_element_type=jnp.float32)


def _partial_stats(y):
    """One-pass BN partial statistics for one tile: (2, Cout) = [sum, sum_sq]."""
    s = jnp.sum(y, axis=0, keepdims=True)
    sq = jnp.sum(y * y, axis=0, keepdims=True)
    return jnp.concatenate([s, sq], axis=0)


# --------------------------------------------------------------------------
# Kernels (grid = (N,), one image tile per grid step, batch axis "parallel")
# --------------------------------------------------------------------------
def conv1_stats_kernel(x_ref, w_ref, y_ref, stats_ref):
    _, H, W, _ = x_ref.shape
    Cout = y_ref.shape[-1]
    y = _conv3x3_fused(x_ref[0], w_ref)                      # (H*W, Cout) f32
    stats_ref[0] = _partial_stats(y)
    y_ref[0] = y.reshape(H, W, Cout).astype(y_ref.dtype)     # bf16 intermediate


def bn1_conv2_stats_kernel(y1_ref, sc_ref, sh_ref, w_ref, y2_ref, stats_ref):
    _, H, W, _ = y1_ref.shape
    Cout = y2_ref.shape[-1]
    # BN1 (folded scale/shift, f32) + ReLU
    a = jnp.maximum(y1_ref[0].astype(jnp.float32) * sc_ref[...] + sh_ref[...], 0.0)
    y = _conv3x3_fused(a.astype(jnp.bfloat16), w_ref)
    stats_ref[0] = _partial_stats(y)
    y2_ref[0] = y.reshape(H, W, Cout).astype(y2_ref.dtype)


def bn2_pool_kernel(y2_ref, sc_ref, sh_ref, conv_ref, pool_ref):
    _, H, W, C = y2_ref.shape
    a = jnp.maximum(y2_ref[0].astype(jnp.float32) * sc_ref[...] + sh_ref[...], 0.0)
    conv_ref[0] = a
    # 2x2 max-pool stride 2 on the per-image tile (strided value slices are not
    # reliably lowered by Mosaic, so the reshape form is kept; the H split is an
    # outer-dim reshape and therefore free).
    Hh, Wh = H // 2, W // 2
    r = a.reshape(Hh, 2, W, C).max(axis=1)
    pool_ref[0] = r.reshape(Hh, Wh, 2, C).max(axis=2)


# --------------------------------------------------------------------------
# Host-side wrapper
# --------------------------------------------------------------------------
def _bn_fold(stats, gamma, beta, count):
    """Reduce per-tile [sum, sumsq] -> folded BN scale/shift (training-mode stats)."""
    s = jnp.sum(stats[:, 0, :], axis=0)
    sq = jnp.sum(stats[:, 1, :], axis=0)
    mu = s / count
    var = jnp.maximum(sq / count - mu * mu, 0.0)        # biased var (PyTorch train)
    scale = gamma.reshape(-1) * jax.lax.rsqrt(var + EPS)
    shift = beta.reshape(-1) - mu * scale
    return (scale.reshape(1, -1).astype(jnp.float32),
            shift.reshape(1, -1).astype(jnp.float32))


def encoder_block_forward(x_nchw, params):
    """x_nchw: (N, Cin, H, W) f32 -> (conv_out NCHW f32, pooled NCHW f32)."""
    x = jnp.transpose(x_nchw, (0, 2, 3, 1))             # NCHW -> NHWC (channels on lanes)
    N, H, W, Cin = x.shape
    Cout = params["w1"].shape[-1]
    count = N * H * W

    x_bf = x.astype(jnp.bfloat16)                       # bf16 MXU inputs, f32 accum
    w1 = params["w1"].reshape(9 * Cin, Cout).astype(jnp.bfloat16)
    w2 = params["w2"].reshape(9 * Cout, Cout).astype(jnp.bfloat16)
    # NOTE: conv biases b1/b2 are intentionally not passed to the kernels; a
    # per-channel constant before train-mode BN cancels exactly (see header).

    cparams = pltpu.CompilerParams(
        dimension_semantics=("parallel",),              # both TCs on v7x get tiles
        vmem_limit_bytes=32 * 1024 * 1024,              # explicit budget (< v7x 64 MiB)
    )

    def img_spec(c):
        return pl.BlockSpec((1, H, W, c), lambda i: (i, 0, 0, 0))

    def full2_spec(arr):                                # small 2-D param, one block
        return pl.BlockSpec(arr.shape, lambda i: (0, 0))

    stats_spec = pl.BlockSpec((1, 2, Cout), lambda i: (i, 0, 0))
    stats_shape = jax.ShapeDtypeStruct((N, 2, Cout), jnp.float32)
    act_shape = jax.ShapeDtypeStruct((N, H, W, Cout), jnp.bfloat16)

    # ---- K1: conv1 + per-tile BN1 partial sums -------------------------------
    y1, st1 = pl.pallas_call(
        conv1_stats_kernel,
        grid=(N,),
        in_specs=[img_spec(Cin), full2_spec(w1)],
        out_specs=(img_spec(Cout), stats_spec),
        out_shape=(act_shape, stats_shape),
        compiler_params=cparams,
        cost_estimate=pl.CostEstimate(
            flops=2 * count * 9 * Cin * Cout + 3 * count * Cout,
            transcendentals=0,
            bytes_accessed=(x_bf.size + w1.size) * 2 + count * Cout * 2
                           + N * 2 * Cout * 4),
    )(x_bf, w1)

    sc1, sh1 = _bn_fold(st1, params["g1"], params["be1"], count)

    # ---- K2: BN1 + ReLU + conv2 + per-tile BN2 partial sums -------------------
    y2, st2 = pl.pallas_call(
        bn1_conv2_stats_kernel,
        grid=(N,),
        in_specs=[img_spec(Cout), full2_spec(sc1), full2_spec(sh1), full2_spec(w2)],
        out_specs=(img_spec(Cout), stats_spec),
        out_shape=(act_shape, stats_shape),
        compiler_params=cparams,
        cost_estimate=pl.CostEstimate(
            flops=2 * count * 9 * Cout * Cout + 6 * count * Cout,
            transcendentals=0,
            bytes_accessed=(count * Cout + w2.size) * 2 + count * Cout * 2
                           + N * 2 * Cout * 4),
    )(y1, sc1, sh1, w2)

    sc2, sh2 = _bn_fold(st2, params["g2"], params["be2"], count)

    # ---- K3: BN2 + ReLU + conv output + 2x2 maxpool ---------------------------
    conv_nhwc, pool_nhwc = pl.pallas_call(
        bn2_pool_kernel,
        grid=(N,),
        in_specs=[img_spec(Cout), full2_spec(sc2), full2_spec(sh2)],
        out_specs=(img_spec(Cout),
                   pl.BlockSpec((1, H // 2, W // 2, Cout), lambda i: (i, 0, 0, 0))),
        out_shape=(jax.ShapeDtypeStruct((N, H, W, Cout), jnp.float32),
                   jax.ShapeDtypeStruct((N, H // 2, W // 2, Cout), jnp.float32)),
        compiler_params=cparams,
        cost_estimate=pl.CostEstimate(
            flops=6 * count * Cout,
            transcendentals=0,
            bytes_accessed=count * Cout * 2 + count * Cout * 4
                           + (count // 4) * Cout * 4),
    )(y2, sc2, sh2)

    # PyTorch-compatible NCHW at the boundary (NHWC internally).
    return (jnp.transpose(conv_nhwc, (0, 3, 1, 2)),
            jnp.transpose(pool_nhwc, (0, 3, 1, 2)))


# --------------------------------------------------------------------------
# Pure-JAX f32 reference (PyTorch-equivalent math, INCLUDING conv biases)
# --------------------------------------------------------------------------
def reference_forward(x_nchw, params):
    x = jnp.transpose(x_nchw, (0, 2, 3, 1)).astype(jnp.float32)

    def conv3x3(x, w9, b):
        N, H, W, _ = x.shape
        Cout = w9.shape[-1]
        xp = jnp.pad(x, ((0, 0), (1, 1), (1, 1), (0, 0)))
        out = jnp.zeros((N, H, W, Cout), jnp.float32)
        for t in range(9):
            dy, dx = t // 3, t % 3
            out = out + jnp.einsum("nhwc,co->nhwo",
                                   xp[:, dy:dy + H, dx:dx + W, :], w9[t])
        return out + b.reshape(1, 1, 1, -1)

    def bn_relu(y, g, be):
        mu = jnp.mean(y, axis=(0, 1, 2), keepdims=True)
        var = jnp.mean((y - mu) ** 2, axis=(0, 1, 2), keepdims=True)
        y = (y - mu) * jax.lax.rsqrt(var + EPS)
        y = y * g.reshape(1, 1, 1, -1) + be.reshape(1, 1, 1, -1)
        return jnp.maximum(y, 0.0)

    y = bn_relu(conv3x3(x, params["w1"], params["b1"]), params["g1"], params["be1"])
    y = bn_relu(conv3x3(y, params["w2"], params["b2"]), params["g2"], params["be2"])
    N, H, W, C = y.shape
    pool = jnp.max(y.reshape(N, H // 2, 2, W // 2, 2, C), axis=(2, 4))
    return jnp.transpose(y, (0, 3, 1, 2)), jnp.transpose(pool, (0, 3, 1, 2))


def init_params(key, cin, cout):
    # Shapes follow nn.Conv2d(cin, cout, 3, padding=1) (weights stored tap-major
    # as (9, cin, cout)) and nn.BatchNorm2d(cout) (gamma=1, beta=0 like PyTorch).
    k1, k2, k3, k4 = jax.random.split(key, 4)
    return {
        "w1": jax.random.normal(k1, (9, cin, cout), jnp.float32) * 0.1,
        "b1": jax.random.normal(k2, (1, cout), jnp.float32) * 0.1,
        "g1": jnp.ones((1, cout), jnp.float32),
        "be1": jnp.zeros((1, cout), jnp.float32),
        "w2": jax.random.normal(k3, (9, cout, cout), jnp.float32) * 0.1,
        "b2": jax.random.normal(k4, (1, cout), jnp.float32) * 0.1,
        "g2": jnp.ones((1, cout), jnp.float32),
        "be2": jnp.zeros((1, cout), jnp.float32),
    }
    # TODO(synk): BatchNorm running_mean/running_var buffer updates (training-state
    # side effects) are not modeled; forward outputs in train mode don't use them.


if __name__ == "__main__":
    key = jax.random.PRNGKey(0)
    kx, kp = jax.random.split(key)

    N, Cin, Cout, H, W = 2, 4, 8, 16, 16
    x = jax.random.normal(kx, (N, Cin, H, W), jnp.float32)   # NCHW like PyTorch
    params = init_params(kp, Cin, Cout)

    fwd = jax.jit(encoder_block_forward)
    conv_out, pooled = fwd(x, params)
    conv_out = jax.block_until_ready(conv_out)
    pooled = jax.block_until_ready(pooled)

    ref_conv, ref_pool = reference_forward(x, params)
    assert conv_out.shape == (N, Cout, H, W)
    assert pooled.shape == (N, Cout, H // 2, W // 2)
    # bf16 MXU inputs with f32 accumulation -> slightly looser tolerance vs f32 ref.
    assert jnp.allclose(conv_out, ref_conv, atol=5e-2, rtol=5e-2)
    assert jnp.allclose(pooled, ref_pool, atol=5e-2, rtol=5e-2)

    print("KERNEL_OK")
</pallas_src>

<mosaic_0001>
module attributes {stable_mosaic.version = 11 : i64} {
  func.func @bn1_conv2_stats_kernel(%arg0: i32, %arg1: memref<1x16x16x8xbf16, #tpu.memory_space<vmem>>, %arg2: memref<1x8xf32, #tpu.memory_space<vmem>>, %arg3: memref<1x8xf32, #tpu.memory_space<vmem>>, %arg4: memref<72x8xbf16, #tpu.memory_space<vmem>>, %arg5: memref<1x16x16x8xbf16, #tpu.memory_space<vmem>>, %arg6: memref<1x2x8xf32, #tpu.memory_space<vmem>>) attributes {dimension_semantics = [#tpu.dimension_semantics<parallel>], iteration_bounds = array<i64: 2>, scalar_prefetch = 0 : i64, scratch_operands = 0 : i64, tpu.core_type = #tpu.core_type<tc>, window_params = [{transform_indices = @transform_0, window_bounds = array<i64: 1, 16, 16, 8>}, {pipeline_mode = #tpu.pipeline_mode<synchronous>, transform_indices = @transform_1, window_bounds = array<i64: 1, 8>}, {pipeline_mode = #tpu.pipeline_mode<synchronous>, transform_indices = @transform_2, window_bounds = array<i64: 1, 8>}, {pipeline_mode = #tpu.pipeline_mode<synchronous>, transform_indices = @transform_3, window_bounds = array<i64: 72, 8>}, {transform_indices = @transform_4, window_bounds = array<i64: 1, 16, 16, 8>}, {transform_indices = @transform_5, window_bounds = array<i64: 1, 2, 8>}]} {
    %c0 = arith.constant 0 : index
    %c0_0 = arith.constant 0 : index
    %c0_1 = arith.constant 0 : index
    %c0_2 = arith.constant 0 : index
    %0 = vector.load %arg1[%c0, %c0_0, %c0_1, %c0_2] : memref<1x16x16x8xbf16, #tpu.memory_space<vmem>>, vector<1x16x16x8xbf16>
    %1 = vector.shape_cast %0 : vector<1x16x16x8xbf16> to vector<16x16x8xbf16>
    %2 = arith.extf %1 : vector<16x16x8xbf16> to vector<16x16x8xf32>
    %c0_3 = arith.constant 0 : index
    %c0_4 = arith.constant 0 : index
    %3 = vector.load %arg2[%c0_3, %c0_4] : memref<1x8xf32, #tpu.memory_space<vmem>>, vector<1x8xf32>
    %4 = vector.shape_cast %3 : vector<1x8xf32> to vector<1x1x8xf32>
    %5 = vector.broadcast %4 : vector<1x1x8xf32> to vector<16x16x8xf32>
    %6 = arith.mulf %2, %5 : vector<16x16x8xf32>
    %c0_5 = arith.constant 0 : index
    %c0_6 = arith.constant 0 : index
    %7 = vector.load %arg3[%c0_5, %c0_6] : memref<1x8xf32, #tpu.memory_space<vmem>>, vector<1x8xf32>
    %8 = vector.shape_cast %7 : vector<1x8xf32> to vector<1x1x8xf32>
    %9 = vector.broadcast %8 : vector<1x1x8xf32> to vector<16x16x8xf32>
    %10 = arith.addf %6, %9 : vector<16x16x8xf32>
    %cst = arith.constant 0.000000e+00 : f32
    %11 = vector.broadcast %cst : f32 to vector<16x16x8xf32>
    %12 = arith.maximumf %10, %11 : vector<16x16x8xf32>
    %13 = arith.truncf %12 : vector<16x16x8xf32> to vector<16x16x8xbf16>
    %cst_7 = arith.constant 0.000000e+00 : bf16
    %14 = vector.broadcast %cst_7 : bf16 to vector<1x16x8xbf16>
    %15 = tpu.concatenate %14, %13, %14 in 0 : vector<1x16x8xbf16>, vector<16x16x8xbf16>, vector<1x16x8xbf16> -> vector<18x16x8xbf16>
    %cst_8 = arith.constant 0.000000e+00 : bf16
    %16 = vector.broadcast %cst_8 : bf16 to vector<18x1x8xbf16>
    %17 = tpu.concatenate %16, %15, %16 in 1 : vector<18x1x8xbf16>, vector<18x16x8xbf16>, vector<18x1x8xbf16> -> vector<18x18x8xbf16>
    %18 = vector.extract_strided_slice %17 {offsets = [0, 0, 0], sizes = [16, 16, 8], strides = [1, 1, 1]} : vector<18x18x8xbf16> to vector<16x16x8xbf16>
    %19 = vector.extract_strided_slice %17 {offsets = [0, 1, 0], sizes = [16, 16, 8], strides = [1, 1, 1]} : vector<18x18x8xbf16> to vector<16x16x8xbf16>
    %20 = vector.extract_strided_slice %17 {offsets = [0, 2, 0], sizes = [16, 16, 8], strides = [1, 1, 1]} : vector<18x18x8xbf16> to vector<16x16x8xbf16>
    %21 = vector.extract_strided_slice %17 {offsets = [1, 0, 0], sizes = [16, 16, 8], strides = [1, 1, 1]} : vector<18x18x8xbf16> to vector<16x16x8xbf16>
    %22 = vector.extract_strided_slice %17 {offsets = [1, 1, 0], sizes = [16, 16, 8], strides = [1, 1, 1]} : vector<18x18x8xbf16> to vector<16x16x8xbf16>
    %23 = vector.extract_strided_slice %17 {offsets = [1, 2, 0], sizes = [16, 16, 8], strides = [1, 1, 1]} : vector<18x18x8xbf16> to vector<16x16x8xbf16>
    %24 = vector.extract_strided_slice %17 {offsets = [2, 0, 0], sizes = [16, 16, 8], strides = [1, 1, 1]} : vector<18x18x8xbf16> to vector<16x16x8xbf16>
    %25 = vector.extract_strided_slice %17 {offsets = [2, 1, 0], sizes = [16, 16, 8], strides = [1, 1, 1]} : vector<18x18x8xbf16> to vector<16x16x8xbf16>
    %26 = vector.extract_strided_slice %17 {offsets = [2, 2, 0], sizes = [16, 16, 8], strides = [1, 1, 1]} : vector<18x18x8xbf16> to vector<16x16x8xbf16>
    %27 = tpu.concatenate %18, %19, %20, %21, %22, %23, %24, %25, %26 in 2 : vector<16x16x8xbf16>, vector<16x16x8xbf16>, vector<16x16x8xbf16>, vector<16x16x8xbf16>, vector<16x16x8xbf16>, vector<16x16x8xbf16>, vector<16x16x8xbf16>, vector<16x16x8xbf16>, vector<16x16x8xbf16> -> vector<16x16x72xbf16>
    %28 = vector.shape_cast %27 : vector<16x16x72xbf16> to vector<256x72xbf16>
    %c0_9 = arith.constant 0 : index
    %c0_10 = arith.constant 0 : index
    %29 = vector.load %arg4[%c0_9, %c0_10] : memref<72x8xbf16, #tpu.memory_space<vmem>>, vector<72x8xbf16>
    %cst_11 = arith.constant dense<0.000000e+00> : vector<256x8xf32>
    %30 = tpu.matmul %28, %29, %cst_11 {dimension_numbers = #tpu.dot_dimension_numbers<[1], [0], [0], [1], [0, 0, 1, 1], [], []>} : vector<256x72xbf16>, vector<72x8xbf16>, vector<256x8xf32> -> vector<256x8xf32>
    %cst_12 = arith.constant dense<0.000000e+00> : vector<8xf32>
    %31 = vector.multi_reduction <add>, %30, %cst_12 [0] : vector<256x8xf32> to vector<8xf32>
    %32 = vector.shape_cast %31 : vector<8xf32> to vector<1x8xf32>
    %33 = arith.mulf %30, %30 : vector<256x8xf32>
    %cst_13 = arith.constant dense<0.000000e+00> : vector<8xf32>
    %34 = vector.multi_reduction <add>, %33, %cst_13 [0] : vector<256x8xf32> to vector<8xf32>
    %35 = vector.shape_cast %34 : vector<8xf32> to vector<1x8xf32>
    %36 = tpu.concatenate %32, %35 in 0 : vector<1x8xf32>, vector<1x8xf32> -> vector<2x8xf32>
    %c0_14 = arith.constant 0 : index
    %c0_15 = arith.constant 0 : index
    %c0_16 = arith.constant 0 : index
    %37 = vector.load %arg6[%c0_14, %c0_15, %c0_16] : memref<1x2x8xf32, #tpu.memory_space<vmem>>, vector<1x2x8xf32>
    %38 = vector.shape_cast %37 : vector<1x2x8xf32> to vector<2x8xf32>
    %39 = vector.shape_cast %36 : vector<2x8xf32> to vector<1x2x8xf32>
    tpu.vector_store %arg6[%c0_14, %c0_15, %c0_16], %39 {strides = array<i32>} : memref<1x2x8xf32, #tpu.memory_space<vmem>>, vector<1x2x8xf32>,
    %40 = vector.shape_cast %30 : vector<256x8xf32> to vector<16x16x8xf32>
    %41 = arith.truncf %40 : vector<16x16x8xf32> to vector<16x16x8xbf16>
    %c0_17 = arith.constant 0 : index
    %c0_18 = arith.constant 0 : index
    %c0_19 = arith.constant 0 : index
    %c0_20 = arith.constant 0 : index
    %42 = vector.load %arg5[%c0_17, %c0_18, %c0_19, %c0_20] : memref<1x16x16x8xbf16, #tpu.memory_space<vmem>>, vector<1x16x16x8xbf16>
    %43 = vector.shape_cast %42 : vector<1x16x16x8xbf16> to vector<16x16x8xbf16>
    %44 = vector.shape_cast %41 : vector<16x16x8xbf16> to vector<1x16x16x8xbf16>
    tpu.vector_store %arg5[%c0_17, %c0_18, %c0_19, %c0_20], %44 {strides = array<i32>} : memref<1x16x16x8xbf16, #tpu.memory_space<vmem>>, vector<1x16x16x8xbf16>,
    return
  }
  func.func @transform_0(%arg0: i32) -> (i32, i32, i32, i32) {
    %c0_i32 = arith.constant 0 : i32
    %c0_i32_0 = arith.constant 0 : i32
    %c0_i32_1 = arith.constant 0 : i32
    %c0_i32_2 = arith.constant 0 : i32
    return %arg0, %c0_i32, %c0_i32_0, %c0_i32_1 : i32, i32, i32, i32
  }
  func.func @transform_1(%arg0: i32) -> (i32, i32) {
    %c0_i32 = arith.constant 0 : i32
    %c0_i32_0 = arith.constant 0 : i32
    %c0_i32_1 = arith.constant 0 : i32
    return %c0_i32, %c0_i32_0 : i32, i32
  }
  func.func @transform_2(%arg0: i32) -> (i32, i32) {
    %c0_i32 = arith.constant 0 : i32
    %c0_i32_0 = arith.constant 0 : i32
    %c0_i32_1 = arith.constant 0 : i32
    return %c0_i32, %c0_i32_0 : i32, i32
  }
  func.func @transform_3(%arg0: i32) -> (i32, i32) {
    %c0_i32 = arith.constant 0 : i32
    %c0_i32_0 = arith.constant 0 : i32
    %c0_i32_1 = arith.constant 0 : i32
    return %c0_i32, %c0_i32_0 : i32, i32
  }
  func.func @transform_4(%arg0: i32) -> (i32, i32, i32, i32) {
    %c0_i32 = arith.constant 0 : i32
    %c0_i32_0 = arith.constant 0 : i32
    %c0_i32_1 = arith.constant 0 : i32
    %c0_i32_2 = arith.constant 0 : i32
    return %arg0, %c0_i32, %c0_i32_0, %c0_i32_1 : i32, i32, i32, i32
  }
  func.func @transform_5(%arg0: i32) -> (i32, i32, i32) {
    %c0_i32 = arith.constant 0 : i32
    %c0_i32_0 = arith.constant 0 : i32
    %c0_i32_1 = arith.constant 0 : i32
    return %arg0, %c0_i32, %c0_i32_0 : i32, i32, i32
  }
}

module attributes {stable_mosaic.version = 11 : i64} {
  func.func @conv1_stats_kernel(%arg0: i32, %arg1: memref<1x16x16x4xbf16, #tpu.memory_space<vmem>>, %arg2: memref<36x8xbf16, #tpu.memory_space<vmem>>, %arg3: memref<1x16x16x8xbf16, #tpu.memory_space<vmem>>, %arg4: memref<1x2x8xf32, #tpu.memory_space<vmem>>) attributes {dimension_semantics = [#tpu.dimension_semantics<parallel>], iteration_bounds = array<i64: 2>, scalar_prefetch = 0 : i64, scratch_operands = 0 : i64, tpu.core_type = #tpu.core_type<tc>, window_params = [{transform_indices = @transform_0, window_bounds = array<i64: 1, 16, 16, 4>}, {pipeline_mode = #tpu.pipeline_mode<synchronous>, transform_indices = @transform_1, window_bounds = array<i64: 36, 8>}, {transform_indices = @transform_2, window_bounds = array<i64: 1, 16, 16, 8>}, {transform_indices = @transform_3, window_bounds = array<i64: 1, 2, 8>}]} {
    %c0 = arith.constant 0 : index
    %c0_0 = arith.constant 0 : index
    %c0_1 = arith.constant 0 : index
    %c0_2 = arith.constant 0 : index
    %0 = vector.load %arg1[%c0, %c0_0, %c0_1, %c0_2] : memref<1x16x16x4xbf16, #tpu.memory_space<vmem>>, vector<1x16x16x4xbf16>
    %1 = vector.shape_cast %0 : vector<1x16x16x4xbf16> to vector<16x16x4xbf16>
    %cst = arith.constant 0.000000e+00 : bf16
    %2 = vector.broadcast %cst : bf16 to vector<1x16x4xbf16>
    %3 = tpu.concatenate %2, %1, %2 in 0 : vector<1x16x4xbf16>, vector<16x16x4xbf16>, vector<1x16x4xbf16> -> vector<18x16x4xbf16>
    %cst_3 = arith.constant 0.000000e+00 : bf16
    %4 = vector.broadcast %cst_3 : bf16 to vector<18x1x4xbf16>
    %5 = tpu.concatenate %4, %3, %4 in 1 : vector<18x1x4xbf16>, vector<18x16x4xbf16>, vector<18x1x4xbf16> -> vector<18x18x4xbf16>
    %6 = vector.extract_strided_slice %5 {offsets = [0, 0, 0], sizes = [16, 16, 4], strides = [1, 1, 1]} : vector<18x18x4xbf16> to vector<16x16x4xbf16>
    %7 = vector.extract_strided_slice %5 {offsets = [0, 1, 0], sizes = [16, 16, 4], strides = [1, 1, 1]} : vector<18x18x4xbf16> to vector<16x16x4xbf16>
    %8 = vector.extract_strided_slice %5 {offsets = [0, 2, 0], sizes = [16, 16, 4], strides = [1, 1, 1]} : vector<18x18x4xbf16> to vector<16x16x4xbf16>
    %9 = vector.extract_strided_slice %5 {offsets = [1, 0, 0], sizes = [16, 16, 4], strides = [1, 1, 1]} : vector<18x18x4xbf16> to vector<16x16x4xbf16>
    %10 = vector.extract_strided_slice %5 {offsets = [1, 1, 0], sizes = [16, 16, 4], strides = [1, 1, 1]} : vector<18x18x4xbf16> to vector<16x16x4xbf16>
    %11 = vector.extract_strided_slice %5 {offsets = [1, 2, 0], sizes = [16, 16, 4], strides = [1, 1, 1]} : vector<18x18x4xbf16> to vector<16x16x4xbf16>
    %12 = vector.extract_strided_slice %5 {offsets = [2, 0, 0], sizes = [16, 16, 4], strides = [1, 1, 1]} : vector<18x18x4xbf16> to vector<16x16x4xbf16>
    %13 = vector.extract_strided_slice %5 {offsets = [2, 1, 0], sizes = [16, 16, 4], strides = [1, 1, 1]} : vector<18x18x4xbf16> to vector<16x16x4xbf16>
    %14 = vector.extract_strided_slice %5 {offsets = [2, 2, 0], sizes = [16, 16, 4], strides = [1, 1, 1]} : vector<18x18x4xbf16> to vector<16x16x4xbf16>
    %15 = tpu.concatenate %6, %7, %8, %9, %10, %11, %12, %13, %14 in 2 : vector<16x16x4xbf16>, vector<16x16x4xbf16>, vector<16x16x4xbf16>, vector<16x16x4xbf16>, vector<16x16x4xbf16>, vector<16x16x4xbf16>, vector<16x16x4xbf16>, vector<16x16x4xbf16>, vector<16x16x4xbf16> -> vector<16x16x36xbf16>
    %16 = vector.shape_cast %15 : vector<16x16x36xbf16> to vector<256x36xbf16>
    %c0_4 = arith.constant 0 : index
    %c0_5 = arith.constant 0 : index
    %17 = vector.load %arg2[%c0_4, %c0_5] : memref<36x8xbf16, #tpu.memory_space<vmem>>, vector<36x8xbf16>
    %cst_6 = arith.constant dense<0.000000e+00> : vector<256x8xf32>
    %18 = tpu.matmul %16, %17, %cst_6 {dimension_numbers = #tpu.dot_dimension_numbers<[1], [0], [0], [1], [0, 0, 1, 1], [], []>} : vector<256x36xbf16>, vector<36x8xbf16>, vector<256x8xf32> -> vector<256x8xf32>
    %cst_7 = arith.constant dense<0.000000e+00> : vector<8xf32>
    %19 = vector.multi_reduction <add>, %18, %cst_7 [0] : vector<256x8xf32> to vector<8xf32>
    %20 = vector.shape_cast %19 : vector<8xf32> to vector<1x8xf32>
    %21 = arith.mulf %18, %18 : vector<256x8xf32>
    %cst_8 = arith.constant dense<0.000000e+00> : vector<8xf32>
    %22 = vector.multi_reduction <add>, %21, %cst_8 [0] : vector<256x8xf32> to vector<8xf32>
    %23 = vector.shape_cast %22 : vector<8xf32> to vector<1x8xf32>
    %24 = tpu.concatenate %20, %23 in 0 : vector<1x8xf32>, vector<1x8xf32> -> vector<2x8xf32>
    %c0_9 = arith.constant 0 : index
    %c0_10 = arith.constant 0 : index
    %c0_11 = arith.constant 0 : index
    %25 = vector.load %arg4[%c0_9, %c0_10, %c0_11] : memref<1x2x8xf32, #tpu.memory_space<vmem>>, vector<1x2x8xf32>
    %26 = vector.shape_cast %25 : vector<1x2x8xf32> to vector<2x8xf32>
    %27 = vector.shape_cast %24 : vector<2x8xf32> to vector<1x2x8xf32>
    tpu.vector_store %arg4[%c0_9, %c0_10, %c0_11], %27 {strides = array<i32>} : memref<1x2x8xf32, #tpu.memory_space<vmem>>, vector<1x2x8xf32>,
    %28 = vector.shape_cast %18 : vector<256x8xf32> to vector<16x16x8xf32>
    %29 = arith.truncf %28 : vector<16x16x8xf32> to vector<16x16x8xbf16>
    %c0_12 = arith.constant 0 : index
    %c0_13 = arith.constant 0 : index
    %c0_14 = arith.constant 0 : index
    %c0_15 = arith.constant 0 : index
    %30 = vector.load %arg3[%c0_12, %c0_13, %c0_14, %c0_15] : memref<1x16x16x8xbf16, #tpu.memory_space<vmem>>, vector<1x16x16x8xbf16>
    %31 = vector.shape_cast %30 : vector<1x16x16x8xbf16> to vector<16x16x8xbf16>
    %32 = vector.shape_cast %29 : vector<16x16x8xbf16> to vector<1x16x16x8xbf16>
    tpu.vector_store %arg3[%c0_12, %c0_13, %c0_14, %c0_15], %32 {strides = array<i32>} : memref<1x16x16x8xbf16, #tpu.memory_space<vmem>>, vector<1x16x16x8xbf16>,
    return
  }
  func.func @transform_0(%arg0: i32) -> (i32, i32, i32, i32) {
    %c0_i32 = arith.constant 0 : i32
    %c0_i32_0 = arith.constant 0 : i32
    %c0_i32_1 = arith.constant 0 : i32
    %c0_i32_2 = arith.constant 0 : i32
    return %arg0, %c0_i32, %c0_i32_0, %c0_i32_1 : i32, i32, i32, i32
  }
  func.func @transform_1(%arg0: i32) -> (i32, i32) {
    %c0_i32 = arith.constant 0 : i32
    %c0_i32_0 = arith.constant 0 : i32
    %c0_i32_1 = arith.constant 0 : i32
    return %c0_i32, %c0_i32_0 : i32, i32
  }
  func.func @transform_2(%arg0: i32) -> (i32, i32, i32, i32) {
    %c0_i32 = arith.constant 0 : i32
    %c0_i32_0 = arith.constant 0 : i32
    %c0_i32_1 = arith.constant 0 : i32
    %c0_i32_2 = arith.constant 0 : i32
    return %arg0, %c0_i32, %c0_i32_0, %c0_i32_1 : i32, i32, i32, i32
  }
  func.func @transform_3(%arg0: i32) -> (i32, i32, i32) {
    %c0_i32 = arith.constant 0 : i32
    %c0_i32_0 = arith.constant 0 : i32
    %c0_i32_1 = arith.constant 0 : i32
    return %arg0, %c0_i32, %c0_i32_0 : i32, i32, i32
  }
}

module attributes {stable_mosaic.version = 11 : i64} {
  func.func @bn2_pool_kernel(%arg0: i32, %arg1: memref<1x16x16x8xbf16, #tpu.memory_space<vmem>>, %arg2: memref<1x8xf32, #tpu.memory_space<vmem>>, %arg3: memref<1x8xf32, #tpu.memory_space<vmem>>, %arg4: memref<1x16x16x8xf32, #tpu.memory_space<vmem>>, %arg5: memref<1x8x8x8xf32, #tpu.memory_space<vmem>>) attributes {dimension_semantics = [#tpu.dimension_semantics<parallel>], iteration_bounds = array<i64: 2>, scalar_prefetch = 0 : i64, scratch_operands = 0 : i64, tpu.core_type = #tpu.core_type<tc>, window_params = [{transform_indices = @transform_0, window_bounds = array<i64: 1, 16, 16, 8>}, {pipeline_mode = #tpu.pipeline_mode<synchronous>, transform_indices = @transform_1, window_bounds = array<i64: 1, 8>}, {pipeline_mode = #tpu.pipeline_mode<synchronous>, transform_indices = @transform_2, window_bounds = array<i64: 1, 8>}, {transform_indices = @transform_3, window_bounds = array<i64: 1, 16, 16, 8>}, {transform_indices = @transform_4, window_bounds = array<i64: 1, 8, 8, 8>}]} {
    %c0 = arith.constant 0 : index
    %c0_0 = arith.constant 0 : index
    %c0_1 = arith.constant 0 : index
    %c0_2 = arith.constant 0 : index
    %0 = vector.load %arg1[%c0, %c0_0, %c0_1, %c0_2] : memref<1x16x16x8xbf16, #tpu.memory_space<vmem>>, vector<1x16x16x8xbf16>
    %1 = vector.shape_cast %0 : vector<1x16x16x8xbf16> to vector<16x16x8xbf16>
    %2 = arith.extf %1 : vector<16x16x8xbf16> to vector<16x16x8xf32>
    %c0_3 = arith.constant 0 : index
    %c0_4 = arith.constant 0 : index
    %3 = vector.load %arg2[%c0_3, %c0_4] : memref<1x8xf32, #tpu.memory_space<vmem>>, vector<1x8xf32>
    %4 = vector.shape_cast %3 : vector<1x8xf32> to vector<1x1x8xf32>
    %5 = vector.broadcast %4 : vector<1x1x8xf32> to vector<16x16x8xf32>
    %6 = arith.mulf %2, %5 : vector<16x16x8xf32>
    %c0_5 = arith.constant 0 : index
    %c0_6 = arith.constant 0 : index
    %7 = vector.load %arg3[%c0_5, %c0_6] : memref<1x8xf32, #tpu.memory_space<vmem>>, vector<1x8xf32>
    %8 = vector.shape_cast %7 : vector<1x8xf32> to vector<1x1x8xf32>
    %9 = vector.broadcast %8 : vector<1x1x8xf32> to vector<16x16x8xf32>
    %10 = arith.addf %6, %9 : vector<16x16x8xf32>
    %cst = arith.constant 0.000000e+00 : f32
    %11 = vector.broadcast %cst : f32 to vector<16x16x8xf32>
    %12 = arith.maximumf %10, %11 : vector<16x16x8xf32>
    %c0_7 = arith.constant 0 : index
    %c0_8 = arith.constant 0 : index
    %c0_9 = arith.constant 0 : index
    %c0_10 = arith.constant 0 : index
    %13 = vector.load %arg4[%c0_7, %c0_8, %c0_9, %c0_10] : memref<1x16x16x8xf32, #tpu.memory_space<vmem>>, vector<1x16x16x8xf32>
    %14 = vector.shape_cast %13 : vector<1x16x16x8xf32> to vector<16x16x8xf32>
    %15 = vector.shape_cast %12 : vector<16x16x8xf32> to vector<1x16x16x8xf32>
    tpu.vector_store %arg4[%c0_7, %c0_8, %c0_9, %c0_10], %15 {strides = array<i32>} : memref<1x16x16x8xf32, #tpu.memory_space<vmem>>, vector<1x16x16x8xf32>,
    %16 = vector.shape_cast %12 : vector<16x16x8xf32> to vector<8x2x16x8xf32>
    %cst_11 = arith.constant dense<0xFF800000> : vector<8x16x8xf32>
    %17 = vector.multi_reduction <maximumf>, %16, %cst_11 [1] : vector<8x2x16x8xf32> to vector<8x16x8xf32>
    %18 = vector.shape_cast %17 : vector<8x16x8xf32> to vector<8x8x2x8xf32>
    %cst_12 = arith.constant dense<0xFF800000> : vector<8x8x8xf32>
    %19 = vector.multi_reduction <maximumf>, %18, %cst_12 [2] : vector<8x8x2x8xf32> to vector<8x8x8xf32>
    %c0_13 = arith.constant 0 : index
    %c0_14 = arith.constant 0 : index
    %c0_15 = arith.constant 0 : index
    %c0_16 = arith.constant 0 : index
    %20 = vector.load %arg5[%c0_13, %c0_14, %c0_15, %c0_16] : memref<1x8x8x8xf32, #tpu.memory_space<vmem>>, vector<1x8x8x8xf32>
    %21 = vector.shape_cast %20 : vector<1x8x8x8xf32> to vector<8x8x8xf32>
    %22 = vector.shape_cast %19 : vector<8x8x8xf32> to vector<1x8x8x8xf32>
    tpu.vector_store %arg5[%c0_13, %c0_14, %c0_15, %c0_16], %22 {strides = array<i32>} : memref<1x8x8x8xf32, #tpu.memory_space<vmem>>, vector<1x8x8x8xf32>,
    return
  }
  func.func @transform_0(%arg0: i32) -> (i32, i32, i32, i32) {
    %c0_i32 = arith.constant 0 : i32
    %c0_i32_0 = arith.constant 0 : i32
    %c0_i32_1 = arith.constant 0 : i32
    %c0_i32_2 = arith.constant 0 : i32
    return %arg0, %c0_i32, %c0_i32_0, %c0_i32_1 : i32, i32, i32, i32
  }
  func.func @transform_1(%arg0: i32) -> (i32, i32) {
    %c0_i32 = arith.constant 0 : i32
    %c0_i32_0 = arith.constant 0 : i32
    %c0_i32_1 = arith.constant 0 : i32
    return %c0_i32, %c0_i32_0 : i32, i32
  }
  func.func @transform_2(%arg0: i32) -> (i32, i32) {
    %c0_i32 = arith.constant 0 : i32
    %c0_i32_0 = arith.constant 0 : i32
    %c0_i32_1 = arith.constant 0 : i32
    return %c0_i32, %c0_i32_0 : i32, i32
  }
  func.func @transform_3(%arg0: i32) -> (i32, i32, i32, i32) {
    %c0_i32 = arith.constant 0 : i32
    %c0_i32_0 = arith.constant 0 : i32
    %c0_i32_1 = arith.constant 0 : i32
    %c0_i32_2 = arith.constant 0 : i32
    return %arg0, %c0_i32, %c0_i32_0, %c0_i32_1 : i32, i32, i32, i32
  }
  func.func @transform_4(%arg0: i32) -> (i32, i32, i32, i32) {
    %c0_i32 = arith.constant 0 : i32
    %c0_i32_0 = arith.constant 0 : i32
    %c0_i32_1 = arith.constant 0 : i32
    %c0_i32_2 = arith.constant 0 : i32
    return %arg0, %c0_i32, %c0_i32_0, %c0_i32_1 : i32, i32, i32, i32
  }
}

</mosaic_0001>

<bundles_post_ra>
// kernel: encoder_block_forward.5
= control target key start
LH: loop header
LB: loop body
LE: loop exit
PB: predicated region body
PF: predicated region fallthrough
CT: control target
= control target key end

     0   :  { %s1390_s15 = smov 0   ;;  %s2027_s0 = inlined_call_operand.vmem [shape: bf16[2,16,16,8], index: 0, kind: input, shape index: {}]   ;;  %s2028_s1 = inlined_call_operand.vmem [shape: f32[1,8], index: 1, kind: input, shape index: {}]   ;;  %s2029_s2 = inlined_call_operand.vmem [shape: f32[1,8], index: 2, kind: input, shape index: {}]   ;;  %s2030_s3 = inlined_call_operand.vmem [shape: f32[2,16,16,8], index: 3, kind: output, shape index: {0}]   ;;  %s2031_s4 = inlined_call_operand.vmem [shape: f32[2,8,8,8], index: 4, kind: output, shape index: {1}]  }
   0x1 LB: > { %s1252_s16 = sadd.s32 4294967295, %s1363_s15   ;;  %p1256_p0 = scmp.ge.s32.totalorder %s1363_s15, 1  ;;  %s1363_s15 = sphi %s1390_s15, %s15_s15  }
   0x2   : > { %p165_p1 = scmp.lt.s32.totalorder %s1363_s15, 3 }
   0x4   : > { %p166_p2 = pnand %p1256_p0, %p165_p1 }
   0x6   : > { %169 = sbr.rel (%p166_p2) target bundleno = 207 (0xcf), region = 32 }
   0xb   : > { %p196_p3 = scmp.lt.s32.totalorder %s1252_s16, 1  ;;  %v1409_v0 = vld [vmem:[%s2028_s1] ss:$0 sm:$0xff]  ;;  %vm379_vm0 = vcmask 64512   ;;  %vm572_vm1 = vcmask 58368   ;;  %vm1085_vm2 = vcmask 1041409  }
   0xc   : > { %v1417_v5 = vld [vmem:[%s2029_s2] ss:$0 sm:$0xff]  ;;  %vm1087_vm3 = vcmask 1042434   ;;  %vm1089_vm4 = vcmask 1043459   ;;  %vm1091_vm5 = vcmask 1044484   ;;  %vm1093_vm6 = vcmask 1045509  }
   0xd   : > { %s2067_s16 = smov (!%p196_p3, %s1252_s16), 1  ;;  %vm1095_vm7 = vcmask 1046534   ;;  %vm1097_vm8 = vcmask 1047559  }
   0xe   : > { %s1265_s17 = sshll.u32 %s2067_s16, 7  ;;  %s1266_s25 = sshll.u32 %s2067_s16, 8 }
   0xf   : > { %s1404_s20 = scalar_lea.vmem %s2027_s0, %s1265_s17  ;;  %s1436_s28 = scalar_lea.vmem %s2030_s3, %s1266_s25 }
  0x10   : > { %v1269_v1 = vld [vmem:[%s1404_s20] sm:$0xff]   ;;  %v1332_v2 = vld [vmem:[%s1404_s20 + $0x8] sm:$0xff]   ;;  %v1333_v3 = vld [vmem:[%s1404_s20 + $0x10] sm:$0xff]   ;;  %s1267_s29 = sshll.u32 %s2067_s16, 6 }
  0x11   : > { %v1270_v4 = vunpack.c.l.bf16 %v1269_v1  ;;  %v1271_v6 = vunpack.c.h.bf16 %v1269_v1  ;;  %v1274_v7 = vunpack.c.l.bf16 %v1332_v2  ;;  %v1275_v8 = vunpack.c.h.bf16 %v1332_v2  ;;  %v1334_v9 = vld [vmem:[%s1404_s20 + $0x18] sm:$0xff]   ;;  %v1443_v38 = vld [vmem:[%s1404_s20 + $0x20] sm:$0xff]   ;;  %s1833_s6 = scalar_lea.vmem %s2031_s4, %s1267_s29 }
  0x12   : > { %v1278_v10 = vunpack.c.l.bf16 %v1333_v3  ;;  %v1279_v11 = vunpack.c.h.bf16 %v1333_v3  ;;  %v1282_v12 = vunpack.c.l.bf16 %v1334_v9  ;;  %v1283_v13 = vunpack.c.h.bf16 %v1334_v9 }
  0x13   : > { %v279_v14 = vmul.f32 %v1409_v0, %v1270_v4  ;;  %v280_v15 = vmul.f32 %v1409_v0, %v1271_v6  ;;  %v281_v16 = vmul.f32 %v1409_v0, %v1274_v7  ;;  %v282_v17 = vmul.f32 %v1409_v0, %v1275_v8 }
  0x14   : > { %v283_v18 = vmul.f32 %v1409_v0, %v1278_v10  ;;  %v284_v19 = vmul.f32 %v1409_v0, %v1279_v11  ;;  %v285_v20 = vmul.f32 %v1409_v0, %v1282_v12  ;;  %v286_v21 = vmul.f32 %v1409_v0, %v1283_v13 }
  0x15   : > { %v315_v22 = vadd.f32 %v1417_v5, %v279_v14  ;;  %v316_v23 = vadd.f32 %v1417_v5, %v280_v15  ;;  %v317_v24 = vadd.f32 %v1417_v5, %v281_v16  ;;  %v318_v25 = vadd.f32 %v1417_v5, %v282_v17 }
  0x16   : > { %v319_v26 = vadd.f32 %v1417_v5, %v283_v18  ;;  %v320_v27 = vadd.f32 %v1417_v5, %v284_v19  ;;  %v321_v28 = vadd.f32 %v1417_v5, %v285_v20  ;;  %v322_v29 = vadd.f32 %v1417_v5, %v286_v21 }
  0x17   : > { %v347_v30 = vmax.f32 %v315_v22, 0.0  ;;  %v348_v31 = vmax.f32 %v316_v23, 0.0  ;;  %v349_v32 = vmax.f32 %v317_v24, 0.0  ;;  %v350_v33 = vmax.f32 %v318_v25, 0.0 }
  0x18   : > { %v351_v34 = vmax.f32 %v319_v26, 0.0  ;;  %v352_v35 = vmax.f32 %v320_v27, 0.0  ;;  %v353_v36 = vmax.f32 %v321_v28, 0.0  ;;  %v354_v37 = vmax.f32 %v322_v29, 0.0  ;;  %v1336_v29 = vld [vmem:[%s1404_s20 + $0x28] sm:$0xff]  }
  0x19   : > { %380 = vst.msk [vmem:[%s1436_s28] sm:$0xff] %vm379_vm0, %v347_v30  ;;  %v412_v39 = vsel %vm379_vm0, %v347_v30, -inf  ;;  %v415_v40 = vsel %vm379_vm0, %v348_v31, -inf  ;;  %v413_v41 = vsel %vm379_vm0, %v349_v32, -inf  ;;  %v416_v42 = vsel %vm379_vm0, %v350_v33, -inf }
  0x1a   : > { %381 = vst.msk [vmem:[%s1436_s28 + $0x8] sm:$0xff] %vm379_vm0, %v348_v31  ;;  %v414_v43 = vmax.f32 %v412_v39, %v413_v41  ;;  %v1453_v44 = vmax.f32 %v415_v40, %v416_v42  ;;  %v418_v45 = vsel %vm379_vm0, %v351_v34, -inf  ;;  %v421_v46 = vsel %vm379_vm0, %v352_v35, -inf  ;;  %v1337_v42 = vld [vmem:[%s1404_s20 + $0x30] sm:$0xff]  }
  0x1b   : > { %382 = vst.msk [vmem:[%s1436_s28 + $0x10] sm:$0xff] %vm379_vm0, %v349_v32  ;;  %v419_v47 = vsel %vm379_vm0, %v353_v36, -inf  ;;  %v422_v48 = vsel %vm379_vm0, %v354_v37, -inf  ;;  %v1286_v49 = vunpack.c.l.bf16 %v1443_v38  ;;  %v1287_v50 = vunpack.c.h.bf16 %v1443_v38 }
  0x1c   : > { %v476_v51 = vrot.slane %v414_v43, 2  ;;  %v477_v52 = vrot.slane %v414_v43, 4  ;;  %v478_v53 = vrot.slane %v414_v43, 6  ;;  %v573_v54 = vsel %vm572_vm1, %v414_v43, -inf  ;;  %383 = vst.msk [vmem:[%s1436_s28 + $0x18] sm:$0xff] %vm379_vm0, %v350_v33 }
  0x1d   : > { %v574_v55 = vrot.slane %v573_v54, 4  ;;  %v601_v58 = vsel %vm572_vm1, %v1453_v44, -inf  ;;  %384 = vst.msk [vmem:[%s1436_s28 + $0x20] sm:$0xff] %vm379_vm0, %v351_v34  ;;  %v420_v6 = vmax.f32 %v418_v45, %v419_v47  ;;  %v1483_v7 = vmax.f32 %v421_v46, %v422_v48 }
  0x1e   : > { %v580_v59 = vsel %vm572_vm1, %v476_v51, -inf  ;;  %v587_v60 = vsel %vm572_vm1, %v477_v52, -inf  ;;  %v594_v61 = vsel %vm572_vm1, %v478_v53, -inf  ;;  %v602_v62 = vrot.slane %v601_v58, 4  ;;  %385 = vst.msk [vmem:[%s1436_s28 + $0x28] sm:$0xff] %vm379_vm0, %v352_v35  ;;  %v1338_v53 = vld [vmem:[%s1404_s20 + $0x38] sm:$0xff]  }
  0x1f   : > { %v575_v63 = vmax.f32 %v573_v54, %v574_v55  ;;  %v581_v1 = vrot.slane %v580_v59, 4  ;;  %v588_v2 = vrot.slane %v587_v60, 4  ;;  %v595_v3 = vrot.slane %v594_v61, 4  ;;  %386 = vst.msk [vmem:[%s1436_s28 + $0x30] sm:$0xff] %vm379_vm0, %v353_v36  ;;  %v1339_v54 = vld [vmem:[%s1404_s20 + $0x40] sm:$0xff]  }
  0x20   : > { %v1479_v4 = vmax.f32 %v601_v58, %v602_v62  ;;  %387 = vst.msk [vmem:[%s1436_s28 + $0x38] sm:$0xff] %vm379_vm0, %v354_v37  ;;  %v287_v8 = vmul.f32 %v1409_v0, %v1286_v49  ;;  %v482_v13 = vrot.slane %v420_v6, 2  ;;  %v483_v14 = vrot.slane %v420_v6, 4 }
  0x21   : > { %v576_v9 = vrot.slane %v575_v63, 2  ;;  %v582_v10 = vmax.f32 %v580_v59, %v581_v1  ;;  %v1486_v11 = vmax.f32 %v587_v60, %v588_v2  ;;  %v1488_v12 = vmax.f32 %v594_v61, %v595_v3 }
  0x22   : > { %v484_v15 = vrot.slane %v420_v6, 6  ;;  %v629_v16 = vsel %vm572_vm1, %v420_v6, -inf  ;;  %v636_v21 = vsel %vm572_vm1, %v482_v13, -inf  ;;  %v643_v22 = vsel %vm572_vm1, %v483_v14, -inf }
  0x23   : > { %v1491_v17 = vmax.f32 %v575_v63, %v576_v9  ;;  %v583_v18 = vrot.slane %v582_v10, 2  ;;  %v590_v19 = vrot.slane %v1486_v11, 2  ;;  %v630_v20 = vrot.slane %v629_v16, 4 }
  0x24   : > { %v650_v23 = vsel %vm572_vm1, %v484_v15, -inf  ;;  %v637_v28 = vrot.slane %v636_v21, 4  ;;  %v644_v30 = vrot.slane %v643_v22, 4  ;;  %v657_v33 = vsel %vm572_vm1, %v1483_v7, -inf }
  0x25   : > { %v578_v25 = vrot.slane %v1491_v17, 1  ;;  %v1499_v26 = vmax.f32 %v582_v10, %v583_v18  ;;  %v631_v27 = vmax.f32 %v629_v16, %v630_v20  ;;  %v651_v31 = vrot.slane %v650_v23, 4 }
  0x26   : > { %v638_v35 = vmax.f32 %v636_v21, %v637_v28  ;;  %v658_v36 = vrot.slane %v657_v33, 4  ;;  %v323_v37 = vadd.f32 %v1417_v5, %v287_v8  ;;  %v1506_v38 = vmax.f32 %v643_v22, %v644_v30 }
  0x27   : > { %v632_v34 = vrot.slane %v631_v27, 2  ;;  %v1508_v39 = vmax.f32 %v650_v23, %v651_v31  ;;  %v288_v40 = vmul.f32 %v1409_v0, %v1287_v50  ;;  %v1290_v41 = vunpack.c.l.bf16 %v1336_v29 }
  0x28   : > { %v639_v45 = vrot.slane %v638_v35, 2  ;;  %v1514_v46 = vmax.f32 %v657_v33, %v658_v36  ;;  %v355_v47 = vmax.f32 %v323_v37, 0.0  ;;  %v1291_v52 = vunpack.c.h.bf16 %v1336_v29 }
  0x29   : > { %v1512_v43 = vmax.f32 %v631_v27, %v632_v34  ;;  %v324_v49 = vadd.f32 %v1417_v5, %v288_v40  ;;  %v289_v51 = vmul.f32 %v1409_v0, %v1290_v41  ;;  %v1294_v59 = vunpack.c.l.bf16 %v1337_v42 }
  0x2a   : > { %v1522_v55 = vmax.f32 %v638_v35, %v639_v45  ;;  %388 = vst.msk [vmem:[%s1436_s28 + $0x40] sm:$0xff] %vm379_vm0, %v355_v47  ;;  %v424_v58 = vsel %vm379_vm0, %v355_v47, -inf  ;;  %v290_v62 = vmul.f32 %v1409_v0, %v1291_v52  ;;  %v1295_v63 = vunpack.c.h.bf16 %v1337_v42 }
  0x2b   : > { %v356_v60 = vmax.f32 %v324_v49, 0.0  ;;  %v325_v61 = vadd.f32 %v1417_v5, %v289_v51  ;;  %v291_v1 = vmul.f32 %v1409_v0, %v1294_v59  ;;  %v1298_v2 = vunpack.c.l.bf16 %v1338_v53 }
  0x2c   : > { %v1299_v3 = vunpack.c.h.bf16 %v1338_v53  ;;  %v1302_v6 = vunpack.c.l.bf16 %v1339_v54  ;;  %v326_v10 = vadd.f32 %v1417_v5, %v290_v62  ;;  %v292_v13 = vmul.f32 %v1409_v0, %v1295_v63 }
  0x2d   : > { %389 = vst.msk [vmem:[%s1436_s28 + $0x48] sm:$0xff] %vm379_vm0, %v356_v60  ;;  %v427_v8 = vsel %vm379_vm0, %v356_v60, -inf  ;;  %v357_v9 = vmax.f32 %v325_v61, 0.0  ;;  %v327_v14 = vadd.f32 %v1417_v5, %v291_v1  ;;  %v293_v15 = vmul.f32 %v1409_v0, %v1298_v2 }
  0x2e   : > { %v294_v16 = vmul.f32 %v1409_v0, %v1299_v3  ;;  %v295_v18 = vmul.f32 %v1409_v0, %v1302_v6  ;;  %v358_v21 = vmax.f32 %v326_v10, 0.0  ;;  %v328_v22 = vadd.f32 %v1417_v5, %v292_v13 }
  0x2f   : > { %390 = vst.msk [vmem:[%s1436_s28 + $0x50] sm:$0xff] %vm379_vm0, %v357_v9  ;;  %v425_v20 = vsel %vm379_vm0, %v357_v9, -inf  ;;  %v1303_v23 = vunpack.c.h.bf16 %v1339_v54  ;;  %v359_v28 = vmax.f32 %v327_v14, 0.0  ;;  %v329_v29 = vadd.f32 %v1417_v5, %v293_v15 }
  0x30   : > { %v426_v27 = vmax.f32 %v424_v58, %v425_v20  ;;  %v330_v30 = vadd.f32 %v1417_v5, %v294_v16  ;;  %391 = vst.msk [vmem:[%s1436_s28 + $0x58] sm:$0xff] %vm379_vm0, %v358_v21  ;;  %v428_v31 = vsel %vm379_vm0, %v358_v21, -inf  ;;  %v360_v33 = vmax.f32 %v328_v22, 0.0 }
  0x31   : > { %v331_v34 = vadd.f32 %v1417_v5, %v295_v18  ;;  %v296_v35 = vmul.f32 %v1409_v0, %v1303_v23  ;;  %392 = vst.msk [vmem:[%s1436_s28 + $0x60] sm:$0xff] %vm379_vm0, %v359_v28  ;;  %v1553_v45 = vmax.f32 %v427_v8, %v428_v31  ;;  %v430_v47 = vsel %vm379_vm0, %v359_v28, -inf }
  0x32   : > { %v488_v36 = vrot.slane %v426_v27, 2  ;;  %v489_v37 = vrot.slane %v426_v27, 4  ;;  %v490_v40 = vrot.slane %v426_v27, 6  ;;  %v685_v41 = vsel %vm572_vm1, %v426_v27, -inf  ;;  %393 = vst.msk [vmem:[%s1436_s28 + $0x68] sm:$0xff] %vm379_vm0, %v360_v33 }
  0x33   : > { %v686_v42 = vrot.slane %v685_v41, 4  ;;  %v433_v49 = vsel %vm379_vm0, %v360_v33, -inf  ;;  %v361_v54 = vmax.f32 %v329_v29, 0.0  ;;  %v713_v1 = vsel %vm572_vm1, %v1553_v45, -inf }
  0x34   : > { %v692_v51 = vsel %vm572_vm1, %v488_v36, -inf  ;;  %v699_v52 = vsel %vm572_vm1, %v489_v37, -inf  ;;  %v706_v53 = vsel %vm572_vm1, %v490_v40, -inf  ;;  %v714_v10 = vrot.slane %v713_v1, 4 }
  0x35   : > { %v687_v58 = vmax.f32 %v685_v41, %v686_v42  ;;  %v693_v59 = vrot.slane %v692_v51, 4  ;;  %v700_v60 = vrot.slane %v699_v52, 4  ;;  %v707_v61 = vrot.slane %v706_v53, 4  ;;  %394 = vst.msk [vmem:[%s1436_s28 + $0x70] sm:$0xff] %vm379_vm0, %v361_v54 }
  0x36   : > { %v431_v2 = vsel %vm379_vm0, %v361_v54, -inf  ;;  %v362_v14 = vmax.f32 %v330_v30, 0.0  ;;  %v363_v15 = vmax.f32 %v331_v34, 0.0  ;;  %v332_v21 = vadd.f32 %v1417_v5, %v296_v35  ;;  %v1340_v34 = vld [vmem:[%s1404_s20 + $0x48] sm:$0xff]  }
  0x37   : > { %v688_v3 = vrot.slane %v687_v58, 2  ;;  %v694_v6 = vmax.f32 %v692_v51, %v693_v59  ;;  %v1569_v8 = vmax.f32 %v699_v52, %v700_v60  ;;  %v1571_v9 = vmax.f32 %v706_v53, %v707_v61 }
  0x38   : > { %v432_v13 = vmax.f32 %v430_v47, %v431_v2  ;;  %v1577_v22 = vmax.f32 %v713_v1, %v714_v10  ;;  %395 = vst.msk [vmem:[%s1436_s28 + $0x78] sm:$0xff] %vm379_vm0, %v362_v14  ;;  %v434_v33 = vsel %vm379_vm0, %v362_v14, -inf  ;;  %v436_v53 = vsel %vm379_vm0, %v363_v15, -inf  ;;  %v1341_v2 = vld [vmem:[%s1404_s20 + $0x50] sm:$0xff]  }
  0x39   : > { %v1573_v16 = vmax.f32 %v687_v58, %v688_v3  ;;  %v695_v18 = vrot.slane %v694_v6, 2  ;;  %396 = vst.msk [vmem:[%s1436_s28 + $0x80] sm:$0xff] %vm379_vm0, %v363_v15  ;;  %v1592_v51 = vmax.f32 %v433_v49, %v434_v33  ;;  %v364_v54 = vmax.f32 %v332_v21, 0.0  ;;  %v1343_v33 = vld [vmem:[%s1404_s20 + $0x60] sm:$0xff]  }
  0x3a   : > { %v494_v23 = vrot.slane %v432_v13, 2  ;;  %v495_v27 = vrot.slane %v432_v13, 4  ;;  %v496_v28 = vrot.slane %v432_v13, 6  ;;  %v741_v30 = vsel %vm572_vm1, %v432_v13, -inf  ;;  %v1342_v13 = vld [vmem:[%s1404_s20 + $0x58] sm:$0xff]  }
  0x3b   : > { %v1582_v31 = vmax.f32 %v694_v6, %v695_v18  ;;  %v742_v36 = vrot.slane %v741_v30, 4  ;;  %v1306_v58 = vunpack.c.l.bf16 %v1340_v34  ;;  %v769_v49 = vsel %vm572_vm1, %v1592_v51, -inf  ;;  %397 = vst.msk [vmem:[%s1436_s28 + $0x88] sm:$0xff] %vm379_vm0, %v364_v54 }
  0x3c   : > { %v748_v35 = vsel %vm572_vm1, %v494_v23, -inf  ;;  %v755_v37 = vsel %vm572_vm1, %v495_v27, -inf  ;;  %v762_v40 = vsel %vm572_vm1, %v496_v28, -inf  ;;  %v439_v10 = vsel %vm379_vm0, %v364_v54, -inf }
  0x3d   : > { %v749_v41 = vrot.slane %v748_v35, 4  ;;  %v756_v42 = vrot.slane %v755_v37, 4  ;;  %v763_v47 = vrot.slane %v762_v40, 4  ;;  %v743_v52 = vmax.f32 %v741_v30, %v742_v36 }
  0x3e   : > { %v770_v18 = vrot.slane %v769_v49, 4  ;;  %v297_v21 = vmul.f32 %v1409_v0, %v1306_v58  ;;  %v1307_v27 = vunpack.c.h.bf16 %v1340_v34  ;;  %v1310_v28 = vunpack.c.l.bf16 %v1341_v2 }
  0x3f   : > { %v750_v59 = vmax.f32 %v748_v35, %v749_v41  ;;  %v1595_v60 = vmax.f32 %v755_v37, %v756_v42  ;;  %v1597_v61 = vmax.f32 %v762_v40, %v763_v47  ;;  %v744_v3 = vrot.slane %v743_v52, 2 }
  0x40   : > { %v1311_v30 = vunpack.c.h.bf16 %v1341_v2  ;;  %v1615_v35 = vmax.f32 %v769_v49, %v770_v18  ;;  %v333_v37 = vadd.f32 %v1417_v5, %v297_v21  ;;  %v1314_v40 = vunpack.c.l.bf16 %v1342_v13 }
  0x41   : > { %v751_v14 = vrot.slane %v750_v59, 2  ;;  %v1610_v23 = vmax.f32 %v743_v52, %v744_v3  ;;  %v298_v42 = vmul.f32 %v1409_v0, %v1307_v27  ;;  %v299_v47 = vmul.f32 %v1409_v0, %v1310_v28 }
  0x42   : > { %v300_v52 = vmul.f32 %v1409_v0, %v1311_v30  ;;  %v365_v34 = vmax.f32 %v333_v37, 0.0  ;;  %v301_v54 = vmul.f32 %v1409_v0, %v1314_v40  ;;  %v1315_v58 = vunpack.c.h.bf16 %v1342_v13 }
  0x43   : > { %v1613_v36 = vmax.f32 %v750_v59, %v751_v14  ;;  %v1318_v59 = vunpack.c.l.bf16 %v1343_v33  ;;  %v334_v2 = vadd.f32 %v1417_v5, %v298_v42  ;;  %v335_v3 = vadd.f32 %v1417_v5, %v299_v47 }
  0x44   : > { %v336_v49 = vadd.f32 %v1417_v5, %v300_v52  ;;  %v1319_v14 = vunpack.c.h.bf16 %v1343_v33  ;;  %398 = vst.msk [vmem:[%s1436_s28 + $0x90] sm:$0xff] %vm379_vm0, %v365_v34  ;;  %v437_v18 = vsel %vm379_vm0, %v365_v34, -inf  ;;  %v337_v21 = vadd.f32 %v1417_v5, %v301_v54 }
  0x45   : > { %v302_v27 = vmul.f32 %v1409_v0, %v1315_v58  ;;  %v303_v28 = vmul.f32 %v1409_v0, %v1318_v59  ;;  %v438_v13 = vmax.f32 %v436_v53, %v437_v18  ;;  %v366_v30 = vmax.f32 %v334_v2, 0.0 }
  0x46   : > { %v367_v37 = vmax.f32 %v335_v3, 0.0  ;;  %v368_v40 = vmax.f32 %v336_v49, 0.0  ;;  %v369_v42 = vmax.f32 %v337_v21, 0.0  ;;  %v304_v52 = vmul.f32 %v1409_v0, %v1319_v14 }
  0x47   : > { %v338_v47 = vadd.f32 %v1417_v5, %v302_v27  ;;  %v339_v33 = vadd.f32 %v1417_v5, %v303_v28  ;;  %v500_v34 = vrot.slane %v438_v13, 2  ;;  %v501_v6 = vrot.slane %v438_v13, 4  ;;  %399 = vst.msk [vmem:[%s1436_s28 + $0x98] sm:$0xff] %vm379_vm0, %v366_v30 }
  0x48   : > { %v502_v54 = vrot.slane %v438_v13, 6  ;;  %v797_v58 = vsel %vm572_vm1, %v438_v13, -inf  ;;  %v440_v59 = vsel %vm379_vm0, %v366_v30, -inf  ;;  %400 = vst.msk [vmem:[%s1436_s28 + $0xa0] sm:$0xff] %vm379_vm0, %v367_v37  ;;  %v442_v2 = vsel %vm379_vm0, %v367_v37, -inf }
  0x49   : > { %v798_v53 = vrot.slane %v797_v58, 4  ;;  %v445_v3 = vsel %vm379_vm0, %v368_v40, -inf  ;;  %v804_v49 = vsel %vm572_vm1, %v500_v34, -inf  ;;  %v811_v14 = vsel %vm572_vm1, %v501_v6, -inf  ;;  %401 = vst.msk [vmem:[%s1436_s28 + $0xa8] sm:$0xff] %vm379_vm0, %v368_v40 }
  0x4a   : > { %v818_v18 = vsel %vm572_vm1, %v502_v54, -inf  ;;  %v1646_v21 = vmax.f32 %v439_v10, %v440_v59  ;;  %v805_v28 = vrot.slane %v804_v49, 4  ;;  %v812_v13 = vrot.slane %v811_v14, 4  ;;  %402 = vst.msk [vmem:[%s1436_s28 + $0xb0] sm:$0xff] %vm379_vm0, %v369_v42 }
  0x4b   : > { %v799_v27 = vmax.f32 %v797_v58, %v798_v53  ;;  %v819_v30 = vrot.slane %v818_v18, 4  ;;  %v443_v6 = vsel %vm379_vm0, %v369_v42, -inf  ;;  %v370_v15 = vmax.f32 %v338_v47, 0.0 }
  0x4c   : > { %v825_v34 = vsel %vm572_vm1, %v1646_v21, -inf  ;;  %v806_v10 = vmax.f32 %v804_v49, %v805_v28  ;;  %v1657_v59 = vmax.f32 %v811_v14, %v812_v13  ;;  %v444_v53 = vmax.f32 %v442_v2, %v443_v6 }
  0x4d   : > { %v800_v54 = vrot.slane %v799_v27, 2  ;;  %v1659_v40 = vmax.f32 %v818_v18, %v819_v30  ;;  %v826_v58 = vrot.slane %v825_v34, 4  ;;  %v371_v37 = vmax.f32 %v339_v33, 0.0  ;;  %403 = vst.msk [vmem:[%s1436_s28 + $0xb8] sm:$0xff] %vm379_vm0, %v370_v15 }
  0x4e   : > { %v807_v1 = vrot.slane %v806_v10, 2  ;;  %v340_v42 = vadd.f32 %v1417_v5, %v304_v52  ;;  %v506_v49 = vrot.slane %v444_v53, 2  ;;  %v507_v14 = vrot.slane %v444_v53, 4 }
  0x4f   : > { %v1661_v41 = vmax.f32 %v799_v27, %v800_v54  ;;  %v1665_v62 = vmax.f32 %v825_v34, %v826_v58  ;;  %v508_v28 = vrot.slane %v444_v53, 6  ;;  %v853_v47 = vsel %vm572_vm1, %v444_v53, -inf  ;;  %404 = vst.msk [vmem:[%s1436_s28 + $0xc0] sm:$0xff] %vm379_vm0, %v371_v37  ;;  %v1344_v27 = vld [vmem:[%s1404_s20 + $0x68] sm:$0xff]  }
  0x50   : > { %v1670_v18 = vmax.f32 %v806_v10, %v807_v1  ;;  %v446_v33 = vsel %vm379_vm0, %v370_v15, -inf  ;;  %v854_v13 = vrot.slane %v853_v47, 4  ;;  %v860_v52 = vsel %vm572_vm1, %v506_v49, -inf }
  0x51   : > { %v867_v30 = vsel %vm572_vm1, %v507_v14, -inf  ;;  %v874_v34 = vsel %vm572_vm1, %v508_v28, -inf  ;;  %v861_v6 = vrot.slane %v860_v52, 4  ;;  %v1680_v10 = vmax.f32 %v445_v3, %v446_v33  ;;  %v1345_v28 = vld [vmem:[%s1404_s20 + $0x70] sm:$0xff]  }
  0x52   : > { %v868_v54 = vrot.slane %v867_v30, 4  ;;  %v875_v1 = vrot.slane %v874_v34, 4  ;;  %v855_v58 = vmax.f32 %v853_v47, %v854_v13  ;;  %v448_v15 = vsel %vm379_vm0, %v371_v37, -inf }
  0x53   : > { %v372_v53 = vmax.f32 %v340_v42, 0.0  ;;  %v1322_v63 = vunpack.c.l.bf16 %v1344_v27  ;;  %v862_v2 = vmax.f32 %v860_v52, %v861_v6  ;;  %v881_v3 = vsel %vm572_vm1, %v1680_v10, -inf  ;;  %v1346_v42 = vld [vmem:[%s1404_s20 + $0x78] sm:$0xff]  }
  0x54   : > { %v1683_v20 = vmax.f32 %v867_v30, %v868_v54  ;;  %v1685_v49 = vmax.f32 %v874_v34, %v875_v1  ;;  %v856_v29 = vrot.slane %v855_v58, 2  ;;  %v882_v13 = vrot.slane %v881_v3, 4 }
  0x55   : > { %405 = vst.msk [vmem:[%s1436_s28 + $0xc8] sm:$0xff] %vm379_vm0, %v372_v53  ;;  %v451_v37 = vsel %vm379_vm0, %v372_v53, -inf  ;;  %v863_v47 = vrot.slane %v862_v2, 2  ;;  %v305_v52 = vmul.f32 %v1409_v0, %v1322_v63  ;;  %v1323_v34 = vunpack.c.h.bf16 %v1344_v27 }
  0x56   : > { %v1698_v30 = vmax.f32 %v855_v58, %v856_v29  ;;  %v1326_v6 = vunpack.c.l.bf16 %v1345_v28  ;;  %v1327_v54 = vunpack.c.h.bf16 %v1345_v28  ;;  %v1702_v32 = vmax.f32 %v881_v3, %v882_v13 }
  0x57   : > { %v1700_v1 = vmax.f32 %v862_v2, %v863_v47  ;;  %v341_v14 = vadd.f32 %v1417_v5, %v305_v52  ;;  %v1330_v53 = vunpack.c.l.bf16 %v1346_v42  ;;  %v306_v33 = vmul.f32 %v1409_v0, %v1323_v34 }
  0x58   : > { %v307_v48 = vmul.f32 %v1409_v0, %v1326_v6  ;;  %v308_v63 = vmul.f32 %v1409_v0, %v1327_v54  ;;  %v1331_v58 = vunpack.c.h.bf16 %v1346_v42  ;;  %v1717_v13 = vmax.f32 %v1491_v17, %v578_v25 }
  0x59   : > { %v373_v29 = vmax.f32 %v341_v14, 0.0  ;;  %v309_v27 = vmul.f32 %v1409_v0, %v1330_v53  ;;  %v342_v28 = vadd.f32 %v1417_v5, %v306_v33  ;;  %v585_v33 = vrot.slane %v1499_v26, 1 }
  0x5a   : > { %v343_v3 = vadd.f32 %v1417_v5, %v307_v48  ;;  %v344_v47 = vadd.f32 %v1417_v5, %v308_v63  ;;  %v310_v52 = vmul.f32 %v1409_v0, %v1331_v58  ;;  %v591_v63 = vmax.f32 %v1486_v11, %v590_v19 }
  0x5b   : > { %406 = vst.msk [vmem:[%s1436_s28 + $0xd0] sm:$0xff] %vm379_vm0, %v373_v29  ;;  %v449_v14 = vsel %vm379_vm0, %v373_v29, -inf  ;;  %v345_v42 = vadd.f32 %v1417_v5, %v309_v27  ;;  %v374_v34 = vmax.f32 %v342_v28, 0.0  ;;  %v1727_v25 = vmax.f32 %v1499_v26, %v585_v33 }
  0x5c   : > { %v450_v48 = vmax.f32 %v448_v15, %v449_v14  ;;  %v375_v6 = vmax.f32 %v343_v3, 0.0  ;;  %v376_v54 = vmax.f32 %v344_v47, 0.0  ;;  %v346_v17 = vadd.f32 %v1417_v5, %v310_v52 }
  0x5d   : > { %v377_v53 = vmax.f32 %v345_v42, 0.0  ;;  %407 = vst.msk [vmem:[%s1436_s28 + $0xd8] sm:$0xff] %vm379_vm0, %v374_v34  ;;  %v452_v28 = vsel %vm379_vm0, %v374_v34, -inf  ;;  %v592_v24 = vrot.slane %v591_v63, 1  ;;  %v597_v2 = vrot.slane %v1488_v12, 2 }
  0x5e   : > { %v512_v29 = vrot.slane %v450_v48, 2  ;;  %v513_v0 = vrot.slane %v450_v48, 4  ;;  %v514_v27 = vrot.slane %v450_v48, 6  ;;  %v909_v58 = vsel %vm572_vm1, %v450_v48, -inf  ;;  %408 = vst.msk [vmem:[%s1436_s28 + $0xe0] sm:$0xff] %vm379_vm0, %v375_v6 }
  0x5f   : > { %v910_v15 = vrot.slane %v909_v58, 4  ;;  %v454_v5 = vsel %vm379_vm0, %v375_v6, -inf  ;;  %v457_v26 = vsel %vm379_vm0, %v376_v54, -inf  ;;  %v1743_v47 = vmax.f32 %v451_v37, %v452_v28  ;;  %409 = vst.msk [vmem:[%s1436_s28 + $0xe8] sm:$0xff] %vm379_vm0, %v376_v54 }
  0x60   : > { %v916_v3 = vsel %vm572_vm1, %v512_v29, -inf  ;;  %v923_v11 = vsel %vm572_vm1, %v513_v0, -inf  ;;  %v930_v19 = vsel %vm572_vm1, %v514_v27, -inf  ;;  %410 = vst.msk [vmem:[%s1436_s28 + $0xf0] sm:$0xff] %vm379_vm0, %v377_v53  ;;  %v455_v29 = vsel %vm379_vm0, %v377_v53, -inf }
  0x61   : > { %v911_v14 = vmax.f32 %v909_v58, %v910_v15  ;;  %v917_v42 = vrot.slane %v916_v3, 4  ;;  %v924_v52 = vrot.slane %v923_v11, 4  ;;  %v931_v33 = vrot.slane %v930_v19, 4 }
  0x62   : > { %v937_v6 = vsel %vm572_vm1, %v1743_v47, -inf  ;;  %v456_v15 = vmax.f32 %v454_v5, %v455_v29  ;;  %v378_v28 = vmax.f32 %v346_v17, 0.0 }
  0x63   : > { %v912_v0 = vrot.slane %v911_v14, 2  ;;  %v918_v37 = vmax.f32 %v916_v3, %v917_v42  ;;  %v1754_v27 = vmax.f32 %v923_v11, %v924_v52  ;;  %v1756_v54 = vmax.f32 %v930_v19, %v931_v33 }
  0x64   : > { %v938_v58 = vrot.slane %v937_v6, 4  ;;  %v518_v53 = vrot.slane %v456_v15, 2  ;;  %v519_v56 = vrot.slane %v456_v15, 4  ;;  %v520_v3 = vrot.slane %v456_v15, 6  ;;  %411 = vst.msk [vmem:[%s1436_s28 + $0xf8] sm:$0xff] %vm379_vm0, %v378_v28 }
  0x65   : > { %v1758_v50 = vmax.f32 %v911_v14, %v912_v0  ;;  %v919_v48 = vrot.slane %v918_v37, 2  ;;  %v965_v17 = vsel %vm572_vm1, %v456_v15, -inf  ;;  %v458_v5 = vsel %vm379_vm0, %v378_v28, -inf }
  0x66   : > { %v1762_v57 = vmax.f32 %v937_v6, %v938_v58  ;;  %v966_v14 = vrot.slane %v965_v17, 4  ;;  %v972_v42 = vsel %vm572_vm1, %v518_v53, -inf  ;;  %v979_v52 = vsel %vm572_vm1, %v519_v56, -inf }
  0x67   : > { %v1767_v19 = vmax.f32 %v918_v37, %v919_v48  ;;  %v986_v33 = vsel %vm572_vm1, %v520_v3, -inf  ;;  %v973_v6 = vrot.slane %v972_v42, 4  ;;  %v980_v29 = vrot.slane %v979_v52, 4 }
  0x68   : > { %2033 = vst [vmem:[#allocation2_spill] sm:$0xff] %v1762_v57  ;;  %v987_v0 = vrot.slane %v986_v33, 4  ;;  %v1774_v58 = vmax.f32 %v457_v26, %v458_v5  ;;  %v967_v34 = vmax.f32 %v965_v17, %v966_v14  ;;  %v593_v11 = vmax.f32 %v591_v63, %v592_v24 }
  0x69   : > { %v598_v48 = vmax.f32 %v1488_v12, %v597_v2  ;;  %v604_v37 = vrot.slane %v1479_v4, 2  ;;  %v974_v15 = vmax.f32 %v972_v42, %v973_v6  ;;  %v1778_v28 = vmax.f32 %v979_v52, %v980_v29 }
  0x6a   : > { %v1780_v57 = vmax.f32 %v986_v33, %v987_v0  ;;  %v968_v53 = vrot.slane %v967_v34, 2  ;;  %v993_v26 = vsel %vm572_vm1, %v1774_v58, -inf  ;;  %v2034_v42 = vrot.slane %v1453_v44, 2 }
  0x6b   : > { %v599_v5 = vrot.slane %v598_v48, 1  ;;  %v975_v17 = vrot.slane %v974_v15, 2  ;;  %v994_v12 = vrot.slane %v993_v26, 4  ;;  %v605_v2 = vmax.f32 %v1479_v4, %v604_v37 }
  0x6c   : > { %v1788_v63 = vmax.f32 %v967_v34, %v968_v53  ;;  %v608_v52 = vsel %vm572_vm1, %v2034_v42, -inf  ;;  %v2035_v33 = vrot.slane %v1453_v44, 4  ;;  %v2036_v34 = vrot.slane %v1453_v44, 6 }
  0x6d   : > { %v600_v14 = vmax.f32 %v598_v48, %v599_v5  ;;  %v1796_v29 = vmax.f32 %v974_v15, %v975_v17  ;;  %v1798_v0 = vmax.f32 %v993_v26, %v994_v12  ;;  %v606_v3 = vrot.slane %v605_v2, 1 }
  0x6e   : > { %v615_v6 = vsel %vm572_vm1, %v2035_v33, -inf  ;;  %v609_v56 = vrot.slane %v608_v52, 4  ;;  %v622_v48 = vsel %vm572_vm1, %v2036_v34, -inf  ;;  %v1086_v15 = vsel %vm1085_vm2, %v1727_v25, %v1717_v13 }
  0x6f   : > { %v616_v4 = vrot.slane %v615_v6, 4  ;;  %v607_v37 = vmax.f32 %v605_v2, %v606_v3  ;;  %v623_v5 = vrot.slane %v622_v48, 4  ;;  %v1088_v42 = vsel %vm1087_vm3, %v593_v11, %v1086_v15 }
  0x70   : > { %v610_v53 = vmax.f32 %v608_v52, %v609_v56  ;;  %v1090_v33 = vsel %vm1089_vm4, %v600_v14, %v1088_v42  ;;  %v487_v13 = vrot.slane %v1483_v7, 6  ;;  %v2037_v52 = vrot.slane %v1512_v43, 1 }
  0x71   : > { %v617_v17 = vmax.f32 %v615_v6, %v616_v4  ;;  %v624_v12 = vmax.f32 %v622_v48, %v623_v5  ;;  %v1092_v2 = vsel %vm1091_vm5, %v607_v37, %v1090_v33  ;;  %v641_v11 = vrot.slane %v1522_v55, 1 }
  0x72   : > { %v611_v26 = vrot.slane %v610_v53, 2  ;;  %v635_v6 = vmax.f32 %v1512_v43, %v2037_v52  ;;  %v2038_v4 = vrot.slane %v1506_v38, 2  ;;  %v660_v5 = vrot.slane %v1514_v46, 2 }
  0x73   : > { %v618_v44 = vrot.slane %v617_v17, 2  ;;  %v625_v3 = vrot.slane %v624_v12, 2  ;;  %v642_v15 = vmax.f32 %v1522_v55, %v641_v11 }
  0x74   : > { %v612_v56 = vmax.f32 %v610_v53, %v611_v26  ;;  %v647_v34 = vmax.f32 %v1506_v38, %v2038_v4  ;;  %v653_v53 = vrot.slane %v1508_v39, 2  ;;  %v2039_v26 = vrot.slane %v1483_v7, 2 }
  0x75   : > { %v619_v25 = vmax.f32 %v617_v17, %v618_v44  ;;  %v626_v48 = vmax.f32 %v624_v12, %v625_v3  ;;  %v661_v38 = vmax.f32 %v1514_v46, %v660_v5  ;;  %v2040_v4 = vrot.slane %v1483_v7, 4 }
  0x76   : > { %v613_v14 = vrot.slane %v612_v56, 1  ;;  %v648_v17 = vrot.slane %v647_v34, 1  ;;  %v664_v43 = vsel %vm572_vm1, %v2039_v26, -inf  ;;  %v654_v33 = vmax.f32 %v1508_v39, %v653_v53 }
  0x77   : > { %v620_v37 = vrot.slane %v619_v25, 1  ;;  %v627_v44 = vrot.slane %v626_v48, 1  ;;  %v665_v52 = vrot.slane %v664_v43, 4  ;;  %v671_v24 = vsel %vm572_vm1, %v2040_v4, -inf }
  0x78   : > { %v614_v42 = vmax.f32 %v612_v56, %v613_v14  ;;  %v649_v3 = vmax.f32 %v647_v34, %v648_v17  ;;  %v655_v11 = vrot.slane %v654_v33, 1  ;;  %v662_v39 = vrot.slane %v661_v38, 1 }
  0x79   : > { %v621_v12 = vmax.f32 %v619_v25, %v620_v37  ;;  %v628_v55 = vmax.f32 %v626_v48, %v627_v44  ;;  %v666_v25 = vmax.f32 %v664_v43, %v665_v52  ;;  %v672_v34 = vrot.slane %v671_v24, 4 }
  0x7a   : > { %v1094_v56 = vsel %vm1093_vm6, %v614_v42, %v1092_v2  ;;  %v678_v14 = vsel %vm572_vm1, %v487_v13, -inf  ;;  %v656_v53 = vmax.f32 %v654_v33, %v655_v11  ;;  %v663_v5 = vmax.f32 %v661_v38, %v662_v39 }
  0x7b   : > { %v1096_v46 = vsel %vm1095_vm7, %v621_v12, %v1094_v56  ;;  %v679_v37 = vrot.slane %v678_v14, 4  ;;  %v667_v17 = vrot.slane %v666_v25, 2  ;;  %v673_v26 = vmax.f32 %v671_v24, %v672_v34 }
  0x7c   : > { %v1098_v7 = vsel %vm1097_vm8, %v628_v55, %v1096_v46  ;;  %v1099_v48 = vsel %vm1085_vm2, %v642_v15, %v635_v6  ;;  %v493_v2 = vrot.slane %v1553_v45, 6  ;;  %v2041_v43 = vrot.slane %v1573_v16, 1 }
  0x7d   : > { %1156 = vst.msk [vmem:[%s1833_s6] sm:$0xff] %vm379_vm0, %v1098_v7  ;;  %v680_v42 = vmax.f32 %v678_v14, %v679_v37  ;;  %v1100_v44 = vsel %vm1087_vm3, %v649_v3, %v1099_v48  ;;  %v697_v12 = vrot.slane %v1582_v31, 1  ;;  %v668_v33 = vmax.f32 %v666_v25, %v667_v17 }
  0x7e   : > { %v691_v13 = vmax.f32 %v1573_v16, %v2041_v43  ;;  %v674_v38 = vrot.slane %v673_v26, 2  ;;  %v1101_v52 = vsel %vm1089_vm4, %v656_v53, %v1100_v44  ;;  %v2042_v4 = vrot.slane %v1569_v8, 2 }
  0x7f   : > { %v681_v6 = vrot.slane %v680_v42, 2  ;;  %v1102_v15 = vsel %vm1091_vm5, %v663_v5, %v1101_v52  ;;  %v698_v55 = vmax.f32 %v1582_v31, %v697_v12  ;;  %v709_v3 = vrot.slane %v1571_v9, 2 }
  0x80   : > { %v703_v24 = vmax.f32 %v1569_v8, %v2042_v4  ;;  %v669_v56 = vrot.slane %v668_v33, 1  ;;  %v675_v11 = vmax.f32 %v673_v26, %v674_v38  ;;  %v716_v39 = vrot.slane %v1577_v22, 2 }
  0x81   : > { %v682_v46 = vmax.f32 %v680_v42, %v681_v6  ;;  %v710_v25 = vmax.f32 %v1571_v9, %v709_v3  ;;  %v2043_v34 = vrot.slane %v1553_v45, 2  ;;  %v2044_v8 = vrot.slane %v1553_v45, 4 }
  0x82   : > { %v704_v16 = vrot.slane %v703_v24, 1  ;;  %v670_v53 = vmax.f32 %v668_v33, %v669_v56  ;;  %v676_v31 = vrot.slane %v675_v11, 1  ;;  %v717_v37 = vmax.f32 %v1577_v22, %v716_v39 }
  0x83   : > { %v720_v14 = vsel %vm572_vm1, %v2043_v34, -inf  ;;  %v727_v7 = vsel %vm572_vm1, %v2044_v8, -inf  ;;  %v683_v17 = vrot.slane %v682_v46, 1  ;;  %v711_v26 = vrot.slane %v710_v25, 1 }
  0x84   : > { %v705_v5 = vmax.f32 %v703_v24, %v704_v16  ;;  %v721_v48 = vrot.slane %v720_v14, 4  ;;  %v728_v44 = vrot.slane %v727_v7, 4  ;;  %v677_v42 = vmax.f32 %v675_v11, %v676_v31 }
  0x85   : > { %v1103_v9 = vsel %vm1093_vm6, %v670_v53, %v1102_v15  ;;  %v718_v43 = vrot.slane %v717_v37, 1  ;;  %v734_v12 = vsel %vm572_vm1, %v493_v2, -inf  ;;  %v684_v38 = vmax.f32 %v682_v46, %v683_v17 }
  0x86   : > { %v712_v45 = vmax.f32 %v710_v25, %v711_v26  ;;  %v722_v52 = vmax.f32 %v720_v14, %v721_v48  ;;  %v729_v4 = vmax.f32 %v727_v7, %v728_v44  ;;  %v1104_v33 = vsel %vm1095_vm7, %v677_v42, %v1103_v9 }
  0x87   : > { %v719_v24 = vmax.f32 %v717_v37, %v718_v43  ;;  %v735_v6 = vrot.slane %v734_v12, 4  ;;  %v1106_v22 = vsel %vm1085_vm2, %v698_v55, %v691_v13  ;;  %v1105_v3 = vsel %vm1097_vm8, %v684_v38, %v1104_v33 }
  0x88   : > { %v723_v56 = vrot.slane %v722_v52, 2  ;;  %v730_v11 = vrot.slane %v729_v4, 2  ;;  %v1107_v16 = vsel %vm1087_vm3, %v705_v5, %v1106_v22  ;;  %1157 = vst.msk [vmem:[%s1833_s6 + $0x8] sm:$0xff] %vm379_vm0, %v1105_v3  ;;  %v499_v39 = vrot.slane %v1592_v51, 6 }
  0x89   : > { %v736_v15 = vmax.f32 %v734_v12, %v735_v6  ;;  %v1108_v2 = vsel %vm1089_vm4, %v712_v45, %v1107_v16  ;;  %v2045_v46 = vrot.slane %v1610_v23, 1  ;;  %v753_v55 = vrot.slane %v1613_v36, 1 }
  0x8a   : > { %v724_v34 = vmax.f32 %v722_v52, %v723_v56  ;;  %v731_v14 = vmax.f32 %v729_v4, %v730_v11  ;;  %v1109_v13 = vsel %vm1091_vm5, %v719_v24, %v1108_v2  ;;  %v2046_v7 = vrot.slane %v1595_v60, 2 }
  0x8b   : > { %v747_v25 = vmax.f32 %v1610_v23, %v2045_v46  ;;  %v737_v8 = vrot.slane %v736_v15, 2  ;;  %v765_v31 = vrot.slane %v1597_v61, 2  ;;  %v772_v5 = vrot.slane %v1615_v35, 2 }
  0x8c   : > { %v759_v53 = vmax.f32 %v1595_v60, %v2046_v7  ;;  %v725_v37 = vrot.slane %v724_v34, 1  ;;  %v732_v17 = vrot.slane %v731_v14, 1  ;;  %v754_v26 = vmax.f32 %v1613_v36, %v753_v55 }
  0x8d   : > { %v2047_v23 = vrot.slane %v1592_v51, 2  ;;  %v738_v44 = vmax.f32 %v736_v15, %v737_v8  ;;  %v766_v9 = vmax.f32 %v1597_v61, %v765_v31  ;;  %v773_v43 = vmax.f32 %v1615_v35, %v772_v5 }
  0x8e   : > { %v760_v42 = vrot.slane %v759_v53, 1  ;;  %v726_v12 = vmax.f32 %v724_v34, %v725_v37  ;;  %v733_v60 = vmax.f32 %v731_v14, %v732_v17  ;;  %v2048_v45 = vrot.slane %v1592_v51, 4 }
  0x8f   : > { %v776_v48 = vsel %vm572_vm1, %v2047_v23, -inf  ;;  %v739_v4 = vrot.slane %v738_v44, 1  ;;  %v767_v36 = vrot.slane %v766_v9, 1  ;;  %v774_v24 = vrot.slane %v773_v43, 1 }
  0x90   : > { %v777_v38 = vrot.slane %v776_v48, 4  ;;  %v783_v52 = vsel %vm572_vm1, %v2048_v45, -inf  ;;  %v761_v33 = vmax.f32 %v759_v53, %v760_v42  ;;  %v1110_v6 = vsel %vm1093_vm6, %v726_v12, %v1109_v13 }
  0x91   : > { %v784_v3 = vrot.slane %v783_v52, 4  ;;  %v790_v61 = vsel %vm572_vm1, %v499_v39, -inf  ;;  %v740_v56 = vmax.f32 %v738_v44, %v739_v4  ;;  %v1111_v35 = vsel %vm1095_vm7, %v733_v60, %v1110_v6 }
  0x92   : > { %v778_v22 = vmax.f32 %v776_v48, %v777_v38  ;;  %v768_v11 = vmax.f32 %v766_v9, %v767_v36  ;;  %v775_v16 = vmax.f32 %v773_v43, %v774_v24  ;;  %v791_v2 = vrot.slane %v790_v61, 4 }
  0x93   : > { %v785_v51 = vmax.f32 %v783_v52, %v784_v3  ;;  %v1113_v46 = vsel %vm1085_vm2, %v754_v26, %v747_v25  ;;  %v1112_v34 = vsel %vm1097_vm8, %v740_v56, %v1111_v35  ;;  %v505_v13 = vrot.slane %v1646_v21, 6 }
  0x94   : > { %v779_v15 = vrot.slane %v778_v22, 2  ;;  %v1114_v14 = vsel %vm1087_vm3, %v761_v33, %v1113_v46  ;;  %v2049_v55 = vrot.slane %v1661_v41, 1  ;;  %1158 = vst.msk [vmem:[%s1833_s6 + $0x10] sm:$0xff] %vm379_vm0, %v1112_v34  ;;  %v792_v53 = vmax.f32 %v790_v61, %v791_v2 }
  0x95   : > { %v786_v7 = vrot.slane %v785_v51, 2  ;;  %v1115_v31 = vsel %vm1089_vm4, %v768_v11, %v1114_v14  ;;  %v809_v25 = vrot.slane %v1670_v18, 1  ;;  %v2050_v37 = vrot.slane %v1657_v59, 2 }
  0x96   : > { %v803_v39 = vmax.f32 %v1661_v41, %v2049_v55  ;;  %v780_v8 = vmax.f32 %v778_v22, %v779_v15  ;;  %v1116_v5 = vsel %vm1091_vm5, %v775_v16, %v1115_v31  ;;  %v821_v26 = vrot.slane %v1659_v40, 2 }
  0x97   : > { %v815_v17 = vmax.f32 %v1657_v59, %v2050_v37  ;;  %v787_v48 = vmax.f32 %v785_v51, %v786_v7  ;;  %v793_v41 = vrot.slane %v792_v53, 2  ;;  %v828_v44 = vrot.slane %v1665_v62, 2 }
  0x98   : > { %v781_v23 = vrot.slane %v780_v8, 1  ;;  %v810_v42 = vmax.f32 %v1670_v18, %v809_v25  ;;  %v822_v43 = vmax.f32 %v1659_v40, %v821_v26  ;;  %v2051_v12 = vrot.slane %v1646_v21, 2 }
  0x99   : > { %v816_v9 = vrot.slane %v815_v17, 1  ;;  %v788_v45 = vrot.slane %v787_v48, 1  ;;  %v794_v52 = vmax.f32 %v792_v53, %v793_v41  ;;  %v829_v59 = vmax.f32 %v1665_v62, %v828_v44 }
  0x9a   : > { %v832_v60 = vsel %vm572_vm1, %v2051_v12, -inf  ;;  %v782_v38 = vmax.f32 %v780_v8, %v781_v23  ;;  %v823_v33 = vrot.slane %v822_v43, 1  ;;  %v2052_v24 = vrot.slane %v1646_v21, 4 }
  0x9b   : > { %v817_v4 = vmax.f32 %v815_v17, %v816_v9  ;;  %v833_v36 = vrot.slane %v832_v60, 4  ;;  %v789_v18 = vmax.f32 %v787_v48, %v788_v45  ;;  %v795_v22 = vrot.slane %v794_v52, 1 }
  0x9c   : > { %v839_v6 = vsel %vm572_vm1, %v2052_v24, -inf  ;;  %v1117_v40 = vsel %vm1093_vm6, %v782_v38, %v1116_v5  ;;  %v830_v3 = vrot.slane %v829_v59, 1  ;;  %v824_v61 = vmax.f32 %v822_v43, %v823_v33 }
  0x9d   : > { %v834_v56 = vmax.f32 %v832_v60, %v833_v36  ;;  %v840_v35 = vrot.slane %v839_v6, 4  ;;  %v846_v11 = vsel %vm572_vm1, %v505_v13, -inf  ;;  %v796_v16 = vmax.f32 %v794_v52, %v795_v22 }
  0x9e   : > { %v1118_v62 = vsel %vm1095_vm7, %v789_v18, %v1117_v40  ;;  %v831_v15 = vmax.f32 %v829_v59, %v830_v3  ;;  %v847_v51 = vrot.slane %v846_v11, 4  ;;  %v1120_v46 = vsel %vm1085_vm2, %v810_v42, %v803_v39 }
  0x9f   : > { %v835_v2 = vrot.slane %v834_v56, 2  ;;  %v841_v21 = vmax.f32 %v839_v6, %v840_v35  ;;  %v511_v34 = vrot.slane %v1680_v10, 6  ;;  %v1119_v14 = vsel %vm1097_vm8, %v796_v16, %v1118_v62 }
  0xa0   : > { %v848_v55 = vmax.f32 %v846_v11, %v847_v51  ;;  %v1121_v8 = vsel %vm1087_vm3, %v817_v4, %v1120_v46  ;;  %v2053_v7 = vrot.slane %v1698_v30, 1  ;;  %1159 = vst.msk [vmem:[%s1833_s6 + $0x18] sm:$0xff] %vm379_vm0, %v1119_v14  ;;  %v865_v25 = vrot.slane %v1700_v1, 1 }
  0xa1   : > { %v836_v53 = vmax.f32 %v834_v56, %v835_v2  ;;  %v842_v31 = vrot.slane %v841_v21, 2  ;;  %v1122_v5 = vsel %vm1089_vm4, %v824_v61, %v1121_v8  ;;  %v2054_v17 = vrot.slane %v1683_v20, 2 }
  0xa2   : > { %v859_v13 = vmax.f32 %v1698_v30, %v2053_v7  ;;  %v849_v39 = vrot.slane %v848_v55, 2  ;;  %v1123_v37 = vsel %vm1091_vm5, %v831_v15, %v1122_v5  ;;  %v877_v23 = vrot.slane %v1685_v49, 2 }
  0xa3   : > { %v871_v26 = vmax.f32 %v1683_v20, %v2054_v17  ;;  %v837_v48 = vrot.slane %v836_v53, 1  ;;  %v843_v41 = vmax.f32 %v841_v21, %v842_v31  ;;  %v866_v30 = vmax.f32 %v1700_v1, %v865_v25 }
  0xa4   : > { %v884_v44 = vrot.slane %v1702_v32, 2  ;;  %v850_v42 = vmax.f32 %v848_v55, %v849_v39  ;;  %v878_v43 = vmax.f32 %v1685_v49, %v877_v23  ;;  %v2055_v12 = vrot.slane %v1680_v10, 2 }
  0xa5   : > { %v872_v9 = vrot.slane %v871_v26, 1  ;;  %v838_v38 = vmax.f32 %v836_v53, %v837_v48  ;;  %v844_v45 = vrot.slane %v843_v41, 1  ;;  %v2056_v1 = vrot.slane %v1680_v10, 4 }
  0xa6   : > { %v888_v60 = vsel %vm572_vm1, %v2055_v12, -inf  ;;  %v885_v20 = vmax.f32 %v1702_v32, %v884_v44  ;;  %v851_v59 = vrot.slane %v850_v42, 1  ;;  %v879_v33 = vrot.slane %v878_v43, 1 }
  0xa7   : > { %v889_v52 = vrot.slane %v888_v60, 4  ;;  %v873_v4 = vmax.f32 %v871_v26, %v872_v9  ;;  %v895_v36 = vsel %vm572_vm1, %v2056_v1, -inf  ;;  %v845_v24 = vmax.f32 %v843_v41, %v844_v45 }
  0xa8   : > { %v1124_v49 = vsel %vm1093_vm6, %v838_v38, %v1123_v37  ;;  %v886_v6 = vrot.slane %v885_v20, 1  ;;  %v852_v22 = vmax.f32 %v850_v42, %v851_v59  ;;  %v880_v40 = vmax.f32 %v878_v43, %v879_v33 }
  0xa9   : > { %v890_v18 = vmax.f32 %v888_v60, %v889_v52  ;;  %v896_v3 = vrot.slane %v895_v36, 4  ;;  %v902_v61 = vsel %vm572_vm1, %v511_v34, -inf  ;;  %v1125_v32 = vsel %vm1095_vm7, %v845_v24, %v1124_v49 }
  0xaa   : > { %v887_v56 = vmax.f32 %v885_v20, %v886_v6  ;;  %v903_v11 = vrot.slane %v902_v61, 4  ;;  %v1126_v10 = vsel %vm1097_vm8, %v852_v22, %v1125_v32  ;;  %v1127_v62 = vsel %vm1085_vm2, %v866_v30, %v859_v13 }
  0xab   : > { %v891_v35 = vrot.slane %v890_v18, 2  ;;  %v897_v16 = vmax.f32 %v895_v36, %v896_v3  ;;  %v517_v15 = vrot.slane %v1743_v47, 6  ;;  %1160 = vst.msk [vmem:[%s1833_s6 + $0x20] sm:$0xff] %vm379_vm0, %v1126_v10  ;;  %v1128_v21 = vsel %vm1087_vm3, %v873_v4, %v1127_v62 }
  0xac   : > { %v904_v2 = vmax.f32 %v902_v61, %v903_v11  ;;  %v2057_v46 = vrot.slane %v1758_v50, 1  ;;  %v1129_v55 = vsel %vm1089_vm4, %v880_v40, %v1128_v21  ;;  %v921_v8 = vrot.slane %v1767_v19, 1 }
  0xad   : > { %v892_v51 = vmax.f32 %v890_v18, %v891_v35  ;;  %v898_v14 = vrot.slane %v897_v16, 2  ;;  %v2058_v7 = vrot.slane %v1754_v27, 2  ;;  %v1130_v5 = vsel %vm1091_vm5, %v887_v56, %v1129_v55 }
  0xae   : > { %v915_v34 = vmax.f32 %v1758_v50, %v2057_v46  ;;  %v905_v31 = vrot.slane %v904_v2, 2  ;;  %v933_v25 = vrot.slane %v1756_v54, 2  ;;  %v922_v37 = vmax.f32 %v1767_v19, %v921_v8  ;;  %v2059_v50 = vld [vmem:[#allocation2_spill] sm:$0xff] }
  0xaf   : > { %v927_v13 = vmax.f32 %v1754_v27, %v2058_v7  ;;  %v893_v53 = vrot.slane %v892_v51, 1  ;;  %v899_v39 = vmax.f32 %v897_v16, %v898_v14  ;;  %v940_v26 = vrot.slane %v2059_v50, 2 }
  0xb0   : > { %v906_v48 = vmax.f32 %v904_v2, %v905_v31  ;;  %v934_v41 = vmax.f32 %v1756_v54, %v933_v25  ;;  %v2060_v30 = vrot.slane %v1743_v47, 2  ;;  %v2061_v38 = vrot.slane %v1743_v47, 4 }
  0xb1   : > { %v928_v17 = vrot.slane %v927_v13, 1  ;;  %v894_v23 = vmax.f32 %v892_v51, %v893_v53  ;;  %v900_v44 = vrot.slane %v899_v39, 1  ;;  %v941_v9 = vmax.f32 %v2059_v50, %v940_v26 }
  0xb2   : > { %v944_v27 = vsel %vm572_vm1, %v2060_v30, -inf  ;;  %v907_v12 = vrot.slane %v906_v48, 1  ;;  %v935_v19 = vrot.slane %v934_v41, 1  ;;  %v951_v45 = vsel %vm572_vm1, %v2061_v38, -inf }
  0xb3   : > { %v929_v42 = vmax.f32 %v927_v13, %v928_v17  ;;  %v945_v43 = vrot.slane %v944_v27, 4  ;;  %v1131_v60 = vsel %vm1093_vm6, %v894_v23, %v1130_v5  ;;  %v901_v20 = vmax.f32 %v899_v39, %v900_v44 }
  0xb4   : > { %v942_v54 = vrot.slane %v941_v9, 1  ;;  %v952_v59 = vrot.slane %v951_v45, 4  ;;  %v908_v4 = vmax.f32 %v906_v48, %v907_v12  ;;  %v936_v33 = vmax.f32 %v934_v41, %v935_v19 }
  0xb5   : > { %v946_v52 = vmax.f32 %v944_v27, %v945_v43  ;;  %v958_v1 = vsel %vm572_vm1, %v517_v15, -inf  ;;  %v1134_v36 = vsel %vm1085_vm2, %v922_v37, %v915_v34  ;;  %v1132_v24 = vsel %vm1095_vm7, %v901_v20, %v1131_v60 }
  0xb6   : > { %v943_v49 = vmax.f32 %v941_v9, %v942_v54  ;;  %v953_v18 = vmax.f32 %v951_v45, %v952_v59  ;;  %v1133_v47 = vsel %vm1097_vm8, %v908_v4, %v1132_v24  ;;  %v959_v22 = vrot.slane %v958_v1, 4 }
  0xb7   : > { %v947_v6 = vrot.slane %v946_v52, 2  ;;  %v1135_v40 = vsel %vm1087_vm3, %v929_v42, %v1134_v36  ;;  %v523_v3 = vrot.slane %v1774_v58, 6  ;;  %1161 = vst.msk [vmem:[%s1833_s6 + $0x28] sm:$0xff] %vm379_vm0, %v1133_v47  ;;  %v2062_v35 = vrot.slane %v1788_v63, 1 }
  0xb8   : > { %v954_v32 = vrot.slane %v953_v18, 2  ;;  %v1136_v56 = vsel %vm1089_vm4, %v936_v33, %v1135_v40  ;;  %v960_v10 = vmax.f32 %v958_v1, %v959_v22  ;;  %v977_v62 = vrot.slane %v1796_v29, 1 }
  0xb9   : > { %v948_v61 = vmax.f32 %v946_v52, %v947_v6  ;;  %v971_v11 = vmax.f32 %v1788_v63, %v2062_v35  ;;  %v1137_v16 = vsel %vm1091_vm5, %v943_v49, %v1136_v56  ;;  %v2063_v15 = vrot.slane %v1778_v28, 2 }
  0xba   : > { %v955_v21 = vmax.f32 %v953_v18, %v954_v32  ;;  %v989_v46 = vrot.slane %v1780_v57, 2  ;;  %v996_v34 = vrot.slane %v1798_v0, 2  ;;  %v961_v14 = vrot.slane %v960_v10, 2 }
  0xbb   : > { %v983_v51 = vmax.f32 %v1778_v28, %v2063_v15  ;;  %v949_v2 = vrot.slane %v948_v61, 1  ;;  %v978_v55 = vmax.f32 %v1796_v29, %v977_v62  ;;  %v2064_v63 = vrot.slane %v1774_v58, 2 }
  0xbc   : > { %v956_v53 = vrot.slane %v955_v21, 1  ;;  %v990_v31 = vmax.f32 %v1780_v57, %v989_v46  ;;  %v997_v28 = vmax.f32 %v1798_v0, %v996_v34  ;;  %v962_v5 = vmax.f32 %v960_v10, %v961_v14 }
  0xbd   : > { %v984_v8 = vrot.slane %v983_v51, 1  ;;  %v1000_v7 = vsel %vm572_vm1, %v2064_v63, -inf  ;;  %v950_v13 = vmax.f32 %v948_v61, %v949_v2  ;;  %v2065_v37 = vrot.slane %v1774_v58, 4 }
  0xbe   : > { %v1001_v39 = vrot.slane %v1000_v7, 4  ;;  %v957_v50 = vmax.f32 %v955_v21, %v956_v53  ;;  %v991_v26 = vrot.slane %v990_v31, 1  ;;  %v998_v23 = vrot.slane %v997_v28, 1 }
  0xbf   : > { %v985_v25 = vmax.f32 %v983_v51, %v984_v8  ;;  %v1007_v17 = vsel %vm572_vm1, %v2065_v37, -inf  ;;  %v1138_v29 = vsel %vm1093_vm6, %v950_v13, %v1137_v16  ;;  %v963_v48 = vrot.slane %v962_v5, 1 }
  0xc0   : > { %v1002_v41 = vmax.f32 %v1000_v7, %v1001_v39  ;;  %v1008_v30 = vrot.slane %v1007_v17, 4  ;;  %v1014_v57 = vsel %vm572_vm1, %v523_v3, -inf  ;;  %v1139_v0 = vsel %vm1095_vm7, %v957_v50, %v1138_v29 }
  0xc1   : > { %v992_v27 = vmax.f32 %v990_v31, %v991_v26  ;;  %v999_v44 = vmax.f32 %v997_v28, %v998_v23  ;;  %v1015_v42 = vrot.slane %v1014_v57, 4  ;;  %v964_v9 = vmax.f32 %v962_v5, %v963_v48 }
  0xc2   : > { %v1003_v58 = vrot.slane %v1002_v41, 2  ;;  %v1009_v43 = vmax.f32 %v1007_v17, %v1008_v30  ;;  %v1141_v12 = vsel %vm1085_vm2, %v978_v55, %v971_v11 }
  0xc3   : > { %v1016_v60 = vmax.f32 %v1014_v57, %v1015_v42  ;;  %v1142_v19 = vsel %vm1087_vm3, %v985_v25, %v1141_v12  ;;  %v1140_v38 = vsel %vm1097_vm8, %v964_v9, %v1139_v0 }
  0xc4   : > { %v1004_v45 = vmax.f32 %v1002_v41, %v1003_v58  ;;  %v1010_v20 = vrot.slane %v1009_v43, 2  ;;  %v1143_v54 = vsel %vm1089_vm4, %v992_v27, %v1142_v19  ;;  %1162 = vst.msk [vmem:[%s1833_s6 + $0x30] sm:$0xff] %vm379_vm0, %v1140_v38 }
  0xc5   : > { %v1017_v52 = vrot.slane %v1016_v60, 2  ;;  %v1144_v59 = vsel %vm1091_vm5, %v999_v44, %v1143_v54 }
  0xc6   : > { %v1005_v4 = vrot.slane %v1004_v45, 1  ;;  %v1011_v33 = vmax.f32 %v1009_v43, %v1010_v20 }
  0xc7   : > { %v1018_v1 = vmax.f32 %v1016_v60, %v1017_v52 }
  0xc8   : > { %v1006_v36 = vmax.f32 %v1004_v45, %v1005_v4  ;;  %v1012_v24 = vrot.slane %v1011_v33, 1 }
  0xc9   : > { %v1019_v49 = vrot.slane %v1018_v1, 1 }
  0xca   : > { %v1013_v6 = vmax.f32 %v1011_v33, %v1012_v24  ;;  %v1145_v18 = vsel %vm1093_vm6, %v1006_v36, %v1144_v59 }
  0xcb   : > { %v1020_v47 = vmax.f32 %v1018_v1, %v1019_v49 }
  0xcc   : > { %v1146_v22 = vsel %vm1095_vm7, %v1013_v6, %v1145_v18 }
  0xcd   : > { %v1147_v40 = vsel %vm1097_vm8, %v1020_v47, %v1146_v22 }
  0xce   : > { %1163 = vst.msk [vmem:[%s1833_s6 + $0x38] sm:$0xff] %vm379_vm0, %v1147_v40 }
  0xcf PF: > { %s15_s15 = sadd.s32 1, %s1363_s15  }
  0xd0   : > { %p12_p4 = scmp.ge.s32.totalorder %s15_s15, 4  }
  0xd2   :  { %14 = sbr.rel (!%p12_p4) target bundleno = 1 (0x1), region = 74 }

// kernel: encoder_block_forward.3
= control target key start
LH: loop header
LB: loop body
LE: loop exit
PB: predicated region body
PF: predicated region fallthrough
CT: control target
= control target key end

     0   :  { %s1950_s12 = smov 0   ;;  %s3022_s0 = inlined_call_operand.vmem [shape: bf16[2,16,16,4], index: 0, kind: input, shape index: {}]   ;;  %s3023_s1 = inlined_call_operand.vmem [shape: bf16[36,8], index: 1, kind: input, shape index: {}]   ;;  %s3024_s2 = inlined_call_operand.vmem [shape: bf16[2,16,16,8], index: 2, kind: output, shape index: {0}]   ;;  %s3025_s3 = inlined_call_operand.vmem [shape: f32[2,2,8], index: 3, kind: output, shape index: {1}]  }
   0x1 LB: > { %s1767_s13 = sadd.s32 4294967295, %s1919_s12   ;;  %p1771_p0 = scmp.ge.s32.totalorder %s1919_s12, 1  ;;  %s1919_s12 = sphi %s1950_s12, %s14_s12  }
   0x2   : > { %p140_p1 = scmp.lt.s32.totalorder %s1919_s12, 3 }
   0x4   : > { %p141_p2 = pnand %p1771_p0, %p140_p1 }
   0x6   : > { %144 = sbr.rel (%p141_p2) target bundleno = 648 (0x288), region = 28 }
   0xb   : > { %vm448_vm0 = vcmask 1040384   ;;  %vm449_vm1 = vsmask.f32 256  ;;  %v1921_v0 = vmov 0   ;;  %p168_p3 = scmp.lt.s32.totalorder %s1767_s13, 1  ;;  %s1922_s18 = smov 4  }
   0xc   : > { %v298_v1 = vrot.slane %v1921_v0, 7  ;;  %vm1959_vm2 = vmand %vm448_vm0, %vm449_vm1  ;;  %vm485_vm3 = vsmask.f32 7424  ;;  %vm742_vm4 = vcmask 1046528   ;;  %s1923_s19 = smov 8   ;;  %s1924_s20 = smov 16  }
   0xd   : > { %s3032_s13 = smov (!%p168_p3, %s1767_s13), 1  ;;  %s1925_s21 = smov 12   ;;  %vm1065_vm5 = vcmask 64512   ;;  %vm1032_vm6 = vcmask 31744   ;;  %vm1349_vm7 = vcmask 1041408   ;;  %vm1098_vm8 = vcmask 97280  }
   0xe   : > { %v1965_v3 = vsel %vm1959_vm2, 0, %v298_v1  ;;  %v1969_v4 = vsel %vm1959_vm2, %v298_v1, 0  ;;  %s1867_s14 = sshll.u32 %s3032_s13, 7  ;;  %s1926_s22 = smov 20   ;;  %vm1131_vm9 = vcmask 130048   ;;  %vm1164_vm10 = vcmask 162816  }
   0xf   : > { %v487_v5 = vshrl.u32 %v1965_v3, 16  ;;  %v489_v6 = vshll.u32 %v1965_v3, 16  ;;  %v494_v7 = vshll.u32 %v1969_v4, 16  ;;  %s1982_s17 = scalar_lea.vmem %s3022_s0, %s1867_s14  ;;  %s1927_s23 = smov 28   ;;  %vm1197_vm11 = vcmask 195584  }
  0x10   : > { %v1872_v10 = vld [vmem:[%s1982_s17 + $0x18] sm:$0xff]  ;;  %v1870_v11 = vld [vmem:[%s1982_s17 + $0x8] sm:$0xff]  ;;  %v1869_v12 = vld [vmem:[%s1982_s17] sm:$0xff]  ;;  %s1928_s24 = smov 24   ;;  %s1929_s25 = smov 32   ;;  %vm1230_vm12 = vcmask 228352  }
  0x11   : > { %v491_v8 = vrot.slane %v489_v6, 1  ;;  %v496_v9 = vrot.slane %v494_v7, 1  ;;  %v1873_v14 = vld [vmem:[%s1982_s17 + $0x20] sm:$0xff]  ;;  %v1871_v15 = vld [vmem:[%s1982_s17 + $0x10] sm:$0xff]  ;;  %v1990_v16 = vld [vmem:[%s1982_s17 + $0x28] sm:$0xff]  ;;  %v324_v17 = vshrl.u32 %v1872_v10, 16  ;;  %s2731_s7 = scalar_lea.vmem %s3024_s2, %s1867_s14 }
  0x12   : > { %v327_v18 = vshll.u32 %v1872_v10, 16  ;;  %v310_v19 = vshrl.u32 %v1870_v11, 16  ;;  %v313_v20 = vshll.u32 %v1870_v11, 16  ;;  %v303_v22 = vshrl.u32 %v1869_v12, 16  ;;  %s1776_s8 = sshll.u32 %s3032_s13, 1 }
  0x13   : > { %v492_v13 = vor.u32 %v491_v8, %v487_v5  ;;  %v306_v23 = vshll.u32 %v1869_v12, 16  ;;  %v331_v24 = vshrl.u32 %v1873_v14, 16  ;;  %v326_v25 = vrot.slane %v324_v17, 7  ;;  %v1875_v17 = vld [vmem:[%s1982_s17 + $0x30] sm:$0xff]  ;;  %s181_s11 = scalar_lea.vmem %s3025_s3, %s1776_s8 }
  0x14   : > { %v312_v26 = vrot.slane %v310_v19, 7  ;;  %v334_v27 = vshll.u32 %v1873_v14, 16  ;;  %v317_v28 = vshrl.u32 %v1871_v15, 16  ;;  %v305_v29 = vrot.slane %v303_v22, 7 }
  0x15   : > { %v1993_v21 = vsel %vm485_vm3, %v492_v13, %v496_v9  ;;  %v333_v30 = vrot.slane %v331_v24, 7  ;;  %v320_v31 = vshll.u32 %v1871_v15, 16  ;;  %v338_v32 = vshrl.u32 %v1990_v16, 16 }
  0x16   : > { %678 = vrot.lane.b32.xlu0 %v1993_v21, %s1922_s18  ;;  %v329_v33 = vor.u32 %v327_v18, %v326_v25  ;;  %v2000_v34 = vsel %vm1959_vm2, %v326_v25, 0  ;;  %v315_v35 = vor.u32 %v313_v20, %v312_v26  ;;  %v2004_v36 = vsel %vm1959_vm2, %v312_v26, 0 }
  0x17   : > { %v542_v37 = vshll.u32 %v2000_v34, 16  ;;  %v518_v38 = vshll.u32 %v2004_v36, 16  ;;  %v308_v39 = vor.u32 %v306_v23, %v305_v29  ;;  %v2010_v40 = vsel %vm1959_vm2, %v305_v29, 0  ;;  %v1877_v23 = vld [vmem:[%s1982_s17 + $0x40] sm:$0xff] }
  0x18   : > { %v2014_v41 = vsel %vm1959_vm2, 0, %v329_v33  ;;  %v2018_v42 = vsel %vm1959_vm2, 0, %v315_v35  ;;  %v506_v43 = vshll.u32 %v2010_v40, 16  ;;  %v336_v44 = vor.u32 %v334_v27, %v333_v30 }
  0x19   : > { %v535_v45 = vshrl.u32 %v2014_v41, 16  ;;  %v537_v46 = vshll.u32 %v2014_v41, 16  ;;  %v544_v47 = vrot.slane %v542_v37, 1  ;;  %v511_v48 = vshrl.u32 %v2018_v42, 16 }
  0x1a   : > { %v513_v49 = vshll.u32 %v2018_v42, 16  ;;  %v520_v50 = vrot.slane %v518_v38, 1  ;;  %v2027_v51 = vsel %vm1959_vm2, 0, %v308_v39  ;;  %v508_v52 = vrot.slane %v506_v43, 1 }
  0x1b   : > { %v539_v53 = vrot.slane %v537_v46, 1  ;;  %v499_v54 = vshrl.u32 %v2027_v51, 16  ;;  %v501_v55 = vshll.u32 %v2027_v51, 16  ;;  %v2033_v56 = vsel %vm1959_vm2, 0, %v336_v44 }
  0x1c   : > { %v515_v57 = vrot.slane %v513_v49, 1  ;;  %v2037_v58 = vsel %vm1959_vm2, %v333_v30, 0  ;;  %v547_v59 = vshrl.u32 %v2033_v56, 16  ;;  %v549_v60 = vshll.u32 %v2033_v56, 16 }
  0x1d   : > { %v540_v61 = vor.u32 %v539_v53, %v535_v45  ;;  %v503_v62 = vrot.slane %v501_v55, 1  ;;  %v554_v63 = vshll.u32 %v2037_v58, 16  ;;  %v319_v0 = vrot.slane %v317_v28, 7 }
  0x1e   : > { %v516_v1 = vor.u32 %v515_v57, %v511_v48  ;;  %v551_v5 = vrot.slane %v549_v60, 1  ;;  %v340_v6 = vrot.slane %v338_v32, 7  ;;  %v341_v7 = vshll.u32 %v1990_v16, 16  ;;  %v1876_v16 = vld [vmem:[%s1982_s17 + $0x38] sm:$0xff]  ;;  %v1879_v32 = vld [vmem:[%s1982_s17 + $0x50] sm:$0xff] }
  0x1f   : > { %v2044_v8 = vsel %vm485_vm3, %v540_v61, %v544_v47  ;;  %v504_v9 = vor.u32 %v503_v62, %v499_v54  ;;  %v556_v10 = vrot.slane %v554_v63, 1  ;;  %v322_v11 = vor.u32 %v320_v31, %v319_v0 }
  0x20   : > { %686 = vrot.lane.b32.xlu2 %v2044_v8, %s1922_s18  ;;  %v2049_v12 = vsel %vm485_vm3, %v516_v1, %v520_v50  ;;  %v552_v13 = vor.u32 %v551_v5, %v547_v59  ;;  %v2053_v14 = vsel %vm1959_vm2, %v319_v0, 0  ;;  %v343_v15 = vor.u32 %v341_v7, %v340_v6 }
  0x21   : > { %682 = vrot.lane.b32.xlu1 %v2049_v12, %s1922_s18  ;;  %v2060_v18 = vsel %vm485_vm3, %v504_v9, %v508_v52  ;;  %v2064_v19 = vsel %vm1959_vm2, 0, %v322_v11  ;;  %v530_v20 = vshll.u32 %v2053_v14, 16  ;;  %v2069_v22 = vsel %vm1959_vm2, %v340_v6, 0  ;;  %v1878_v9 = vld [vmem:[%s1982_s17 + $0x48] sm:$0xff] }
  0x22   : > { %680 = vrot.lane.b32.xlu0 %v2060_v18, %s1922_s18  ;;  %v2075_v24 = vsel %vm485_vm3, %v552_v13, %v556_v10  ;;  %v523_v25 = vshrl.u32 %v2064_v19, 16  ;;  %v525_v26 = vshll.u32 %v2064_v19, 16  ;;  %v2081_v27 = vsel %vm1959_vm2, 0, %v343_v15 }
  0x23   : > { %v532_v28 = vrot.slane %v530_v20, 1  ;;  %v559_v29 = vshrl.u32 %v2081_v27, 16  ;;  %v561_v30 = vshll.u32 %v2081_v27, 16  ;;  %v566_v31 = vshll.u32 %v2069_v22, 16 }
  0x24   : > { %v527_v33 = vrot.slane %v525_v26, 1  ;;  %v352_v35 = vshrl.u32 %v1876_v16, 16  ;;  %v355_v37 = vshll.u32 %v1876_v16, 16  ;;  %v345_v38 = vshrl.u32 %v1875_v17, 16 }
  0x25   : > { %v563_v39 = vrot.slane %v561_v30, 1  ;;  %v568_v43 = vrot.slane %v566_v31, 1  ;;  %v348_v44 = vshll.u32 %v1875_v17, 16  ;;  %v359_v45 = vshrl.u32 %v1877_v23, 16 }
  0x26   : > { %v528_v46 = vor.u32 %v527_v33, %v523_v25  ;;  %v354_v47 = vrot.slane %v352_v35, 7  ;;  %v347_v48 = vrot.slane %v345_v38, 7  ;;  %v362_v49 = vshll.u32 %v1877_v23, 16  ;;  %v1880_v25 = vld [vmem:[%s1982_s17 + $0x58] sm:$0xff] }
  0x27   : > { %v564_v50 = vor.u32 %v563_v39, %v559_v29  ;;  %v361_v52 = vrot.slane %v359_v45, 7  ;;  %v373_v53 = vshrl.u32 %v1879_v32, 16  ;;  %v376_v54 = vshll.u32 %v1879_v32, 16 }
  0x28   : > { %688 = vrot.lane.b32.xlu2 %v2075_v24, %s1922_s18  ;;  %v2090_v55 = vsel %vm485_vm3, %v528_v46, %v532_v28  ;;  %v357_v57 = vor.u32 %v355_v37, %v354_v47  ;;  %v2094_v59 = vsel %vm1959_vm2, %v354_v47, 0  ;;  %v350_v60 = vor.u32 %v348_v44, %v347_v48 }
  0x29   : > { %684 = vrot.lane.b32.xlu1 %v2090_v55, %s1922_s18  ;;  %v2099_v61 = vsel %vm485_vm3, %v564_v50, %v568_v43  ;;  %v590_v62 = vshll.u32 %v2094_v59, 16  ;;  %v2104_v63 = vsel %vm1959_vm2, %v347_v48, 0  ;;  %v364_v0 = vor.u32 %v362_v49, %v361_v52  ;;  %v1882_v48 = vld [vmem:[%s1982_s17 + $0x68] sm:$0xff] }
  0x2a   : > { %690 = vrot.lane.b32.xlu0 %v2099_v61, %s1922_s18  ;;  %v2110_v1 = vsel %vm1959_vm2, 0, %v357_v57  ;;  %v2114_v5 = vsel %vm1959_vm2, 0, %v350_v60  ;;  %v578_v6 = vshll.u32 %v2104_v63, 16  ;;  %v2119_v7 = vsel %vm1959_vm2, %v361_v52, 0 }
  0x2b   : > { %v583_v10 = vshrl.u32 %v2110_v1, 16  ;;  %v585_v11 = vshll.u32 %v2110_v1, 16  ;;  %v592_v13 = vrot.slane %v590_v62, 1  ;;  %v571_v15 = vshrl.u32 %v2114_v5, 16 }
  0x2c   : > { %v573_v16 = vshll.u32 %v2114_v5, 16  ;;  %v580_v17 = vrot.slane %v578_v6, 1  ;;  %v2128_v20 = vsel %vm1959_vm2, 0, %v364_v0  ;;  %v602_v23 = vshll.u32 %v2119_v7, 16 }
  0x2d   : > { %v587_v26 = vrot.slane %v585_v11, 1  ;;  %v595_v28 = vshrl.u32 %v2128_v20, 16  ;;  %v597_v29 = vshll.u32 %v2128_v20, 16  ;;  %v375_v30 = vrot.slane %v373_v53, 7 }
  0x2e   : > { %v575_v31 = vrot.slane %v573_v16, 1  ;;  %v604_v32 = vrot.slane %v602_v23, 1  ;;  %v366_v33 = vshrl.u32 %v1878_v9, 16  ;;  %v369_v35 = vshll.u32 %v1878_v9, 16 }
  0x2f   : > { %v588_v37 = vor.u32 %v587_v26, %v583_v10  ;;  %v599_v38 = vrot.slane %v597_v29, 1  ;;  %v378_v39 = vor.u32 %v376_v54, %v375_v30  ;;  %v2136_v43 = vsel %vm1959_vm2, %v375_v30, 0  ;;  %v1881_v54 = vld [vmem:[%s1982_s17 + $0x60] sm:$0xff] }
  0x30   : > { %v576_v44 = vor.u32 %v575_v31, %v571_v15  ;;  %v626_v45 = vshll.u32 %v2136_v43, 16  ;;  %v368_v46 = vrot.slane %v366_v33, 7  ;;  %v380_v47 = vshrl.u32 %v1880_v25, 16 }
  0x31   : > { %v2141_v49 = vsel %vm485_vm3, %v588_v37, %v592_v13  ;;  %v600_v50 = vor.u32 %v599_v38, %v595_v28  ;;  %v2145_v52 = vsel %vm1959_vm2, 0, %v378_v39  ;;  %v383_v53 = vshll.u32 %v1880_v25, 16  ;;  %v1883_v39 = vld [vmem:[%s1982_s17 + $0x70] sm:$0xff] }
  0x32   : > { %694 = vrot.lane.b32.xlu2 %v2141_v49, %s1922_s18  ;;  %v2151_v57 = vsel %vm485_vm3, %v576_v44, %v580_v17  ;;  %v619_v60 = vshrl.u32 %v2145_v52, 16  ;;  %v621_v62 = vshll.u32 %v2145_v52, 16  ;;  %v628_v0 = vrot.slane %v626_v45, 1 }
  0x33   : > { %692 = vrot.lane.b32.xlu1 %v2151_v57, %s1922_s18  ;;  %v2158_v6 = vsel %vm485_vm3, %v600_v50, %v604_v32  ;;  %v371_v9 = vor.u32 %v369_v35, %v368_v46  ;;  %v2162_v10 = vsel %vm1959_vm2, %v368_v46, 0  ;;  %v382_v11 = vrot.slane %v380_v47, 7 }
  0x34   : > { %696 = vrot.lane.b32.xlu0 %v2158_v6, %s1922_s18  ;;  %v623_v13 = vrot.slane %v621_v62, 1  ;;  %v614_v15 = vshll.u32 %v2162_v10, 16  ;;  %v394_v16 = vshrl.u32 %v1882_v48, 16  ;;  %v397_v17 = vshll.u32 %v1882_v48, 16 }
  0x35   : > { %v2169_v23 = vsel %vm1959_vm2, 0, %v371_v9  ;;  %v385_v25 = vor.u32 %v383_v53, %v382_v11  ;;  %v2173_v26 = vsel %vm1959_vm2, %v382_v11, 0  ;;  %v387_v28 = vshrl.u32 %v1881_v54, 16 }
  0x36   : > { %v624_v29 = vor.u32 %v623_v13, %v619_v60  ;;  %v607_v30 = vshrl.u32 %v2169_v23, 16  ;;  %v609_v31 = vshll.u32 %v2169_v23, 16  ;;  %v616_v32 = vrot.slane %v614_v15, 1 }
  0x37   : > { %v2179_v33 = vsel %vm1959_vm2, 0, %v385_v25  ;;  %v638_v35 = vshll.u32 %v2173_v26, 16  ;;  %v396_v37 = vrot.slane %v394_v16, 7  ;;  %v389_v38 = vrot.slane %v387_v28, 7 }
  0x38   : > { %v2184_v44 = vsel %vm485_vm3, %v624_v29, %v628_v0  ;;  %v611_v45 = vrot.slane %v609_v31, 1  ;;  %v631_v46 = vshrl.u32 %v2179_v33, 16  ;;  %v633_v47 = vshll.u32 %v2179_v33, 16 }
  0x39   : > { %v640_v48 = vrot.slane %v638_v35, 1  ;;  %v399_v50 = vor.u32 %v397_v17, %v396_v37  ;;  %v2190_v53 = vsel %vm1959_vm2, %v396_v37, 0  ;;  %v390_v60 = vshll.u32 %v1881_v54, 16 }
  0x3a   : > { %700 = vrot.lane.b32.xlu2 %v2184_v44, %s1922_s18  ;;  %v612_v62 = vor.u32 %v611_v45, %v607_v30  ;;  %v635_v9 = vrot.slane %v633_v47, 1  ;;  %v662_v0 = vshll.u32 %v2190_v53, 16  ;;  %v2197_v11 = vsel %vm1959_vm2, %v389_v38, 0 }
  0x3b   : > { %v2201_v13 = vsel %vm1959_vm2, 0, %v399_v50  ;;  %v392_v15 = vor.u32 %v390_v60, %v389_v38  ;;  %v650_v16 = vshll.u32 %v2197_v11, 16  ;;  %v401_v17 = vshrl.u32 %v1883_v39, 16 }
  0x3c   : > { %v2205_v54 = vsel %vm485_vm3, %v612_v62, %v616_v32  ;;  %v636_v25 = vor.u32 %v635_v9, %v631_v46  ;;  %v655_v28 = vshrl.u32 %v2201_v13, 16  ;;  %v657_v29 = vshll.u32 %v2201_v13, 16 }
  0x3d   : > { %698 = vrot.lane.b32.xlu1 %v2205_v54, %s1922_s18  ;;  %v664_v30 = vrot.slane %v662_v0, 1  ;;  %v2213_v31 = vsel %vm1959_vm2, 0, %v392_v15  ;;  %v403_v35 = vrot.slane %v401_v17, 7  ;;  %v404_v46 = vshll.u32 %v1883_v39, 16 }
  0x3e   : > { %v2216_v37 = vsel %vm485_vm3, %v636_v25, %v640_v48  ;;  %v659_v38 = vrot.slane %v657_v29, 1  ;;  %v643_v32 = vshrl.u32 %v2213_v31, 16  ;;  %v645_v45 = vshll.u32 %v2213_v31, 16 }
  0x3f   : > { %702 = vrot.lane.b32.xlu0 %v2216_v37, %s1922_s18  ;;  %v2224_v47 = vsel %vm1959_vm2, %v403_v35, 0  ;;  %v652_v62 = vrot.slane %v650_v16, 1  ;;  %v406_v9 = vor.u32 %v404_v46, %v403_v35  ;;  %v746_v17 = vrot.slane %v2027_v51, 1 }
  0x40   : > { %v660_v50 = vor.u32 %v659_v38, %v655_v28  ;;  %v647_v60 = vrot.slane %v645_v45, 1  ;;  %v674_v15 = vshll.u32 %v2224_v47, 16  ;;  %v747_v29 = vrot.slane %v2010_v40, 1 }
  0x41   : > { %v2234_v39 = vsel %vm1959_vm2, 0, %v406_v9  ;;  %v743_v38 = vrot.slane %v1965_v3, 1  ;;  %v749_v40 = vrot.slane %v2018_v42, 1  ;;  %v756_v9 = vrot.slane %v2000_v34, 1 }
  0x42   : > { %v2227_v48 = vsel %vm485_vm3, %v660_v50, %v664_v30  ;;  %v648_v0 = vor.u32 %v647_v60, %v643_v32  ;;  %v667_v16 = vshrl.u32 %v2234_v39, 16  ;;  %v669_v28 = vshll.u32 %v2234_v39, 16 }
  0x43   : > { %706 = vrot.lane.b32.xlu2 %v2227_v48, %s1922_s18  ;;  %v676_v35 = vrot.slane %v674_v15, 1  ;;  %v744_v32 = vrot.slane %v1969_v4, 1  ;;  %v2248_v46 = vsel %vm742_vm4, %v746_v17, %v747_v29  ;;  %v750_v4 = vrot.slane %v2004_v36, 1 }
  0x44   : > { %v2238_v25 = vsel %vm485_vm3, %v648_v0, %v652_v62  ;;  %v671_v30 = vrot.slane %v669_v28, 1  ;;  %v755_v62 = vrot.slane %v2014_v41, 1  ;;  %v752_v0 = vrot.slane %v2064_v19, 1 }
  0x45   : > { %704 = vrot.lane.b32.xlu1 %v2238_v25, %s1922_s18  ;;  %v2254_v60 = vsel %vm742_vm4, %v743_v38, %v744_v32  ;;  %v753_v15 = vrot.slane %v2053_v14, 1  ;;  %v751_v17 = vsel %vm742_vm4, %v749_v40, %v750_v4  ;;  %v758_v34 = vrot.slane %v2033_v56, 1 }
  0x46   : > { %v672_v45 = vor.u32 %v671_v30, %v667_v16  ;;  %3029 = vst [vmem:[#allocation2_spill] sm:$0xff] %v2254_v60  ;;  %v2270_v16 = vsel %vm742_vm4, %v755_v62, %v756_v9  ;;  %v759_v36 = vrot.slane %v2037_v58, 1  ;;  %v764_v29 = vrot.slane %v2114_v5, 1 }
  0x47   : > { %v2273_v28 = vsel %vm742_vm4, %v752_v0, %v753_v15  ;;  %v765_v14 = vrot.slane %v2104_v63, 1  ;;  %v761_v30 = vrot.slane %v2081_v27, 1  ;;  %v767_v58 = vrot.slane %v2110_v1, 1 }
  0x48   : > { %v2251_v50 = vsel %vm485_vm3, %v672_v45, %v676_v35  ;;  %v762_v35 = vrot.slane %v2069_v22, 1  ;;  %v2287_v38 = vsel %vm742_vm4, %v758_v34, %v759_v36  ;;  %v768_v63 = vrot.slane %v2094_v59, 1 }
  0x49   : > { %708 = vrot.lane.b32.xlu0 %v2251_v50, %s1922_s18  ;;  %v2290_v32 = vsel %vm742_vm4, %v764_v29, %v765_v14  ;;  %v773_v22 = vrot.slane %v2169_v23, 1  ;;  %v774_v40 = vrot.slane %v2162_v10, 1  ;;  %v770_v4 = vrot.slane %v2128_v20, 1 }
  0x4a   : > { %v2293_v45 = vsel %vm742_vm4, %v761_v30, %v762_v35  ;;  %v771_v62 = vrot.slane %v2119_v7, 1  ;;  %v2308_v9 = vsel %vm742_vm4, %v767_v58, %v768_v63  ;;  %v776_v59 = vrot.slane %v2145_v52, 1 }
  0x4b   : > { %793 = vrot.lane.b32.xlu2 %v2248_v46, %s1923_s19  ;;  %v2311_v0 = vsel %vm742_vm4, %v773_v22, %v774_v40  ;;  %v777_v10 = vrot.slane %v2136_v43, 1  ;;  %v782_v7 = vrot.slane %v2213_v31, 1  ;;  %v783_v34 = vrot.slane %v2197_v11, 1 }
  0x4c   : > { %v2314_v15 = vsel %vm742_vm4, %v770_v4, %v771_v62  ;;  %v779_v36 = vrot.slane %v2179_v33, 1  ;;  %v780_v29 = vrot.slane %v2173_v26, 1  ;;  %v785_v43 = vrot.slane %v2201_v13, 1 }
  0x4d   : > { %791 = vrot.lane.b32.xlu1 %v2254_v60, %s1923_s19  ;;  %v2329_v14 = vsel %vm742_vm4, %v776_v59, %v777_v10  ;;  %v2332_v30 = vsel %vm742_vm4, %v782_v7, %v783_v34  ;;  %v786_v11 = vrot.slane %v2190_v53, 1  ;;  %vm1263_vm13 = vcmask 261120  }
  0x4e   : > { %v2335_v35 = vsel %vm742_vm4, %v779_v36, %v780_v29  ;;  %vm1316_vm14 = vcmask 293888   ;;  %vm1648_vm15 = vcmask 60416   ;;  %vm1614_vm1 = vcmask 58368  }
  0x4f   : > { %v2346_v26 = vsel %vm742_vm4, %v785_v43, %v786_v11 }
  0x51   : > { %795 = vrot.lane.b32.xlu0 %v751_v17, %s1923_s19 }
  0x53   : > { %799 = vrot.lane.b32.xlu2 %v2270_v16, %s1923_s19 }
  0x55   : > { %797 = vrot.lane.b32.xlu1 %v2273_v28, %s1923_s19 }
  0x59   : > { %801 = vrot.lane.b32.xlu0 %v2287_v38, %s1923_s19 }
  0x5b   : > { %805 = vrot.lane.b32.xlu2 %v2290_v32, %s1923_s19 }
  0x5d   : > { %803 = vrot.lane.b32.xlu1 %v2293_v45, %s1923_s19 }
  0x61   : > { %807 = vrot.lane.b32.xlu0 %v2308_v9, %s1923_s19 }
  0x63   : > { %811 = vrot.lane.b32.xlu2 %v2311_v0, %s1923_s19 }
  0x65   : > { %809 = vrot.lane.b32.xlu1 %v2314_v15, %s1923_s19 }
  0x69   : > { %813 = vrot.lane.b32.xlu0 %v2329_v14, %s1923_s19 }
  0x6b   : > { %817 = vrot.lane.b32.xlu2 %v2332_v30, %s1923_s19 }
  0x6d   : > { %815 = vrot.lane.b32.xlu1 %v2335_v35, %s1923_s19 }
  0x71   : > { %819 = vrot.lane.b32.xlu0 %v2346_v26, %s1923_s19 }
  0x73   : > { %868 = vrot.lane.b32.xlu2 %v2060_v18, %s1924_s20 }
  0x75   : > { %824 = vrot.lane.b32.xlu1 %v2027_v51, %s1925_s21 }
  0x79   : > { %904 = vrot.lane.b32.xlu0 %v2248_v46, %s1926_s22 }
  0x7a   : > { %v687_v58 = vpop.permute.xlu2 %686 }
  0x7b   : > { %968 = vrot.lane.b32.xlu2 %v2049_v12, %s1927_s23  ;;  %v1042_v36 = vsel %vm1032_vm6, %v2014_v41, %v687_v58 }
  0x7d   : > { %936 = vrot.lane.b32.xlu1 %v2018_v42, %s1928_s24 }
  0x81   : > { %1000 = vrot.lane.b32.xlu0 %v751_v17, %s1929_s25 }
  0x82   : > { %v2360_v53 = vpop.permute.xlu2 %688 }
  0x83   : > { %832 = vrot.lane.b32.xlu2 %v2033_v56, %s1925_s21 }
  0x85   : > { %826 = vrot.lane.b32.xlu1 %v2018_v42, %s1925_s21 }
  0x88   : > { %v2370_v18 = vpop.permute.xlu0 %678 }
  0x89   : > { %870 = vrot.lane.b32.xlu0 %v2049_v12, %s1924_s20 }
  0x8b   : > { %906 = vrot.lane.b32.xlu2 %v751_v17, %s1926_s22 }
  0x8c   : > { %v2372_v46 = vpop.permute.xlu2 %694 }
  0x8d   : > { %876 = vrot.lane.b32.xlu1 %v2075_v24, %s1924_s20 }
  0x91   : > { %912 = vrot.lane.b32.xlu0 %v2287_v38, %s1926_s22 }
  0x93   : > { %944 = vrot.lane.b32.xlu2 %v2081_v27, %s1928_s24  ;;  %v683_v63 = vpop.permute.xlu1 %682 }
  0x94   : > { %v2380_v22 = vpop.permute.xlu2 %700  ;;  %v681_v12 = vpop.permute.xlu0 %680 }
  0x95   : > { %938 = vrot.lane.b32.xlu1 %v2064_v19, %s1928_s24  ;;  %v1036_v62 = vsel %vm1032_vm6, %v2027_v51, %v681_v12 }
  0x99   : > { %970 = vrot.lane.b32.xlu0 %v2090_v55, %s1927_s23 }
  0x9b   : > { %1002 = vrot.lane.b32.xlu2 %v2273_v28, %s1929_s25  ;;  %v685_v17 = vpop.permute.xlu1 %684 }
  0x9c   : > { %v691_v4 = vpop.permute.xlu0 %690 }
  0x9d   : > { %976 = vrot.lane.b32.xlu1 %v2099_v61, %s1927_s23  ;;  %v2390_v40 = vpop.permute.xlu2 %706 }
  0xa1   : > { %1008 = vrot.lane.b32.xlu0 %v2293_v45, %s1929_s25 }
  0xa3   : > { %884 = vrot.lane.b32.xlu2 %v2158_v6, %s1924_s20 }
  0xa5   : > { %840 = vrot.lane.b32.xlu1 %v2128_v20, %s1925_s21  ;;  %v693_v59 = vpop.permute.xlu1 %692  ;;  %v794_v10 = vpop.permute.xlu2 %793 }
  0xa6   : > { %v2401_v7 = vsel %vm1065_vm5, %v1036_v62, %v794_v10  ;;  %v2403_v34 = vpop.permute.xlu0 %696  ;;  %v1048_v12 = vsel %vm1032_vm6, %v2114_v5, %v693_v59 }
  0xa9   : > { %920 = vrot.lane.b32.xlu0 %v2314_v15, %s1926_s22 }
  0xab   : > { %984 = vrot.lane.b32.xlu2 %v2205_v54, %s1927_s23 }
  0xad   : > { %952 = vrot.lane.b32.xlu1 %v2169_v23, %s1928_s24  ;;  %v800_v51 = vpop.permute.xlu2 %799 }
  0xae   : > { %v2414_v29 = vsel %vm1065_vm5, %v1042_v36, %v800_v51 }
  0xaf   : > { %v699_v43 = vpop.permute.xlu1 %698 }
  0xb0   : > { %v1054_v36 = vsel %vm1032_vm6, %v2169_v23, %v699_v43 }
  0xb1   : > { %1016 = vrot.lane.b32.xlu0 %v2311_v0, %s1929_s25  ;;  %v2418_v11 = vpop.permute.xlu0 %702 }
  0xb3   : > { %834 = vrot.lane.b32.xlu2 %v2081_v27, %s1925_s21 }
  0xb5   : > { %828 = vrot.lane.b32.xlu1 %v2064_v19, %s1925_s21  ;;  %v806_v58 = vpop.permute.xlu2 %805 }
  0xb6   : > { %v2427_v62 = vsel %vm1065_vm5, %v1048_v12, %v806_v58 }
  0xb7   : > { %v705_v10 = vpop.permute.xlu1 %704 }
  0xb9   : > { %872 = vrot.lane.b32.xlu0 %v2090_v55, %s1924_s20  ;;  %v1038_v55 = vsel %vm1032_vm6, %v2018_v42, %v683_v63  ;;  %v1300_v63 = vld [vmem:[%s3023_s1 + $0x10] sm:$0x3] }
  0xbb   : > { %908 = vrot.lane.b32.xlu2 %v2273_v28, %s1926_s22  ;;  %v2435_v51 = vpop.permute.xlu0 %708  ;;  %v1060_v28 = vsel %vm1032_vm6, %v2213_v31, %v705_v10  ;;  %v1310_v10 = vunpack.c.l.b16 %v1300_v63 }
  0xbd   : > { %878 = vrot.lane.b32.xlu1 %v2099_v61, %s1924_s20  ;;  %v812_v59 = vpop.permute.xlu2 %811 }
  0xbe   : > { %v2440_v60 = vsel %vm1065_vm5, %v1054_v36, %v812_v59 }
  0xbf   : > { %v2442_v12 = vpop.permute.xlu1 %791 }
  0xc1   : > { %914 = vrot.lane.b32.xlu0 %v2293_v45, %s1926_s22  ;;  %v1040_v45 = vsel %vm1032_vm6, %v2064_v19, %v685_v17  ;;  %v1044_v19 = vsel %vm1032_vm6, %v2033_v56, %v2360_v53 }
  0xc3   : > { %946 = vrot.lane.b32.xlu2 %v2114_v5, %s1928_s24  ;;  %v796_v43 = vpop.permute.xlu0 %795 }
  0xc4   : > { %v2455_v58 = vsel %vm1065_vm5, %v1038_v55, %v796_v43  ;;  %v1313_v55 = vpack.c.b16 %v1310_v10, %v1310_v10  ;;  %v1885_v10 = vld [vmem:[%s3023_s1] sm:$0xff] }
  0xc5   : > { %940 = vrot.lane.b32.xlu1 %v2014_v41, %s1928_s24  ;;  %v818_v61 = vpop.permute.xlu2 %817 }
  0xc6   : > { %v2458_v36 = vsel %vm1065_vm5, %v1060_v28, %v818_v61  ;;  %v1351_v43 = vsel %vm1349_vm7, %v1313_v55, 0 }
  0xc7   : > { %v798_v59 = vpop.permute.xlu1 %797  ;;  %1358 = vmatpush.bf16.msra.mxu0 %v1351_v43  ;;  %1887 = vmatpush.bf16.msra.mxu1 %v1351_v43 }
  0xc8   : > { %v2463_v42 = vsel %vm1065_vm5, %v1040_v45, %v798_v59  ;;  %v1886_v45 = vld [vmem:[%s3023_s1 + $0x8] sm:$0xff]  ;;  %v1046_v59 = vsel %vm1032_vm6, %v2081_v27, %v691_v4  ;;  %1888 = vmatpush.bf16.msra.mxu2 %v1351_v43  ;;  %1889 = vmatpush.bf16.msra.mxu3 %v1351_v43  ;;  %v1050_v27 = vsel %vm1032_vm6, %v2110_v1, %v2372_v46 }
  0xc9   : > { %972 = vrot.lane.b32.xlu0 %v2044_v8, %s1927_s23 }
  0xcb   : > { %1004 = vrot.lane.b32.xlu2 %v2270_v16, %s1929_s25  ;;  %v802_v17 = vpop.permute.xlu0 %801  ;;  %1359 = vmatpush.bf16.msra.mxu0 %v1886_v45 }
  0xcc   : > { %v2478_v61 = vsel %vm1065_vm5, %v1044_v19, %v802_v17  ;;  %1890 = vmatpush.bf16.msra.mxu1 %v1886_v45  ;;  %1891 = vmatpush.bf16.msra.mxu2 %v1886_v45  ;;  %v1052_v17 = vsel %vm1032_vm6, %v2128_v20, %v2403_v34 }
  0xcd   : > { %978 = vrot.lane.b32.xlu1 %v2151_v57, %s1927_s23  ;;  %v869_v28 = vpop.permute.xlu2 %868  ;;  %1892 = vmatpush.bf16.msra.mxu3 %v1886_v45 }
  0xcf   : > { %v804_v63 = vpop.permute.xlu1 %803  ;;  %1360 = vmatpush.bf16.msra.mxu0 %v1885_v10 }
  0xd0   : > { %v2486_v53 = vsel %vm1065_vm5, %v1046_v59, %v804_v63  ;;  %1893 = vmatpush.bf16.msra.mxu1 %v1885_v10  ;;  %1894 = vmatpush.bf16.msra.mxu2 %v1885_v10  ;;  %v1058_v63 = vsel %vm1032_vm6, %v2179_v33, %v2418_v11 }
  0xd1   : > { %1010 = vrot.lane.b32.xlu0 %v2290_v32, %s1929_s25  ;;  %1895 = vmatpush.bf16.msra.mxu3 %v1885_v10 }
  0xd3   : > { %848 = vrot.lane.b32.xlu2 %v2213_v31, %s1925_s21  ;;  %v808_v4 = vpop.permute.xlu0 %807 }
  0xd4   : > { %v2501_v19 = vsel %vm1065_vm5, %v1050_v27, %v808_v4  ;;  %v1034_v4 = vsel %vm1032_vm6, %v1965_v3, %v2370_v18 }
  0xd5   : > { %842 = vrot.lane.b32.xlu1 %v2169_v23, %s1925_s21  ;;  %v969_v55 = vpop.permute.xlu2 %968  ;;  %v1056_v23 = vsel %vm1032_vm6, %v2145_v52, %v2380_v22 }
  0xd7   : > { %v810_v43 = vpop.permute.xlu1 %809 }
  0xd8   : > { %v2507_v45 = vsel %vm1065_vm5, %v1052_v17, %v810_v43  ;;  %v1067_v43 = vsel %vm1065_vm5, %v1034_v4, %v2442_v12 }
  0xd9   : > { %886 = vrot.lane.b32.xlu0 %v2205_v54, %s1924_s20 }
  0xdb   : > { %922 = vrot.lane.b32.xlu2 %v2311_v0, %s1926_s22  ;;  %v814_v46 = vpop.permute.xlu0 %813  ;;  %v1062_v0 = vsel %vm1032_vm6, %v2201_v13, %v2390_v40 }
  0xdc   : > { %v2519_v59 = vsel %vm1065_vm5, %v1056_v23, %v814_v46 }
  0xdd   : > { %892 = vrot.lane.b32.xlu1 %v2238_v25, %s1924_s20  ;;  %v833_v34 = vpop.permute.xlu2 %832 }
  0xdf   : > { %v816_v54 = vpop.permute.xlu1 %815 }
  0xe0   : > { %v2525_v10 = vsel %vm1065_vm5, %v1058_v63, %v816_v54 }
  0xe1   : > { %928 = vrot.lane.b32.xlu0 %v2332_v30, %s1926_s22 }
  0xe3   : > { %960 = vrot.lane.b32.xlu2 %v2201_v13, %s1928_s24  ;;  %v820_v22 = vpop.permute.xlu0 %819 }
  0xe4   : > { %v2537_v11 = vsel %vm1065_vm5, %v1062_v0, %v820_v22 }
  0xe5   : > { %954 = vrot.lane.b32.xlu1 %v2145_v52, %s1928_s24  ;;  %v907_v27 = vpop.permute.xlu2 %906 }
  0xe7   : > { %v825_v17 = vpop.permute.xlu1 %824 }
  0xe8   : > { %v1100_v23 = vsel %vm1098_vm8, %v1067_v43, %v825_v17 }
  0xe9   : > { %986 = vrot.lane.b32.xlu0 %v2184_v44, %s1927_s23  ;;  %v1133_v40 = vsel %vm1131_vm9, %v1100_v23, %v869_v28 }
  0xeb   : > { %1018 = vrot.lane.b32.xlu2 %v2329_v14, %s1929_s25  ;;  %v905_v46 = vpop.permute.xlu0 %904 }
  0xec   : > { %v1166_v12 = vsel %vm1164_vm10, %v1133_v40, %v905_v46  ;;  %v1108_v46 = vsel %vm1098_vm8, %v2414_v29, %v833_v34 }
  0xed   : > { %992 = vrot.lane.b32.xlu1 %v2227_v48, %s1927_s23  ;;  %v945_v18 = vpop.permute.xlu2 %944 }
  0xef   : > { %v937_v63 = vpop.permute.xlu1 %936 }
  0xf0   : > { %v1199_v54 = vsel %vm1197_vm11, %v1166_v12, %v937_v63 }
  0xf1   : > { %1024 = vrot.lane.b32.xlu0 %v2346_v26, %s1929_s25  ;;  %v1232_v0 = vsel %vm1230_vm12, %v1199_v54, %v969_v55 }
  0xf3   : > { %836 = vrot.lane.b32.xlu2 %v2114_v5, %s1925_s21  ;;  %v1001_v28 = vpop.permute.xlu0 %1000 }
  0xf4   : > { %v1265_v4 = vsel %vm1263_vm13, %v1232_v0, %v1001_v28 }
  0xf5   : > { %830 = vrot.lane.b32.xlu1 %v2014_v41, %s1925_s21  ;;  %v1003_v22 = vpop.permute.xlu2 %1002  ;;  %1849 = vmatmul.msk.bf16.vlgmr.msra.gmra.mxu0 %vm1316_vm14, %v1265_v4 }
  0xf7   : > { %v827_v17 = vpop.permute.xlu1 %826 }
  0xf8   : > { %v1102_v41 = vsel %vm1098_vm8, %v2401_v7, %v827_v17 }
  0xf9   : > { %874 = vrot.lane.b32.xlu0 %v2044_v8, %s1924_s20 }
  0xfb   : > { %910 = vrot.lane.b32.xlu2 %v2270_v16, %s1926_s22  ;;  %v871_v55 = vpop.permute.xlu0 %870 }
  0xfc   : > { %v1135_v16 = vsel %vm1131_vm9, %v1102_v41, %v871_v55  ;;  %v789_v41 = vrot.slane %v2224_v47, 1 }
  0xfd   : > { %880 = vrot.lane.b32.xlu1 %v2151_v57, %s1924_s20  ;;  %v885_v5 = vpop.permute.xlu2 %884  ;;  %v1168_v57 = vsel %vm1164_vm10, %v1135_v16, %v907_v27 }
  0xff   : > { %v877_v43 = vpop.permute.xlu1 %876 }
 0x100   : > { %v1141_v7 = vsel %vm1131_vm9, %v1108_v46, %v877_v43 }
 0x101   : > { %916 = vrot.lane.b32.xlu0 %v2290_v32, %s1926_s22 }
 0x103   : > { %948 = vrot.lane.b32.xlu2 %v2110_v1, %s1928_s24  ;;  %v913_v23 = vpop.permute.xlu0 %912 }
 0x104   : > { %v1174_v63 = vsel %vm1164_vm10, %v1141_v7, %v913_v23 }
 0x105   : > { %942 = vrot.lane.b32.xlu1 %v2033_v56, %s1928_s24  ;;  %v985_v8 = vpop.permute.xlu2 %984 }
 0x107   : > { %v939_v40 = vpop.permute.xlu1 %938 }
 0x108   : > { %v1201_v32 = vsel %vm1197_vm11, %v1168_v57, %v939_v40 }
 0x109   : > { %974 = vrot.lane.b32.xlu0 %v2075_v24, %s1927_s23  ;;  %v1207_v24 = vsel %vm1197_vm11, %v1174_v63, %v945_v18 }
 0x10b   : > { %1006 = vrot.lane.b32.xlu2 %v2287_v38, %s1929_s25  ;;  %v971_v56 = vpop.permute.xlu0 %970 }
 0x10c   : > { %v1234_v27 = vsel %vm1230_vm12, %v1201_v32, %v971_v56 }
 0x10d   : > { %980 = vrot.lane.b32.xlu1 %v2141_v49, %s1927_s23  ;;  %v835_v12 = vpop.permute.xlu2 %834  ;;  %v1267_v29 = vsel %vm1263_vm13, %v1234_v27, %v1003_v22 }
 0x10e   : > { %1850 = vmatmul.msk.bf16.gmra.mxu0 %vm1316_vm14, %v1267_v29  ;;  %v1110_v27 = vsel %vm1098_vm8, %v2478_v61, %v835_v12 }
 0x10f   : > { %v977_v34 = vpop.permute.xlu1 %976 }
 0x110   : > { %v1240_v38 = vsel %vm1230_vm12, %v1207_v24, %v977_v34 }
 0x111   : > { %1012 = vrot.lane.b32.xlu0 %v2308_v9, %s1929_s25 }
 0x113   : > { %850 = vrot.lane.b32.xlu2 %v2201_v13, %s1925_s21  ;;  %v1009_v54 = vpop.permute.xlu0 %1008 }
 0x114   : > { %v1273_v28 = vsel %vm1263_vm13, %v1240_v38, %v1009_v54 }
 0x115   : > { %844 = vrot.lane.b32.xlu1 %v2145_v52, %s1925_s21  ;;  %v909_v0 = vpop.permute.xlu2 %908  ;;  %1853 = vmatmul.msk.bf16.vlgmr.msra.gmra.mxu1 %vm1316_vm14, %v1273_v28 }
 0x117   : > { %v841_v22 = vpop.permute.xlu1 %840 }
 0x118   : > { %v1116_v18 = vsel %vm1098_vm8, %v2501_v19, %v841_v22 }
 0x119   : > { %888 = vrot.lane.b32.xlu0 %v2184_v44, %s1924_s20  ;;  %v1149_v13 = vsel %vm1131_vm9, %v1116_v18, %v885_v5 }
 0x11b   : > { %924 = vrot.lane.b32.xlu2 %v2329_v14, %s1926_s22  ;;  %v921_v4 = vpop.permute.xlu0 %920 }
 0x11c   : > { %v1182_v17 = vsel %vm1164_vm10, %v1149_v13, %v921_v4 }
 0x11d   : > { %894 = vrot.lane.b32.xlu1 %v2227_v48, %s1924_s20  ;;  %v947_v52 = vpop.permute.xlu2 %946 }
 0x11f   : > { %v953_v55 = vpop.permute.xlu1 %952 }
 0x120   : > { %v1215_v43 = vsel %vm1197_vm11, %v1182_v17, %v953_v55 }
 0x121   : > { %930 = vrot.lane.b32.xlu0 %v2346_v26, %s1926_s22  ;;  %v1248_v44 = vsel %vm1230_vm12, %v1215_v43, %v985_v8  ;;  %v788_v26 = vrot.slane %v2234_v39, 1 }
 0x123   : > { %962 = vrot.lane.b32.xlu2 %v2234_v39, %s1928_s24  ;;  %v1017_v14 = vpop.permute.xlu0 %1016  ;;  %v2634_v40 = vsel %vm742_vm4, %v788_v26, %v789_v41 }
 0x124   : > { %v1281_v48 = vsel %vm1263_vm13, %v1248_v44, %v1017_v14 }
 0x125   : > { %956 = vrot.lane.b32.xlu1 %v2179_v33, %s1928_s24  ;;  %v1005_v19 = vpop.permute.xlu2 %1004  ;;  %1857 = vmatmul.msk.bf16.vlgmr.msra.gmra.mxu2 %vm1316_vm14, %v1281_v48 }
 0x127   : > { %v829_v5 = vpop.permute.xlu1 %828 }
 0x128   : > { %v1104_v47 = vsel %vm1098_vm8, %v2455_v58, %v829_v5  ;;  %v1884_v58 = vld [vmem:[%s1982_s17 + $0x78] sm:$0xff] }
 0x129   : > { %988 = vrot.lane.b32.xlu0 %v2216_v37, %s1927_s23  ;;  %v408_v24 = vshrl.u32 %v1884_v58, 16  ;;  %v411_v54 = vshll.u32 %v1884_v58, 16 }
 0x12b   : > { %1020 = vrot.lane.b32.xlu2 %v2335_v35, %s1929_s25  ;;  %v873_v23 = vpop.permute.xlu0 %872 }
 0x12c   : > { %v1137_v32 = vsel %vm1131_vm9, %v1104_v47, %v873_v23 }
 0x12d   : > { %994 = vrot.lane.b32.xlu1 %v2251_v50, %s1927_s23  ;;  %v2631_v8 = vpop.permute.xlu2 %848  ;;  %v1170_v56 = vsel %vm1164_vm10, %v1137_v32, %v909_v0 }
 0x12e   : > { %v1124_v23 = vsel %vm1098_vm8, %v2525_v10, %v2631_v8 }
 0x12f   : > { %v879_v16 = vpop.permute.xlu1 %878 }
 0x131   : > { %1026 = vrot.lane.b32.xlu0 %v2634_v40, %s1929_s25 }
 0x133   : > { %882 = vrot.lane.b32.xlu2 %v2141_v49, %s1924_s20  ;;  %v915_v57 = vpop.permute.xlu0 %914 }
 0x135   : > { %838 = vrot.lane.b32.xlu1 %v2110_v1, %s1925_s21  ;;  %v923_v46 = vpop.permute.xlu2 %922  ;;  %v1143_v1 = vsel %vm1131_vm9, %v1110_v27, %v879_v16 }
 0x136   : > { %v1176_v61 = vsel %vm1164_vm10, %v1143_v1, %v915_v57 }
 0x137   : > { %v941_v7 = vpop.permute.xlu1 %940 }
 0x138   : > { %v1203_v49 = vsel %vm1197_vm11, %v1170_v56, %v941_v7 }
 0x139   : > { %918 = vrot.lane.b32.xlu0 %v2308_v9, %s1926_s22 }
 0x13b   : > { %982 = vrot.lane.b32.xlu2 %v2158_v6, %s1927_s23  ;;  %v973_v63 = vpop.permute.xlu0 %972  ;;  %v1209_v6 = vsel %vm1197_vm11, %v1176_v61, %v947_v52 }
 0x13c   : > { %v1236_v34 = vsel %vm1230_vm12, %v1203_v49, %v973_v63 }
 0x13d   : > { %950 = vrot.lane.b32.xlu1 %v2128_v20, %s1928_s24  ;;  %v961_v29 = vpop.permute.xlu2 %960  ;;  %v1269_v12 = vsel %vm1263_vm13, %v1236_v34, %v1005_v19  ;;  %v410_v20 = vrot.slane %v408_v24, 7 }
 0x13e   : > { %1851 = vmatmul.msk.bf16.gmra.mxu0 %vm1316_vm14, %v1269_v12 }
 0x13f   : > { %v979_v9 = vpop.permute.xlu1 %978  ;;  %v413_v13 = vor.u32 %v411_v54, %v410_v20  ;;  %v484_v55 = vsel %vm1959_vm2, %v410_v20, 0 }
 0x140   : > { %v1242_v38 = vsel %vm1230_vm12, %v1209_v6, %v979_v9  ;;  %v902_v47 = vrot.slane %v484_v55, 1  ;;  %v3030_v9 = vld [vmem:[#allocation2_spill] sm:$0xff] }
 0x141   : > { %1014 = vrot.lane.b32.xlu0 %v2314_v15, %s1929_s25  ;;  %v467_v15 = vsel %vm1959_vm2, 0, %v413_v13 }
 0x142   : > { %v859_v52 = vshll.u32 %v467_v15, 16  ;;  %v857_v43 = vshrl.u32 %v467_v15, 16  ;;  %v901_v16 = vrot.slane %v467_v15, 1 }
 0x143   : > { %852 = vrot.lane.b32.xlu2 %v2234_v39, %s1925_s21  ;;  %v1011_v0 = vpop.permute.xlu0 %1010 }
 0x144   : > { %v1275_v22 = vsel %vm1263_vm13, %v1242_v38, %v1011_v0  ;;  %v861_v44 = vrot.slane %v859_v52, 1 }
 0x145   : > { %846 = vrot.lane.b32.xlu1 %v2179_v33, %s1925_s21  ;;  %v1019_v28 = vpop.permute.xlu2 %1018  ;;  %1854 = vmatmul.msk.bf16.gmra.mxu1 %vm1316_vm14, %v1275_v22 }
 0x146   : > { %v862_v19 = vor.u32 %v861_v44, %v857_v43 }
 0x147   : > { %v843_v18 = vpop.permute.xlu1 %842 }
 0x149   : > { %890 = vrot.lane.b32.xlu0 %v2216_v37, %s1924_s20  ;;  %v864_v37 = vshll.u32 %v484_v55, 16 }
 0x14b   : > { %926 = vrot.lane.b32.xlu2 %v2335_v35, %s1926_s22  ;;  %v887_v4 = vpop.permute.xlu0 %886  ;;  %v1118_v35 = vsel %vm1098_vm8, %v2507_v45, %v843_v18  ;;  %v866_v48 = vrot.slane %v864_v37, 1 }
 0x14c   : > { %v1151_v2 = vsel %vm1131_vm9, %v1118_v35, %v887_v4 }
 0x14d   : > { %896 = vrot.lane.b32.xlu1 %v2251_v50, %s1924_s20  ;;  %v2679_v33 = vpop.permute.xlu2 %836  ;;  %v1184_v26 = vsel %vm1164_vm10, %v1151_v2, %v923_v46  ;;  %v867_v41 = vsel %vm485_vm3, %v862_v19, %v866_v48 }
 0x14e   : > { %v1112_v6 = vsel %vm1098_vm8, %v2486_v53, %v2679_v33 }
 0x14f   : > { %v893_v17 = vpop.permute.xlu1 %892 }
 0x151   : > { %932 = vrot.lane.b32.xlu0 %v2634_v40, %s1926_s22 }
 0x153   : > { %964 = vrot.lane.b32.xlu2 %v467_v15, %s1928_s24  ;;  %v929_v14 = vpop.permute.xlu0 %928 }
 0x155   : > { %958 = vrot.lane.b32.xlu1 %v2213_v31, %s1928_s24  ;;  %v911_v50 = vpop.permute.xlu2 %910  ;;  %v1157_v31 = vsel %vm1131_vm9, %v1124_v23, %v893_v17 }
 0x156   : > { %v1190_v32 = vsel %vm1164_vm10, %v1157_v31, %v929_v14 }
 0x157   : > { %v955_v5 = vpop.permute.xlu1 %954 }
 0x158   : > { %v1217_v45 = vsel %vm1197_vm11, %v1184_v26, %v955_v5 }
 0x159   : > { %990 = vrot.lane.b32.xlu0 %v2238_v25, %s1927_s23  ;;  %v903_v25 = vsel %vm742_vm4, %v901_v16, %v902_v47 }
 0x15b   : > { %1022 = vrot.lane.b32.xlu2 %v2332_v30, %s1929_s25  ;;  %v987_v57 = vpop.permute.xlu0 %986  ;;  %v1223_v30 = vsel %vm1197_vm11, %v1190_v32, %v961_v29 }
 0x15c   : > { %v1250_v46 = vsel %vm1230_vm12, %v1217_v45, %v987_v57 }
 0x15d   : > { %996 = vrot.lane.b32.xlu1 %v867_v41, %s1927_s23  ;;  %v1283_v10 = vsel %vm1263_vm13, %v1250_v46, %v1019_v28  ;;  %v949_v7 = vpop.permute.xlu2 %948 }
 0x15e   : > { %1858 = vmatmul.msk.bf16.gmra.mxu2 %vm1316_vm14, %v1283_v10 }
 0x15f   : > { %v993_v8 = vpop.permute.xlu1 %992 }
 0x160   : > { %v1256_v56 = vsel %vm1230_vm12, %v1223_v30, %v993_v8 }
 0x161   : > { %1028 = vrot.lane.b32.xlu0 %v903_v25, %s1929_s25 }
 0x163   : > { %854 = vrot.lane.b32.xlu2 %v467_v15, %s1925_s21  ;;  %v1025_v27 = vpop.permute.xlu0 %1024 }
 0x164   : > { %v1289_v49 = vsel %vm1263_vm13, %v1256_v56, %v1025_v27 }
 0x165   : > { %821 = vrot.lane.b32.xlu1 %v2634_v40, %s1923_s19  ;;  %1861 = vmatmul.msk.bf16.vlgmr.msra.gmra.mxu3 %vm1316_vm14, %v1289_v49  ;;  %v1007_v1 = vpop.permute.xlu2 %1006 }
 0x167   : > { %v831_v58 = vpop.permute.xlu1 %830 }
 0x168   : > { %v1106_v40 = vsel %vm1098_vm8, %v2463_v42, %v831_v58 }
 0x169   : > { %898 = vrot.lane.b32.xlu0 %v867_v41, %s1924_s20 }
 0x16b   : > { %966 = vrot.lane.b32.xlu2 %v1965_v3, %s1928_s24  ;;  %v875_v63 = vpop.permute.xlu0 %874 }
 0x16d   : > { %934 = vrot.lane.b32.xlu1 %v903_v25, %s1926_s22  ;;  %v2724_v34 = vpop.permute.xlu2 %850 }
 0x16f   : > { %v881_v29 = vpop.permute.xlu1 %880 }
 0x170   : > { %v1145_v54 = vsel %vm1131_vm9, %v1112_v6, %v881_v29 }
 0x171   : > { %998 = vrot.lane.b32.xlu0 %v1993_v21, %s1927_s23  ;;  %v1139_v21 = vsel %vm1131_vm9, %v1106_v40, %v875_v63  ;;  %v1126_v40 = vsel %vm1098_vm8, %v2458_v36, %v2724_v34 }
 0x172   : > { %v1362_v3 = vpop.f32.mrf.mxu0  ;;  %v1172_v24 = vsel %vm1164_vm10, %v1139_v21, %v911_v50 }
 0x173   : > { %v1616_v61 = vpack.c.bf16 %v1362_v3, %v1362_v3  ;;  %v917_v12 = vpop.permute.xlu0 %916  ;;  %v1511_v38 = vmul.f32 %v1362_v3, %v1362_v3  ;;  %v1442_v28 = vsel %vm1065_vm5, %v1362_v3, 0.0 }
 0x174   : > { %v1178_v33 = vsel %vm1164_vm10, %v1145_v54, %v917_v12 }
 0x175   : > { %1030 = vrot.lane.b32.xlu1 %v3030_v9, %s1929_s25  ;;  %1649 = vst.msk [vmem:[%s2731_s7] sm:$0xf] %vm1648_vm15, %v1616_v61  ;;  %v925_v4 = vpop.permute.xlu2 %924  ;;  %v1543_v53 = vsel %vm1065_vm5, %v1511_v38, 0.0  ;;  %v1211_v35 = vsel %vm1197_vm11, %v1178_v33, %v949_v7 }
 0x177   : > { %v943_v42 = vpop.permute.xlu1 %942 }
 0x178   : > { %v1205_v20 = vsel %vm1197_vm11, %v1172_v24, %v943_v42 }
 0x17a   : > { %v1364_v0 = vpop.f32.mrf.mxu0 }
 0x17b   : > { %v1443_v22 = vsel %vm1065_vm5, %v1364_v0, 0.0  ;;  %v1512_v18 = vmul.f32 %v1364_v0, %v1364_v0  ;;  %v1617_v13 = vpack.c.bf16 %v1364_v0, %v1364_v0  ;;  %v975_v15 = vpop.permute.xlu0 %974 }
 0x17c   : > { %v1444_v52 = vadd.f32 %v1443_v22, %v1442_v28  ;;  %v1238_v17 = vsel %vm1230_vm12, %v1205_v20, %v975_v15 }
 0x17d   : > { %v1544_v55 = vsel %vm1065_vm5, %v1512_v18, 0.0  ;;  %1650 = vst.msk [vmem:[%s2731_s7 + $0x4] sm:$0xf] %vm1648_vm15, %v1617_v13  ;;  %v1271_v43 = vsel %vm1263_vm13, %v1238_v17, %v1007_v1  ;;  %v963_v2 = vpop.permute.xlu2 %962 }
 0x17e   : > { %v1545_v37 = vadd.f32 %v1544_v55, %v1543_v53  ;;  %1852 = vmatmul.msk.bf16.gmra.mxu0 %vm1316_vm14, %v1271_v43 }
 0x17f   : > { %v981_v44 = vpop.permute.xlu1 %980 }
 0x180   : > { %v1244_v14 = vsel %vm1230_vm12, %v1211_v35, %v981_v44 }
 0x183   : > { %v1013_v50 = vpop.permute.xlu0 %1012 }
 0x184   : > { %v1277_v19 = vsel %vm1263_vm13, %v1244_v14, %v1013_v50 }
 0x185   : > { %1855 = vmatmul.msk.bf16.gmra.mxu1 %vm1316_vm14, %v1277_v19  ;;  %v1021_v46 = vpop.permute.xlu2 %1020 }
 0x187   : > { %v845_v48 = vpop.permute.xlu1 %844 }
 0x188   : > { %v1120_v32 = vsel %vm1098_vm8, %v2440_v60, %v845_v48 }
 0x18b   : > { %v1367_v5 = vpop.f32.mrf.mxu0  ;;  %v889_v26 = vpop.permute.xlu0 %888 }
 0x18c   : > { %v1445_v41 = vsel %vm1065_vm5, %v1367_v5, 0.0  ;;  %v1513_v23 = vmul.f32 %v1367_v5, %v1367_v5  ;;  %v1618_v45 = vpack.c.bf16 %v1367_v5, %v1367_v5  ;;  %v1153_v49 = vsel %vm1131_vm9, %v1120_v32, %v889_v26 }
 0x18d   : > { %v1446_v31 = vadd.f32 %v1445_v41, %v1444_v52  ;;  %v1186_v29 = vsel %vm1164_vm10, %v1153_v49, %v925_v4  ;;  %v883_v12 = vpop.permute.xlu2 %882 }
 0x18e   : > { %v1546_v47 = vsel %vm1065_vm5, %v1513_v23, 0.0  ;;  %1651 = vst.msk [vmem:[%s2731_s7 + $0x8] sm:$0xf] %vm1648_vm15, %v1618_v45 }
 0x18f   : > { %v895_v16 = vpop.permute.xlu1 %894  ;;  %v1547_v57 = vadd.f32 %v1546_v47, %v1545_v37 }
 0x190   : > { %v1159_v61 = vsel %vm1131_vm9, %v1126_v40, %v895_v16 }
 0x192   : > { %v2764_v10 = vpop.f32.mrf.mxu1 }
 0x193   : > { %v1624_v8 = vpack.c.bf16 %v2764_v10, %v2764_v10  ;;  %v1369_v25 = vpop.f32.mrf.mxu0  ;;  %v931_v7 = vpop.permute.xlu0 %930 }
 0x194   : > { %v1447_v30 = vsel %vm1065_vm5, %v1369_v25, 0.0  ;;  %v1514_v56 = vmul.f32 %v1369_v25, %v1369_v25  ;;  %v1619_v27 = vpack.c.bf16 %v1369_v25, %v1369_v25  ;;  %v1192_v6 = vsel %vm1164_vm10, %v1159_v61, %v931_v7 }
 0x195   : > { %1657 = vst.msk [vmem:[%s2731_s7 + $0x20] sm:$0xf] %vm1648_vm15, %v1624_v8  ;;  %v1448_v58 = vadd.f32 %v1447_v30, %v1446_v31  ;;  %v1225_v38 = vsel %vm1197_vm11, %v1192_v6, %v963_v2  ;;  %v983_v0 = vpop.permute.xlu2 %982 }
 0x196   : > { %v1548_v60 = vsel %vm1065_vm5, %v1514_v56, 0.0  ;;  %1652 = vst.msk [vmem:[%s2731_s7 + $0xc] sm:$0xf] %vm1648_vm15, %v1619_v27 }
 0x197   : > { %v957_v1 = vpop.permute.xlu1 %956  ;;  %v1549_v63 = vadd.f32 %v1548_v60, %v1547_v57 }
 0x198   : > { %v1219_v3 = vsel %vm1197_vm11, %v1186_v29, %v957_v1 }
 0x19a   : > { %v2781_v9 = vpop.f32.mrf.mxu1 }
 0x19b   : > { %v1625_v21 = vpack.c.bf16 %v2781_v9, %v2781_v9  ;;  %v989_v42 = vpop.permute.xlu0 %988 }
 0x19c   : > { %v1252_v24 = vsel %vm1230_vm12, %v1219_v3, %v989_v42 }
 0x19d   : > { %1658 = vst.msk [vmem:[%s2731_s7 + $0x24] sm:$0xf] %vm1648_vm15, %v1625_v21  ;;  %v1285_v36 = vsel %vm1263_vm13, %v1252_v24, %v1021_v46  ;;  %v853_v33 = vpop.permute.xlu2 %852 }
 0x19e   : > { %1859 = vmatmul.msk.bf16.gmra.mxu2 %vm1316_vm14, %v1285_v36  ;;  %v1128_v60 = vsel %vm1098_vm8, %v2537_v11, %v853_v33 }
 0x19f   : > { %v995_v34 = vpop.permute.xlu1 %994 }
 0x1a0   : > { %v1258_v20 = vsel %vm1230_vm12, %v1225_v38, %v995_v34 }
 0x1a3   : > { %v1027_v54 = vpop.permute.xlu0 %1026 }
 0x1a4   : > { %v1291_v28 = vsel %vm1263_vm13, %v1258_v20, %v1027_v54 }
 0x1a5   : > { %1862 = vmatmul.msk.bf16.gmra.mxu3 %vm1316_vm14, %v1291_v28  ;;  %v927_v50 = vpop.permute.xlu2 %926 }
 0x1a7   : > { %v839_v22 = vpop.permute.xlu1 %838 }
 0x1a8   : > { %v1114_v18 = vsel %vm1098_vm8, %v2427_v62, %v839_v22  ;;  %v2797_v13 = vpop.f32.mrf.mxu2 }
 0x1a9   : > { %v1632_v15 = vpack.c.bf16 %v2797_v13, %v2797_v13  ;;  %v1147_v4 = vsel %vm1131_vm9, %v1114_v18, %v883_v12 }
 0x1ab   : > { %1665 = vst.msk [vmem:[%s2731_s7 + $0x40] sm:$0xf] %vm1648_vm15, %v1632_v15  ;;  %v919_v52 = vpop.permute.xlu0 %918 }
 0x1ac   : > { %v1180_v17 = vsel %vm1164_vm10, %v1147_v4, %v919_v52 }
 0x1ad   : > { %v965_v16 = vpop.permute.xlu2 %964 }
 0x1af   : > { %v951_v53 = vpop.permute.xlu1 %950 }
 0x1b0   : > { %v1213_v55 = vsel %vm1197_vm11, %v1180_v17, %v951_v53  ;;  %v2806_v43 = vpop.f32.mrf.mxu2 }
 0x1b1   : > { %v1633_v62 = vpack.c.bf16 %v2806_v43, %v2806_v43  ;;  %v1246_v44 = vsel %vm1230_vm12, %v1213_v55, %v983_v0  ;;  %v1064_v0 = vsel %vm1032_vm6, %v2234_v39, %v2435_v51 }
 0x1b3   : > { %1666 = vst.msk [vmem:[%s2731_s7 + $0x44] sm:$0xf] %vm1648_vm15, %v1633_v62  ;;  %v1015_v37 = vpop.permute.xlu0 %1014 }
 0x1b4   : > { %v1279_v35 = vsel %vm1263_vm13, %v1246_v44, %v1015_v37 }
 0x1b5   : > { %1856 = vmatmul.msk.bf16.gmra.mxu1 %vm1316_vm14, %v1279_v35  ;;  %v1023_v3 = vpop.permute.xlu2 %1022 }
 0x1b7   : > { %v847_v14 = vpop.permute.xlu1 %846 }
 0x1b8   : > { %v1122_v47 = vsel %vm1098_vm8, %v2519_v59, %v847_v14 }
 0x1bb   : > { %v1372_v19 = vpop.f32.mrf.mxu0  ;;  %v891_v48 = vpop.permute.xlu0 %890 }
 0x1bc   : > { %v1449_v2 = vsel %vm1065_vm5, %v1372_v19, 0.0  ;;  %v1515_v5 = vmul.f32 %v1372_v19, %v1372_v19  ;;  %v1620_v26 = vpack.c.bf16 %v1372_v19, %v1372_v19  ;;  %v1155_v56 = vsel %vm1131_vm9, %v1122_v47, %v891_v48 }
 0x1bd   : > { %v1450_v41 = vadd.f32 %v1449_v2, %v1448_v58  ;;  %v1188_v1 = vsel %vm1164_vm10, %v1155_v56, %v927_v50  ;;  %v855_v54 = vpop.permute.xlu2 %854  ;;  %v1457_v56 = vsel %vm1065_vm5, %v2764_v10, 0.0 }
 0x1be   : > { %v1550_v45 = vsel %vm1065_vm5, %v1515_v5, 0.0  ;;  %1653 = vst.msk [vmem:[%s2731_s7 + $0x10] sm:$0xf] %vm1648_vm15, %v1620_v26 }
 0x1bf   : > { %v897_v23 = vpop.permute.xlu1 %896  ;;  %v1551_v31 = vadd.f32 %v1550_v45, %v1549_v63 }
 0x1c0   : > { %v1161_v29 = vsel %vm1131_vm9, %v1128_v60, %v897_v23  ;;  %v1459_v60 = vsel %vm1065_vm5, %v2781_v9, 0.0 }
 0x1c2   : > { %v2821_v57 = vpop.f32.mrf.mxu1 }
 0x1c3   : > { %v1626_v46 = vpack.c.bf16 %v2821_v57, %v2821_v57  ;;  %v1374_v32 = vpop.f32.mrf.mxu0  ;;  %v933_v8 = vpop.permute.xlu0 %932 }
 0x1c4   : > { %v1451_v25 = vsel %vm1065_vm5, %v1374_v32, 0.0  ;;  %v1516_v7 = vmul.f32 %v1374_v32, %v1374_v32  ;;  %v1621_v30 = vpack.c.bf16 %v1374_v32, %v1374_v32  ;;  %v1194_v42 = vsel %vm1164_vm10, %v1161_v29, %v933_v8 }
 0x1c5   : > { %1659 = vst.msk [vmem:[%s2731_s7 + $0x28] sm:$0xf] %vm1648_vm15, %v1626_v46  ;;  %v1452_v27 = vadd.f32 %v1451_v25, %v1450_v41  ;;  %v1227_v6 = vsel %vm1197_vm11, %v1194_v42, %v965_v16  ;;  %v967_v17 = vpop.permute.xlu2 %966  ;;  %v1519_v32 = vmul.f32 %v2764_v10, %v2764_v10 }
 0x1c6   : > { %v1552_v59 = vsel %vm1065_vm5, %v1516_v7, 0.0  ;;  %1654 = vst.msk [vmem:[%s2731_s7 + $0x14] sm:$0xf] %vm1648_vm15, %v1621_v30 }
 0x1c7   : > { %v959_v49 = vpop.permute.xlu1 %958  ;;  %v1553_v58 = vadd.f32 %v1552_v59, %v1551_v31 }
 0x1c8   : > { %v1221_v63 = vsel %vm1197_vm11, %v1188_v1, %v959_v49  ;;  %v1558_v1 = vsel %vm1065_vm5, %v1519_v32, 0.0 }
 0x1ca   : > { %v2837_v40 = vpop.f32.mrf.mxu1 }
 0x1cb   : > { %v1627_v61 = vpack.c.bf16 %v2837_v40, %v2837_v40  ;;  %v991_v12 = vpop.permute.xlu0 %990 }
 0x1cc   : > { %v1254_v21 = vsel %vm1230_vm12, %v1221_v63, %v991_v12  ;;  %v1521_v63 = vmul.f32 %v2821_v57, %v2821_v57  ;;  %v1522_v12 = vmul.f32 %v2837_v40, %v2837_v40 }
 0x1cd   : > { %1660 = vst.msk [vmem:[%s2731_s7 + $0x2c] sm:$0xf] %vm1648_vm15, %v1627_v61  ;;  %v1287_v24 = vsel %vm1263_vm13, %v1254_v21, %v1023_v3  ;;  %v1461_v61 = vsel %vm1065_vm5, %v2821_v57, 0.0 }
 0x1ce   : > { %1860 = vmatmul.msk.bf16.gmra.mxu2 %vm1316_vm14, %v1287_v24 }
 0x1cf   : > { %v997_v11 = vpop.permute.xlu1 %996 }
 0x1d0   : > { %v1260_v36 = vsel %vm1230_vm12, %v1227_v6, %v997_v11  ;;  %v1562_v11 = vsel %vm1065_vm5, %v1521_v63, 0.0 }
 0x1d3   : > { %v1029_v34 = vpop.permute.xlu0 %1028 }
 0x1d4   : > { %v1293_v38 = vsel %vm1263_vm13, %v1260_v36, %v1029_v34 }
 0x1d5   : > { %1863 = vmatmul.msk.bf16.gmra.mxu3 %vm1316_vm14, %v1293_v38 }
 0x1d7   : > { %v822_v20 = vpop.permute.xlu1 %821 }
 0x1d8   : > { %v1097_v28 = vsel %vm1065_vm5, %v1064_v0, %v822_v20  ;;  %v1564_v20 = vsel %vm1065_vm5, %v1522_v12, 0.0 }
 0x1d9   : > { %v1130_v22 = vsel %vm1098_vm8, %v1097_v28, %v855_v54 }
 0x1db   : > { %v899_v18 = vpop.permute.xlu0 %898 }
 0x1dc   : > { %v1163_v4 = vsel %vm1131_vm9, %v1130_v22, %v899_v18 }
 0x1df   : > { %v935_v15 = vpop.permute.xlu1 %934 }
 0x1e0   : > { %v1196_v52 = vsel %vm1164_vm10, %v1163_v4, %v935_v15 }
 0x1e1   : > { %v2858_v53 = vpop.f32.mrf.mxu2  ;;  %v1229_v39 = vsel %vm1197_vm11, %v1196_v52, %v967_v17 }
 0x1e2   : > { %v1634_v33 = vpack.c.bf16 %v2858_v53, %v2858_v53 }
 0x1e3   : > { %v999_v51 = vpop.permute.xlu0 %998 }
 0x1e4   : > { %1667 = vst.msk [vmem:[%s2731_s7 + $0x48] sm:$0xf] %vm1648_vm15, %v1634_v33  ;;  %v1262_v55 = vsel %vm1230_vm12, %v1229_v39, %v999_v51 }
 0x1e7   : > { %v1031_v62 = vpop.permute.xlu1 %1030 }
 0x1e8   : > { %v1295_v44 = vsel %vm1263_vm13, %v1262_v55, %v1031_v62  ;;  %v2868_v37 = vpop.f32.mrf.mxu3 }
 0x1e9   : > { %1864 = vmatmul.msk.bf16.gmra.mxu3 %vm1316_vm14, %v1295_v44  ;;  %v1640_v35 = vpack.c.bf16 %v2868_v37, %v2868_v37  ;;  %v2872_v14 = vpop.f32.mrf.mxu2 }
 0x1ea   : > { %v1635_v50 = vpack.c.bf16 %v2872_v14, %v2872_v14  ;;  %v1530_v63 = vmul.f32 %v2872_v14, %v2872_v14 }
 0x1eb   : > { %1673 = vst.msk [vmem:[%s2731_s7 + $0x60] sm:$0xf] %vm1648_vm15, %v1640_v35 }
 0x1ec   : > { %1668 = vst.msk [vmem:[%s2731_s7 + $0x4c] sm:$0xf] %vm1648_vm15, %v1635_v50 }
 0x1f0   : > { %v2880_v19 = vpop.f32.mrf.mxu3 }
 0x1f1   : > { %v1641_v48 = vpack.c.bf16 %v2880_v19, %v2880_v19 }
 0x1f3   : > { %1674 = vst.msk [vmem:[%s2731_s7 + $0x64] sm:$0xf] %vm1648_vm15, %v1641_v48 }
 0x1fb   : > { %v1377_v2 = vpop.f32.mrf.mxu0 }
 0x1fc   : > { %v1453_v5 = vsel %vm1065_vm5, %v1377_v2, 0.0  ;;  %v1517_v26 = vmul.f32 %v1377_v2, %v1377_v2  ;;  %v1622_v41 = vpack.c.bf16 %v1377_v2, %v1377_v2 }
 0x1fd   : > { %v1454_v23 = vadd.f32 %v1453_v5, %v1452_v27  ;;  %v1520_v27 = vmul.f32 %v2781_v9, %v2781_v9  ;;  %v1463_v9 = vsel %vm1065_vm5, %v2837_v40, 0.0 }
 0x1fe   : > { %v1554_v45 = vsel %vm1065_vm5, %v1517_v26, 0.0  ;;  %1655 = vst.msk [vmem:[%s2731_s7 + $0x18] sm:$0xf] %vm1648_vm15, %v1622_v41 }
 0x1ff   : > { %v1555_v31 = vadd.f32 %v1554_v45, %v1553_v58  ;;  %v1560_v10 = vsel %vm1065_vm5, %v1520_v27, 0.0  ;;  %v1527_v45 = vmul.f32 %v2797_v13, %v2797_v13 }
 0x201   : > { %v1574_v27 = vsel %vm1065_vm5, %v1527_v45, 0.0 }
 0x202   : > { %v1392_v16 = vpop.f32.mrf.mxu1 }
 0x203   : > { %v1628_v47 = vpack.c.bf16 %v1392_v16, %v1392_v16  ;;  %v1379_v46 = vpop.f32.mrf.mxu0  ;;  %v1523_v6 = vmul.f32 %v1392_v16, %v1392_v16  ;;  %v1465_v57 = vsel %vm1065_vm5, %v1392_v16, 0.0 }
 0x204   : > { %v1455_v8 = vsel %vm1065_vm5, %v1379_v46, 0.0  ;;  %v1518_v25 = vmul.f32 %v1379_v46, %v1379_v46  ;;  %v1623_v7 = vpack.c.bf16 %v1379_v46, %v1379_v46 }
 0x205   : > { %1661 = vst.msk [vmem:[%s2731_s7 + $0x30] sm:$0xf] %vm1648_vm15, %v1628_v47  ;;  %v1456_v30 = vadd.f32 %v1455_v8, %v1454_v23  ;;  %v1566_v22 = vsel %vm1065_vm5, %v1523_v6, 0.0  ;;  %v1473_v8 = vsel %vm1065_vm5, %v2797_v13, 0.0 }
 0x206   : > { %v1556_v49 = vsel %vm1065_vm5, %v1518_v25, 0.0  ;;  %1656 = vst.msk [vmem:[%s2731_s7 + $0x1c] sm:$0xf] %vm1648_vm15, %v1623_v7  ;;  %v1528_v25 = vmul.f32 %v2806_v43, %v2806_v43 }
 0x207   : > { %v1458_v59 = vadd.f32 %v1457_v56, %v1456_v30  ;;  %v1557_v58 = vadd.f32 %v1556_v49, %v1555_v31  ;;  %v1475_v49 = vsel %vm1065_vm5, %v2806_v43, 0.0  ;;  %v1479_v43 = vsel %vm1065_vm5, %v2872_v14, 0.0 }
 0x208   : > { %v1576_v13 = vsel %vm1065_vm5, %v1528_v25, 0.0 }
 0x209   : > { %v1460_v29 = vadd.f32 %v1459_v60, %v1458_v59  ;;  %v1559_v3 = vadd.f32 %v1558_v1, %v1557_v58  ;;  %v1529_v59 = vmul.f32 %v2858_v53, %v2858_v53  ;;  %v1477_v60 = vsel %vm1065_vm5, %v2858_v53, 0.0 }
 0x20a   : > { %v1394_v21 = vpop.f32.mrf.mxu1 }
 0x20b   : > { %v1462_v42 = vadd.f32 %v1461_v61, %v1460_v29  ;;  %v1561_v24 = vadd.f32 %v1560_v10, %v1559_v3  ;;  %v1629_v36 = vpack.c.bf16 %v1394_v21, %v1394_v21  ;;  %v1524_v54 = vmul.f32 %v1394_v21, %v1394_v21 }
 0x20c   : > { %v1467_v40 = vsel %vm1065_vm5, %v1394_v21, 0.0  ;;  %v1578_v10 = vsel %vm1065_vm5, %v1529_v59, 0.0  ;;  %v1580_v21 = vsel %vm1065_vm5, %v1530_v63, 0.0 }
 0x20d   : > { %v1563_v34 = vadd.f32 %v1562_v11, %v1561_v24  ;;  %v1464_v38 = vadd.f32 %v1463_v9, %v1462_v42  ;;  %1662 = vst.msk [vmem:[%s2731_s7 + $0x34] sm:$0xf] %vm1648_vm15, %v1629_v36  ;;  %v1568_v4 = vsel %vm1065_vm5, %v1524_v54, 0.0 }
 0x20f   : > { %v1466_v0 = vadd.f32 %v1465_v57, %v1464_v38  ;;  %v1565_v28 = vadd.f32 %v1564_v20, %v1563_v34 }
 0x211   : > { %v1468_v18 = vadd.f32 %v1467_v40, %v1466_v0  ;;  %v1567_v15 = vadd.f32 %v1566_v22, %v1565_v28 }
 0x213   : > { %v1569_v52 = vadd.f32 %v1568_v4, %v1567_v15 }
 0x221   : > { %v1412_v17 = vpop.f32.mrf.mxu2 }
 0x222   : > { %v1636_v33 = vpack.c.bf16 %v1412_v17, %v1412_v17  ;;  %v1531_v24 = vmul.f32 %v1412_v17, %v1412_v17  ;;  %v1481_v53 = vsel %vm1065_vm5, %v1412_v17, 0.0 }
 0x224   : > { %1669 = vst.msk [vmem:[%s2731_s7 + $0x50] sm:$0xf] %vm1648_vm15, %v1636_v33  ;;  %v1582_v36 = vsel %vm1065_vm5, %v1531_v24, 0.0 }
 0x228   : > { %v2924_v39 = vpop.f32.mrf.mxu3 }
 0x229   : > { %v1642_v51 = vpack.c.bf16 %v2924_v39, %v2924_v39  ;;  %v1414_v55 = vpop.f32.mrf.mxu2 }
 0x22a   : > { %v1637_v62 = vpack.c.bf16 %v1414_v55, %v1414_v55  ;;  %v1532_v34 = vmul.f32 %v1414_v55, %v1414_v55  ;;  %v1483_v14 = vsel %vm1065_vm5, %v1414_v55, 0.0 }
 0x22b   : > { %1675 = vst.msk [vmem:[%s2731_s7 + $0x68] sm:$0xf] %vm1648_vm15, %v1642_v51 }
 0x22c   : > { %1670 = vst.msk [vmem:[%s2731_s7 + $0x54] sm:$0xf] %vm1648_vm15, %v1637_v62  ;;  %v1584_v0 = vsel %vm1065_vm5, %v1532_v34, 0.0 }
 0x230   : > { %v2932_v44 = vpop.f32.mrf.mxu3 }
 0x231   : > { %v1643_v35 = vpack.c.bf16 %v2932_v44, %v2932_v44 }
 0x232   : > { %v1397_v50 = vpop.f32.mrf.mxu1 }
 0x233   : > { %1676 = vst.msk [vmem:[%s2731_s7 + $0x6c] sm:$0xf] %vm1648_vm15, %v1643_v35  ;;  %v1630_v48 = vpack.c.bf16 %v1397_v50, %v1397_v50  ;;  %v1525_v2 = vmul.f32 %v1397_v50, %v1397_v50  ;;  %v1469_v5 = vsel %vm1065_vm5, %v1397_v50, 0.0  ;;  %v1489_v35 = vsel %vm1065_vm5, %v2868_v37, 0.0 }
 0x234   : > { %v1470_v41 = vadd.f32 %v1469_v5, %v1468_v18  ;;  %v1536_v50 = vmul.f32 %v2880_v19, %v2880_v19 }
 0x235   : > { %1663 = vst.msk [vmem:[%s2731_s7 + $0x38] sm:$0xf] %vm1648_vm15, %v1630_v48  ;;  %v1570_v26 = vsel %vm1065_vm5, %v1525_v2, 0.0 }
 0x236   : > { %v1571_v46 = vadd.f32 %v1570_v26, %v1569_v52  ;;  %v1535_v52 = vmul.f32 %v2868_v37, %v2868_v37 }
 0x238   : > { %v1590_v26 = vsel %vm1065_vm5, %v1535_v52, 0.0 }
 0x23a   : > { %v1399_v23 = vpop.f32.mrf.mxu1 }
 0x23b   : > { %v1471_v31 = vsel %vm1065_vm5, %v1399_v23, 0.0  ;;  %v1526_v16 = vmul.f32 %v1399_v23, %v1399_v23  ;;  %v1631_v47 = vpack.c.bf16 %v1399_v23, %v1399_v23  ;;  %v1537_v23 = vmul.f32 %v2924_v39, %v2924_v39 }
 0x23c   : > { %v1472_v32 = vadd.f32 %v1471_v31, %v1470_v41  ;;  %v1491_v41 = vsel %vm1065_vm5, %v2880_v19, 0.0  ;;  %v1592_v31 = vsel %vm1065_vm5, %v1536_v50, 0.0  ;;  %v1538_v19 = vmul.f32 %v2932_v44, %v2932_v44 }
 0x23d   : > { %v1572_v7 = vsel %vm1065_vm5, %v1526_v16, 0.0  ;;  %1664 = vst.msk [vmem:[%s2731_s7 + $0x3c] sm:$0xf] %vm1648_vm15, %v1631_v47  ;;  %v1493_v16 = vsel %vm1065_vm5, %v2924_v39, 0.0 }
 0x23e   : > { %v1474_v30 = vadd.f32 %v1473_v8, %v1472_v32  ;;  %v1573_v56 = vadd.f32 %v1572_v7, %v1571_v46  ;;  %v1594_v8 = vsel %vm1065_vm5, %v1537_v23, 0.0 }
 0x240   : > { %v1476_v58 = vadd.f32 %v1475_v49, %v1474_v30  ;;  %v1575_v1 = vadd.f32 %v1574_v27, %v1573_v56  ;;  %v1495_v30 = vsel %vm1065_vm5, %v2932_v44, 0.0  ;;  %v1596_v27 = vsel %vm1065_vm5, %v1538_v19, 0.0 }
 0x242   : > { %v1478_v29 = vadd.f32 %v1477_v60, %v1476_v58  ;;  %v1577_v3 = vadd.f32 %v1576_v13, %v1575_v1 }
 0x244   : > { %v1579_v61 = vadd.f32 %v1578_v10, %v1577_v3  ;;  %v1480_v12 = vadd.f32 %v1479_v43, %v1478_v29 }
 0x246   : > { %v1581_v42 = vadd.f32 %v1580_v21, %v1579_v61  ;;  %v1482_v6 = vadd.f32 %v1481_v53, %v1480_v12 }
 0x248   : > { %v1583_v20 = vadd.f32 %v1582_v36, %v1581_v42  ;;  %v1484_v54 = vadd.f32 %v1483_v14, %v1482_v6 }
 0x24a   : > { %v1585_v18 = vadd.f32 %v1584_v0, %v1583_v20 }
 0x251   : > { %v1417_v11 = vpop.f32.mrf.mxu2 }
 0x252   : > { %v1638_v9 = vpack.c.bf16 %v1417_v11, %v1417_v11  ;;  %v1533_v38 = vmul.f32 %v1417_v11, %v1417_v11  ;;  %v1485_v57 = vsel %vm1065_vm5, %v1417_v11, 0.0 }
 0x253   : > { %v1486_v40 = vadd.f32 %v1485_v57, %v1484_v54 }
 0x254   : > { %1671 = vst.msk [vmem:[%s2731_s7 + $0x58] sm:$0xf] %vm1648_vm15, %v1638_v9  ;;  %v1586_v28 = vsel %vm1065_vm5, %v1533_v38, 0.0 }
 0x255   : > { %v1587_v55 = vadd.f32 %v1586_v28, %v1585_v18 }
 0x258   : > { %v1432_v22 = vpop.f32.mrf.mxu3 }
 0x259   : > { %v1644_v15 = vpack.c.bf16 %v1432_v22, %v1432_v22  ;;  %v1419_v4 = vpop.f32.mrf.mxu2  ;;  %v1539_v39 = vmul.f32 %v1432_v22, %v1432_v22  ;;  %v1497_v58 = vsel %vm1065_vm5, %v1432_v22, 0.0 }
 0x25a   : > { %v1487_v17 = vsel %vm1065_vm5, %v1419_v4, 0.0  ;;  %v1534_v33 = vmul.f32 %v1419_v4, %v1419_v4  ;;  %v1639_v51 = vpack.c.bf16 %v1419_v4, %v1419_v4 }
 0x25b   : > { %1677 = vst.msk [vmem:[%s2731_s7 + $0x70] sm:$0xf] %vm1648_vm15, %v1644_v15  ;;  %v1488_v62 = vadd.f32 %v1487_v17, %v1486_v40  ;;  %v1598_v60 = vsel %vm1065_vm5, %v1539_v39, 0.0 }
 0x25c   : > { %v1588_v48 = vsel %vm1065_vm5, %v1534_v33, 0.0  ;;  %1672 = vst.msk [vmem:[%s2731_s7 + $0x5c] sm:$0xf] %vm1648_vm15, %v1639_v51 }
 0x25d   : > { %v1490_v2 = vadd.f32 %v1489_v35, %v1488_v62  ;;  %v1589_v5 = vadd.f32 %v1588_v48, %v1587_v55 }
 0x25f   : > { %v1492_v45 = vadd.f32 %v1491_v41, %v1490_v2  ;;  %v1591_v37 = vadd.f32 %v1590_v26, %v1589_v5 }
 0x260   : > { %v1434_v47 = vpop.f32.mrf.mxu3 }
 0x261   : > { %v1494_v46 = vadd.f32 %v1493_v16, %v1492_v45  ;;  %v1593_v32 = vadd.f32 %v1592_v31, %v1591_v37  ;;  %v1645_v25 = vpack.c.bf16 %v1434_v47, %v1434_v47  ;;  %v1540_v63 = vmul.f32 %v1434_v47, %v1434_v47 }
 0x262   : > { %v1499_v44 = vsel %vm1065_vm5, %v1434_v47, 0.0 }
 0x263   : > { %v1595_v7 = vadd.f32 %v1594_v8, %v1593_v32  ;;  %1678 = vst.msk [vmem:[%s2731_s7 + $0x74] sm:$0xf] %vm1648_vm15, %v1645_v25  ;;  %v1496_v56 = vadd.f32 %v1495_v30, %v1494_v46  ;;  %v1600_v61 = vsel %vm1065_vm5, %v1540_v63, 0.0 }
 0x265   : > { %v1597_v49 = vadd.f32 %v1596_v27, %v1595_v7  ;;  %v1498_v13 = vadd.f32 %v1497_v58, %v1496_v56 }
 0x267   : > { %v1599_v3 = vadd.f32 %v1598_v60, %v1597_v49  ;;  %v1500_v43 = vadd.f32 %v1499_v44, %v1498_v13 }
 0x269   : > { %v1601_v21 = vadd.f32 %v1600_v61, %v1599_v3 }
 0x26c   : > { %v1437_v59 = vpop.f32.mrf.mxu3 }
 0x26d   : > { %v1646_v1 = vpack.c.bf16 %v1437_v59, %v1437_v59  ;;  %v1541_v29 = vmul.f32 %v1437_v59, %v1437_v59  ;;  %v1501_v10 = vsel %vm1065_vm5, %v1437_v59, 0.0 }
 0x26e   : > { %v1502_v42 = vadd.f32 %v1501_v10, %v1500_v43 }
 0x26f   : > { %1679 = vst.msk [vmem:[%s2731_s7 + $0x78] sm:$0xf] %vm1648_vm15, %v1646_v1  ;;  %v1602_v12 = vsel %vm1065_vm5, %v1541_v29, 0.0 }
 0x270   : > { %v1603_v6 = vadd.f32 %v1602_v12, %v1601_v21 }
 0x274   : > { %v1439_v24 = vpop.f32.mrf.mxu3 }
 0x275   : > { %v1503_v11 = vsel %vm1065_vm5, %v1439_v24, 0.0  ;;  %v1542_v53 = vmul.f32 %v1439_v24, %v1439_v24  ;;  %v1647_v9 = vpack.c.bf16 %v1439_v24, %v1439_v24 }
 0x276   : > { %v1504_v36 = vadd.f32 %v1503_v11, %v1502_v42 }
 0x277   : > { %v1604_v34 = vsel %vm1065_vm5, %v1542_v53, 0.0  ;;  %1680 = vst.msk [vmem:[%s2731_s7 + $0x7c] sm:$0xf] %vm1648_vm15, %v1647_v9 }
 0x278   : > { %v1505_v38 = vrot.slane %v1504_v36, 4  ;;  %v1605_v20 = vadd.f32 %v1604_v34, %v1603_v6 }
 0x27a   : > { %v1506_v14 = vadd.f32 %v1505_v38, %v1504_v36  ;;  %v1606_v57 = vrot.slane %v1605_v20, 4 }
 0x27c   : > { %v1507_v54 = vrot.slane %v1506_v14, 2  ;;  %v1607_v0 = vadd.f32 %v1606_v57, %v1605_v20 }
 0x27e   : > { %v1508_v28 = vadd.f32 %v1507_v54, %v1506_v14  ;;  %v1608_v22 = vrot.slane %v1607_v0, 2 }
 0x280   : > { %v1509_v40 = vrot.slane %v1508_v28, 1  ;;  %v1609_v18 = vadd.f32 %v1608_v22, %v1607_v0 }
 0x282   : > { %v1610_v15 = vrot.slane %v1609_v18, 1  ;;  %v1510_v4 = vadd.f32 %v1509_v40, %v1508_v28 }
 0x284   : > { %v1611_v52 = vadd.f32 %v1610_v15, %v1609_v18 }
 0x286   : > { %v1613_v17 = vsel %vm448_vm0, %v1510_v4, %v1611_v52 }
 0x287   : > { %1615 = vst.msk [vmem:[%s181_s11] sm:$0x3] %vm1614_vm1, %v1613_v17 }
 0x288 PF: > { %s14_s12 = sadd.s32 1, %s1919_s12  }
 0x289   : > { %p11_p4 = scmp.ge.s32.totalorder %s14_s12, 4  }
 0x28b   :  { %13 = sbr.rel (!%p11_p4) target bundleno = 1 (0x1), region = 70 }

// kernel: encoder_block_forward.4
= control target key start
LH: loop header
LB: loop body
LE: loop exit
PB: predicated region body
PF: predicated region fallthrough
CT: control target
= control target key end

     0   :  { %s2217_s18 = smov 0   ;;  %s3392_s0 = inlined_call_operand.vmem [shape: bf16[2,16,16,8], index: 0, kind: input, shape index: {}]   ;;  %s3393_s1 = inlined_call_operand.vmem [shape: f32[1,8], index: 1, kind: input, shape index: {}]   ;;  %s3394_s2 = inlined_call_operand.vmem [shape: f32[1,8], index: 2, kind: input, shape index: {}]   ;;  %s3395_s3 = inlined_call_operand.vmem [shape: bf16[72,8], index: 3, kind: input, shape index: {}]   ;;  %s3396_s4 = inlined_call_operand.vmem [shape: bf16[2,16,16,8], index: 4, kind: output, shape index: {0}]   ;;  %s3397_s5 = inlined_call_operand.vmem [shape: f32[2,2,8], index: 5, kind: output, shape index: {1}]  }
   0x1 LB: > { %s2005_s19 = sadd.s32 4294967295, %s2176_s18   ;;  %p2009_p0 = scmp.ge.s32.totalorder %s2176_s18, 1  ;;  %s2176_s18 = sphi %s2217_s18, %s16_s18  }
   0x2   : > { %p190_p1 = scmp.lt.s32.totalorder %s2176_s18, 3 }
   0x4   : > { %p191_p2 = pnand %p2009_p0, %p190_p1 }
   0x6   : > { %194 = sbr.rel (%p191_p2) target bundleno = 702 (0x2be), region = 36 }
   0xb   : > { %vm670_vm0 = vcmask 1040384   ;;  %vm671_vm1 = vsmask.f32 256  ;;  %v2178_v0 = vmov 0   ;;  %p222_p3 = scmp.lt.s32.totalorder %s2005_s19, 1  ;;  %s2179_s28 = smov 8  }
   0xc   : > { %v520_v1 = vrot.slane %v2178_v0, 7  ;;  %vm2226_vm2 = vmand %vm670_vm0, %vm671_vm1  ;;  %v2254_v10 = vld [vmem:[%s3393_s1] ss:$0 sm:$0xff]  ;;  %vm707_vm3 = vsmask.f32 7424  ;;  %vm964_vm4 = vcmask 1046528  }
   0xd   : > { %s3407_s19 = smov (!%p222_p3, %s2005_s19), 1  ;;  %v2262_v17 = vld [vmem:[%s3394_s2] ss:$0 sm:$0xff]  ;;  %s2180_s29 = smov 16   ;;  %vm1287_vm5 = vcmask 130048   ;;  %vm1254_vm6 = vcmask 64512  }
   0xe   : > { %v2232_v3 = vsel %vm2226_vm2, 0, %v520_v1  ;;  %v2236_v4 = vsel %vm2226_vm2, %v520_v1, 0  ;;  %s2049_s20 = sshll.u32 %s3407_s19, 7  ;;  %s2181_s30 = smov 32   ;;  %vm1587_vm7 = vcmask 1043456   ;;  %vm1320_vm8 = vcmask 195584  }
   0xf   : > { %v709_v5 = vshrl.u32 %v2232_v3, 16  ;;  %v711_v6 = vshll.u32 %v2232_v3, 16  ;;  %v716_v7 = vshll.u32 %v2236_v4, 16  ;;  %s2249_s23 = scalar_lea.vmem %s3392_s0, %s2049_s20  ;;  %s2182_s6 = smov 24   ;;  %vm1353_vm9 = vcmask 261120  }
  0x10   : > { %v2121_v11 = vld [vmem:[%s2249_s23 + $0x18] sm:$0xff]   ;;  %v2119_v12 = vld [vmem:[%s2249_s23 + $0x8] sm:$0xff]   ;;  %v2056_v13 = vld [vmem:[%s2249_s23] sm:$0xff]   ;;  %s2183_s7 = smov 56   ;;  %s2184_s8 = smov 48   ;;  %vm1386_vm10 = vcmask 326656  }
  0x11   : > { %v713_v8 = vrot.slane %v711_v6, 1  ;;  %v718_v9 = vrot.slane %v716_v7, 1  ;;  %v2069_v15 = vunpack.c.l.bf16 %v2121_v11  ;;  %v2070_v16 = vunpack.c.h.bf16 %v2121_v11  ;;  %v2122_v19 = vld [vmem:[%s2249_s23 + $0x20] sm:$0xff]   ;;  %v2120_v56 = vld [vmem:[%s2249_s23 + $0x10] sm:$0xff]   ;;  %v2288_v61 = vld [vmem:[%s2249_s23 + $0x28] sm:$0xff]   ;;  %s2185_s9 = smov 40  }
  0x12   : > { %v2061_v18 = vunpack.c.l.bf16 %v2119_v12  ;;  %v2062_v20 = vunpack.c.h.bf16 %v2119_v12  ;;  %v2057_v21 = vunpack.c.l.bf16 %v2056_v13  ;;  %v2058_v22 = vunpack.c.h.bf16 %v2056_v13  ;;  %s2186_s10 = smov 64  }
  0x13   : > { %v714_v14 = vor.u32 %v713_v8, %v709_v5  ;;  %v2073_v23 = vunpack.c.l.bf16 %v2122_v19  ;;  %v311_v25 = vmul.f32 %v2254_v10, %v2069_v15  ;;  %v312_v26 = vmul.f32 %v2254_v10, %v2070_v16 }
  0x14   : > { %v307_v27 = vmul.f32 %v2254_v10, %v2061_v18  ;;  %v308_v28 = vmul.f32 %v2254_v10, %v2062_v20  ;;  %v305_v29 = vmul.f32 %v2254_v10, %v2057_v21  ;;  %v306_v30 = vmul.f32 %v2254_v10, %v2058_v22 }
  0x15   : > { %v2266_v24 = vsel %vm707_vm3, %v714_v14, %v718_v9  ;;  %v2074_v31 = vunpack.c.h.bf16 %v2122_v19  ;;  %v347_v32 = vadd.f32 %v2262_v17, %v311_v25  ;;  %v348_v33 = vadd.f32 %v2262_v17, %v312_v26 }
  0x16   : > { %900 = vrot.lane.b32.xlu0 %v2266_v24, %s2179_s28  ;;  %v343_v34 = vadd.f32 %v2262_v17, %v307_v27  ;;  %v313_v35 = vmul.f32 %v2254_v10, %v2073_v23  ;;  %v344_v36 = vadd.f32 %v2262_v17, %v308_v28  ;;  %v341_v37 = vadd.f32 %v2262_v17, %v305_v29 }
  0x17   : > { %v342_v38 = vadd.f32 %v2262_v17, %v306_v30  ;;  %v314_v39 = vmul.f32 %v2254_v10, %v2074_v31  ;;  %v379_v40 = vmax.f32 %v347_v32, 0.0  ;;  %v380_v41 = vmax.f32 %v348_v33, 0.0 }
  0x18   : > { %v375_v42 = vmax.f32 %v343_v34, 0.0  ;;  %v349_v43 = vadd.f32 %v2262_v17, %v313_v35  ;;  %v376_v44 = vmax.f32 %v344_v36, 0.0  ;;  %v373_v45 = vmax.f32 %v341_v37, 0.0 }
  0x19   : > { %v374_v46 = vmax.f32 %v342_v38, 0.0  ;;  %v350_v47 = vadd.f32 %v2262_v17, %v314_v39  ;;  %v411_v48 = vpack.c.bf16 %v379_v40, %v379_v40  ;;  %v412_v49 = vpack.c.bf16 %v380_v41, %v380_v41 }
  0x1a   : > { %v407_v50 = vpack.c.bf16 %v375_v42, %v375_v42  ;;  %v381_v51 = vmax.f32 %v349_v43, 0.0  ;;  %v408_v52 = vpack.c.bf16 %v376_v44, %v376_v44  ;;  %v405_v53 = vpack.c.bf16 %v373_v45, %v373_v45 }
  0x1b   : > { %v406_v54 = vpack.c.bf16 %v374_v46, %v374_v46  ;;  %v382_v55 = vmax.f32 %v350_v47, 0.0  ;;  %v475_v57 = vunpack.c.l.b16 %v411_v48  ;;  %v476_v58 = vunpack.c.l.b16 %v412_v49 }
  0x1c   : > { %v471_v59 = vunpack.c.l.b16 %v407_v50  ;;  %v413_v60 = vpack.c.bf16 %v381_v51, %v381_v51  ;;  %v472_v62 = vunpack.c.l.b16 %v408_v52  ;;  %v469_v63 = vunpack.c.l.b16 %v405_v53 }
  0x1d   : > { %v470_v0 = vunpack.c.l.b16 %v406_v54  ;;  %v414_v1 = vpack.c.bf16 %v382_v55, %v382_v55  ;;  %v504_v5 = vpack.c.b16 %v476_v58, %v475_v57  ;;  %v2065_v7 = vunpack.c.l.bf16 %v2120_v56 }
  0x1e   : > { %v477_v6 = vunpack.c.l.b16 %v413_v60  ;;  %v2066_v8 = vunpack.c.h.bf16 %v2120_v56  ;;  %v502_v9 = vpack.c.b16 %v472_v62, %v471_v59  ;;  %v2077_v13 = vunpack.c.l.bf16 %v2288_v61 }
  0x1f   : > { %v501_v11 = vpack.c.b16 %v470_v0, %v469_v63  ;;  %v478_v12 = vunpack.c.l.b16 %v414_v1  ;;  %v546_v14 = vshrl.u32 %v504_v5, 16  ;;  %v549_v15 = vshll.u32 %v504_v5, 16 }
  0x20   : > { %v309_v16 = vmul.f32 %v2254_v10, %v2065_v7  ;;  %v310_v18 = vmul.f32 %v2254_v10, %v2066_v8  ;;  %v532_v19 = vshrl.u32 %v502_v9, 16  ;;  %v535_v20 = vshll.u32 %v502_v9, 16 }
  0x21   : > { %v525_v21 = vshrl.u32 %v501_v11, 16  ;;  %v528_v22 = vshll.u32 %v501_v11, 16  ;;  %v548_v23 = vrot.slane %v546_v14, 7  ;;  %v505_v25 = vpack.c.b16 %v478_v12, %v477_v6  ;;  %v2125_v12 = vld [vmem:[%s2249_s23 + $0x38] sm:$0xff]  }
  0x22   : > { %v345_v26 = vadd.f32 %v2262_v17, %v309_v16  ;;  %v346_v27 = vadd.f32 %v2262_v17, %v310_v18  ;;  %v534_v28 = vrot.slane %v532_v19, 7  ;;  %v2078_v30 = vunpack.c.h.bf16 %v2288_v61 }
  0x23   : > { %v527_v29 = vrot.slane %v525_v21, 7  ;;  %v315_v31 = vmul.f32 %v2254_v10, %v2077_v13  ;;  %v551_v32 = vor.u32 %v549_v15, %v548_v23  ;;  %v2299_v33 = vsel %vm2226_vm2, %v548_v23, 0  ;;  %v2124_v13 = vld [vmem:[%s2249_s23 + $0x30] sm:$0xff]  }
  0x24   : > { %v553_v34 = vshrl.u32 %v505_v25, 16  ;;  %v556_v35 = vshll.u32 %v505_v25, 16  ;;  %v764_v36 = vshll.u32 %v2299_v33, 16  ;;  %v537_v37 = vor.u32 %v535_v20, %v534_v28 }
  0x25   : > { %v2304_v38 = vsel %vm2226_vm2, %v534_v28, 0  ;;  %v530_v39 = vor.u32 %v528_v22, %v527_v29  ;;  %v2308_v40 = vsel %vm2226_vm2, 0, %v551_v32  ;;  %v2313_v42 = vsel %vm2226_vm2, %v527_v29, 0 }
  0x26   : > { %v740_v41 = vshll.u32 %v2304_v38, 16  ;;  %v555_v43 = vrot.slane %v553_v34, 7  ;;  %v757_v44 = vshrl.u32 %v2308_v40, 16  ;;  %v759_v45 = vshll.u32 %v2308_v40, 16 }
  0x27   : > { %v766_v46 = vrot.slane %v764_v36, 1  ;;  %v2319_v47 = vsel %vm2226_vm2, 0, %v537_v37  ;;  %v2325_v51 = vsel %vm2226_vm2, 0, %v530_v39  ;;  %v728_v55 = vshll.u32 %v2313_v42, 16 }
  0x28   : > { %v733_v48 = vshrl.u32 %v2319_v47, 16  ;;  %v735_v49 = vshll.u32 %v2319_v47, 16  ;;  %v742_v50 = vrot.slane %v740_v41, 1  ;;  %v761_v52 = vrot.slane %v759_v45, 1 }
  0x29   : > { %v721_v53 = vshrl.u32 %v2325_v51, 16  ;;  %v723_v54 = vshll.u32 %v2325_v51, 16  ;;  %v558_v57 = vor.u32 %v556_v35, %v555_v43  ;;  %v2332_v58 = vsel %vm2226_vm2, %v555_v43, 0 }
  0x2a   : > { %v737_v56 = vrot.slane %v735_v49, 1  ;;  %v377_v59 = vmax.f32 %v345_v26, 0.0  ;;  %v762_v60 = vor.u32 %v761_v52, %v757_v44  ;;  %v730_v62 = vrot.slane %v728_v55, 1  ;;  %v2126_v44 = vld [vmem:[%s2249_s23 + $0x40] sm:$0xff]  }
  0x2b   : > { %v725_v61 = vrot.slane %v723_v54, 1  ;;  %v776_v63 = vshll.u32 %v2332_v58, 16  ;;  %v2337_v1 = vsel %vm2226_vm2, 0, %v558_v57  ;;  %v378_v5 = vmax.f32 %v346_v27, 0.0 }
  0x2c   : > { %v738_v0 = vor.u32 %v737_v56, %v733_v48  ;;  %v409_v6 = vpack.c.bf16 %v377_v59, %v377_v59  ;;  %v2340_v7 = vsel %vm707_vm3, %v762_v60, %v766_v46  ;;  %v769_v9 = vshrl.u32 %v2337_v1, 16 }
  0x2d   : > { %v726_v8 = vor.u32 %v725_v61, %v721_v53  ;;  %v771_v11 = vshll.u32 %v2337_v1, 16  ;;  %908 = vrot.lane.b32.xlu2 %v2340_v7, %s2179_s28  ;;  %v778_v15 = vrot.slane %v776_v63, 1  ;;  %v410_v16 = vpack.c.bf16 %v378_v5, %v378_v5 }
  0x2e   : > { %v2349_v14 = vsel %vm707_vm3, %v738_v0, %v742_v50  ;;  %v473_v18 = vunpack.c.l.b16 %v409_v6  ;;  %v316_v21 = vmul.f32 %v2254_v10, %v2078_v30  ;;  %v351_v22 = vadd.f32 %v2262_v17, %v315_v31 }
  0x2f   : > { %904 = vrot.lane.b32.xlu1 %v2349_v14, %s2179_s28  ;;  %v2354_v19 = vsel %vm707_vm3, %v726_v8, %v730_v62  ;;  %v773_v20 = vrot.slane %v771_v11, 1  ;;  %v474_v23 = vunpack.c.l.b16 %v410_v16  ;;  %v2085_v25 = vunpack.c.l.bf16 %v2125_v12 }
  0x30   : > { %902 = vrot.lane.b32.xlu0 %v2354_v19, %s2179_s28  ;;  %v2086_v26 = vunpack.c.h.bf16 %v2125_v12  ;;  %v2081_v27 = vunpack.c.l.bf16 %v2124_v13  ;;  %v352_v29 = vadd.f32 %v2262_v17, %v316_v21  ;;  %v383_v32 = vmax.f32 %v351_v22, 0.0 }
  0x31   : > { %v774_v28 = vor.u32 %v773_v20, %v769_v9  ;;  %v2082_v34 = vunpack.c.h.bf16 %v2124_v13  ;;  %v503_v35 = vpack.c.b16 %v474_v23, %v473_v18  ;;  %v319_v36 = vmul.f32 %v2254_v10, %v2085_v25 }
  0x32   : > { %v320_v30 = vmul.f32 %v2254_v10, %v2086_v26  ;;  %v317_v31 = vmul.f32 %v2254_v10, %v2081_v27  ;;  %v384_v39 = vmax.f32 %v352_v29, 0.0  ;;  %v415_v41 = vpack.c.bf16 %v383_v32, %v383_v32  ;;  %v2128_v26 = vld [vmem:[%s2249_s23 + $0x50] sm:$0xff]  }
  0x33   : > { %v2365_v37 = vsel %vm707_vm3, %v774_v28, %v778_v15  ;;  %v318_v43 = vmul.f32 %v2254_v10, %v2082_v34  ;;  %v539_v45 = vshrl.u32 %v503_v35, 16  ;;  %v542_v46 = vshll.u32 %v503_v35, 16 }
  0x34   : > { %v355_v48 = vadd.f32 %v2262_v17, %v319_v36  ;;  %v356_v49 = vadd.f32 %v2262_v17, %v320_v30  ;;  %v416_v50 = vpack.c.bf16 %v384_v39, %v384_v39  ;;  %v479_v52 = vunpack.c.l.b16 %v415_v41 }
  0x35   : > { %v353_v53 = vadd.f32 %v2262_v17, %v317_v31  ;;  %v354_v54 = vadd.f32 %v2262_v17, %v318_v43  ;;  %910 = vrot.lane.b32.xlu2 %v2365_v37, %s2179_s28  ;;  %v541_v55 = vrot.slane %v539_v45, 7  ;;  %v2089_v59 = vunpack.c.l.bf16 %v2126_v44 }
  0x36   : > { %v387_v56 = vmax.f32 %v355_v48, 0.0  ;;  %v388_v57 = vmax.f32 %v356_v49, 0.0  ;;  %v480_v60 = vunpack.c.l.b16 %v416_v50  ;;  %v2090_v63 = vunpack.c.h.bf16 %v2126_v44 }
  0x37   : > { %v385_v61 = vmax.f32 %v353_v53, 0.0  ;;  %v386_v62 = vmax.f32 %v354_v54, 0.0  ;;  %v544_v0 = vor.u32 %v542_v46, %v541_v55  ;;  %v2377_v5 = vsel %vm2226_vm2, %v541_v55, 0 }
  0x38   : > { %v419_v6 = vpack.c.bf16 %v387_v56, %v387_v56  ;;  %v420_v8 = vpack.c.bf16 %v388_v57, %v388_v57  ;;  %v752_v9 = vshll.u32 %v2377_v5, 16  ;;  %v506_v11 = vpack.c.b16 %v480_v60, %v479_v52 }
  0x39   : > { %v417_v12 = vpack.c.bf16 %v385_v61, %v385_v61  ;;  %v418_v13 = vpack.c.bf16 %v386_v62, %v386_v62  ;;  %v2382_v15 = vsel %vm2226_vm2, 0, %v544_v0  ;;  %v321_v20 = vmul.f32 %v2254_v10, %v2089_v59 }
  0x3a   : > { %v483_v16 = vunpack.c.l.b16 %v419_v6  ;;  %v484_v18 = vunpack.c.l.b16 %v420_v8  ;;  %v745_v21 = vshrl.u32 %v2382_v15, 16  ;;  %v747_v22 = vshll.u32 %v2382_v15, 16 }
  0x3b   : > { %v754_v23 = vrot.slane %v752_v9, 1  ;;  %v560_v25 = vshrl.u32 %v506_v11, 16  ;;  %v563_v27 = vshll.u32 %v506_v11, 16  ;;  %v481_v29 = vunpack.c.l.b16 %v417_v12 }
  0x3c   : > { %v508_v28 = vpack.c.b16 %v484_v18, %v483_v16  ;;  %v482_v32 = vunpack.c.l.b16 %v418_v13  ;;  %v749_v34 = vrot.slane %v747_v22, 1  ;;  %v322_v36 = vmul.f32 %v2254_v10, %v2090_v63 }
  0x3d   : > { %v562_v35 = vrot.slane %v560_v25, 7  ;;  %v357_v30 = vadd.f32 %v2262_v17, %v321_v20  ;;  %v2097_v43 = vunpack.c.l.bf16 %v2128_v26  ;;  %v2098_v13 = vunpack.c.h.bf16 %v2128_v26 }
  0x3e   : > { %v574_v31 = vshrl.u32 %v508_v28, 16  ;;  %v577_v39 = vshll.u32 %v508_v28, 16  ;;  %v507_v41 = vpack.c.b16 %v482_v32, %v481_v29  ;;  %v750_v44 = vor.u32 %v749_v34, %v745_v21  ;;  %v2127_v34 = vld [vmem:[%s2249_s23 + $0x48] sm:$0xff]  }
  0x3f   : > { %v565_v45 = vor.u32 %v563_v27, %v562_v35  ;;  %v2392_v46 = vsel %vm2226_vm2, %v562_v35, 0  ;;  %v358_v48 = vadd.f32 %v2262_v17, %v322_v36  ;;  %v389_v56 = vmax.f32 %v357_v30, 0.0  ;;  %v2129_v35 = vld [vmem:[%s2249_s23 + $0x58] sm:$0xff]  }
  0x40   : > { %v788_v49 = vshll.u32 %v2392_v46, 16  ;;  %v576_v50 = vrot.slane %v574_v31, 7  ;;  %v567_v52 = vshrl.u32 %v507_v41, 16  ;;  %v570_v53 = vshll.u32 %v507_v41, 16 }
  0x41   : > { %v2397_v54 = vsel %vm707_vm3, %v750_v44, %v754_v23  ;;  %v2401_v55 = vsel %vm2226_vm2, 0, %v565_v45  ;;  %v390_v57 = vmax.f32 %v358_v48, 0.0  ;;  %v421_v6 = vpack.c.bf16 %v389_v56, %v389_v56 }
  0x42   : > { %906 = vrot.lane.b32.xlu1 %v2397_v54, %s2179_s28  ;;  %v781_v59 = vshrl.u32 %v2401_v55, 16  ;;  %v783_v60 = vshll.u32 %v2401_v55, 16  ;;  %v790_v61 = vrot.slane %v788_v49, 1  ;;  %v579_v62 = vor.u32 %v577_v39, %v576_v50 }
  0x43   : > { %v2409_v63 = vsel %vm2226_vm2, %v576_v50, 0  ;;  %v569_v0 = vrot.slane %v567_v52, 7  ;;  %v422_v8 = vpack.c.bf16 %v390_v57, %v390_v57  ;;  %v485_v27 = vunpack.c.l.b16 %v421_v6 }
  0x44   : > { %v785_v9 = vrot.slane %v783_v60, 1  ;;  %v2413_v11 = vsel %vm2226_vm2, 0, %v579_v62  ;;  %v812_v12 = vshll.u32 %v2409_v63, 16  ;;  %v325_v32 = vmul.f32 %v2254_v10, %v2097_v43 }
  0x45   : > { %v805_v16 = vshrl.u32 %v2413_v11, 16  ;;  %v807_v18 = vshll.u32 %v2413_v11, 16  ;;  %v572_v20 = vor.u32 %v570_v53, %v569_v0  ;;  %v2420_v21 = vsel %vm2226_vm2, %v569_v0, 0 }
  0x46   : > { %v786_v22 = vor.u32 %v785_v9, %v781_v59  ;;  %v814_v23 = vrot.slane %v812_v12, 1  ;;  %v800_v25 = vshll.u32 %v2420_v21, 16  ;;  %v486_v26 = vunpack.c.l.b16 %v422_v8 }
  0x47   : > { %v809_v28 = vrot.slane %v807_v18, 1  ;;  %v2425_v29 = vsel %vm2226_vm2, 0, %v572_v20  ;;  %v326_v45 = vmul.f32 %v2254_v10, %v2098_v13  ;;  %v361_v48 = vadd.f32 %v2262_v17, %v325_v32 }
  0x48   : > { %v2431_v36 = vsel %vm707_vm3, %v786_v22, %v790_v61  ;;  %v793_v30 = vshrl.u32 %v2425_v29, 16  ;;  %v795_v31 = vshll.u32 %v2425_v29, 16  ;;  %v802_v39 = vrot.slane %v800_v25, 1 }
  0x49   : > { %912 = vrot.lane.b32.xlu0 %v2431_v36, %s2179_s28  ;;  %v810_v41 = vor.u32 %v809_v28, %v805_v16  ;;  %v509_v44 = vpack.c.b16 %v486_v26, %v485_v27  ;;  %v2093_v49 = vunpack.c.l.bf16 %v2127_v34  ;;  %v2094_v50 = vunpack.c.h.bf16 %v2127_v34 }
  0x4a   : > { %v797_v43 = vrot.slane %v795_v31, 1  ;;  %v2101_v52 = vunpack.c.l.bf16 %v2129_v35  ;;  %v362_v59 = vadd.f32 %v2262_v17, %v326_v45  ;;  %v393_v61 = vmax.f32 %v361_v48, 0.0 }
  0x4b   : > { %v2440_v53 = vsel %vm707_vm3, %v810_v41, %v814_v23  ;;  %v581_v56 = vshrl.u32 %v509_v44, 16  ;;  %v584_v57 = vshll.u32 %v509_v44, 16  ;;  %v323_v62 = vmul.f32 %v2254_v10, %v2093_v49  ;;  %v2131_v41 = vld [vmem:[%s2249_s23 + $0x68] sm:$0xff]  }
  0x4c   : > { %916 = vrot.lane.b32.xlu2 %v2440_v53, %s2179_s28  ;;  %v798_v60 = vor.u32 %v797_v43, %v793_v30  ;;  %v324_v0 = vmul.f32 %v2254_v10, %v2094_v50  ;;  %v394_v8 = vmax.f32 %v362_v59, 0.0  ;;  %v2102_v9 = vunpack.c.h.bf16 %v2129_v35 }
  0x4d   : > { %v583_v6 = vrot.slane %v581_v56, 7  ;;  %v327_v12 = vmul.f32 %v2254_v10, %v2101_v52  ;;  %v425_v16 = vpack.c.bf16 %v393_v61, %v393_v61  ;;  %v359_v18 = vadd.f32 %v2262_v17, %v323_v62  ;;  %v2130_v62 = vld [vmem:[%s2249_s23 + $0x60] sm:$0xff]  }
  0x4e   : > { %v2449_v13 = vsel %vm707_vm3, %v798_v60, %v802_v39  ;;  %v360_v20 = vadd.f32 %v2262_v17, %v324_v0  ;;  %v426_v25 = vpack.c.bf16 %v394_v8, %v394_v8  ;;  %v328_v27 = vmul.f32 %v2254_v10, %v2102_v9 }
  0x4f   : > { %914 = vrot.lane.b32.xlu1 %v2449_v13, %s2179_s28  ;;  %v586_v22 = vor.u32 %v584_v57, %v583_v6  ;;  %v2457_v23 = vsel %vm2226_vm2, %v583_v6, 0  ;;  %v489_v26 = vunpack.c.l.b16 %v425_v16  ;;  %v391_v32 = vmax.f32 %v359_v18, 0.0 }
  0x50   : > { %v824_v28 = vshll.u32 %v2457_v23, 16  ;;  %v392_v34 = vmax.f32 %v360_v20, 0.0  ;;  %v490_v30 = vunpack.c.l.b16 %v426_v25  ;;  %v363_v31 = vadd.f32 %v2262_v17, %v327_v12 }
  0x51   : > { %v2463_v35 = vsel %vm2226_vm2, 0, %v586_v22  ;;  %v364_v39 = vadd.f32 %v2262_v17, %v328_v27  ;;  %v423_v43 = vpack.c.bf16 %v391_v32, %v391_v32  ;;  %v2109_v60 = vunpack.c.l.bf16 %v2131_v41 }
  0x52   : > { %v817_v44 = vshrl.u32 %v2463_v35, 16  ;;  %v819_v45 = vshll.u32 %v2463_v35, 16  ;;  %v826_v48 = vrot.slane %v824_v28, 1  ;;  %v511_v49 = vpack.c.b16 %v490_v30, %v489_v26 }
  0x53   : > { %v424_v50 = vpack.c.bf16 %v392_v34, %v392_v34  ;;  %v395_v52 = vmax.f32 %v363_v31, 0.0  ;;  %v396_v56 = vmax.f32 %v364_v39, 0.0  ;;  %v487_v59 = vunpack.c.l.b16 %v423_v43 }
  0x54   : > { %v821_v57 = vrot.slane %v819_v45, 1  ;;  %v2110_v61 = vunpack.c.h.bf16 %v2131_v41  ;;  %v595_v0 = vshrl.u32 %v511_v49, 16  ;;  %v598_v6 = vshll.u32 %v511_v49, 16 }
  0x55   : > { %v488_v8 = vunpack.c.l.b16 %v424_v50  ;;  %v427_v9 = vpack.c.bf16 %v395_v52, %v395_v52  ;;  %v428_v16 = vpack.c.bf16 %v396_v56, %v396_v56  ;;  %v331_v18 = vmul.f32 %v2254_v10, %v2109_v60 }
  0x56   : > { %v822_v12 = vor.u32 %v821_v57, %v817_v44  ;;  %v332_v20 = vmul.f32 %v2254_v10, %v2110_v61  ;;  %v597_v22 = vrot.slane %v595_v0, 7  ;;  %v2105_v28 = vunpack.c.l.bf16 %v2130_v62 }
  0x57   : > { %v510_v25 = vpack.c.b16 %v488_v8, %v487_v59  ;;  %v491_v27 = vunpack.c.l.b16 %v427_v9  ;;  %v492_v32 = vunpack.c.l.b16 %v428_v16  ;;  %v367_v34 = vadd.f32 %v2262_v17, %v331_v18 }
  0x58   : > { %v2474_v26 = vsel %vm707_vm3, %v822_v12, %v826_v48  ;;  %v368_v30 = vadd.f32 %v2262_v17, %v332_v20  ;;  %v600_v31 = vor.u32 %v598_v6, %v597_v22  ;;  %v2482_v39 = vsel %vm2226_vm2, %v597_v22, 0 }
  0x59   : > { %918 = vrot.lane.b32.xlu0 %v2474_v26, %s2179_s28  ;;  %v588_v41 = vshrl.u32 %v510_v25, 16  ;;  %v591_v44 = vshll.u32 %v510_v25, 16  ;;  %v848_v45 = vshll.u32 %v2482_v39, 16  ;;  %v512_v43 = vpack.c.b16 %v492_v32, %v491_v27 }
  0x5a   : > { %v399_v48 = vmax.f32 %v367_v34, 0.0  ;;  %v400_v49 = vmax.f32 %v368_v30, 0.0  ;;  %v2487_v50 = vsel %vm2226_vm2, 0, %v600_v31  ;;  %v2106_v56 = vunpack.c.h.bf16 %v2130_v62 }
  0x5b   : > { %v590_v52 = vrot.slane %v588_v41, 7  ;;  %v329_v57 = vmul.f32 %v2254_v10, %v2105_v28  ;;  %v841_v59 = vshrl.u32 %v2487_v50, 16  ;;  %v843_v60 = vshll.u32 %v2487_v50, 16  ;;  %v2132_v41 = vld [vmem:[%s2249_s23 + $0x70] sm:$0xff]  }
  0x5c   : > { %v850_v61 = vrot.slane %v848_v45, 1  ;;  %v602_v0 = vshrl.u32 %v512_v43, 16  ;;  %v605_v9 = vshll.u32 %v512_v43, 16  ;;  %v431_v12 = vpack.c.bf16 %v399_v48, %v399_v48 }
  0x5d   : > { %v593_v6 = vor.u32 %v591_v44, %v590_v52  ;;  %v2494_v8 = vsel %vm2226_vm2, %v590_v52, 0  ;;  %v845_v16 = vrot.slane %v843_v60, 1  ;;  %v432_v20 = vpack.c.bf16 %v400_v49, %v400_v49 }
  0x5e   : > { %v836_v18 = vshll.u32 %v2494_v8, 16  ;;  %v604_v62 = vrot.slane %v602_v0, 7  ;;  %v495_v25 = vunpack.c.l.b16 %v431_v12  ;;  %v330_v27 = vmul.f32 %v2254_v10, %v2106_v56 }
  0x5f   : > { %v2499_v22 = vsel %vm2226_vm2, 0, %v593_v6  ;;  %v365_v28 = vadd.f32 %v2262_v17, %v329_v57  ;;  %v846_v32 = vor.u32 %v845_v16, %v841_v59  ;;  %v496_v43 = vunpack.c.l.b16 %v432_v20 }
  0x60   : > { %v829_v34 = vshrl.u32 %v2499_v22, 16  ;;  %v831_v30 = vshll.u32 %v2499_v22, 16  ;;  %v838_v31 = vrot.slane %v836_v18, 1  ;;  %v607_v44 = vor.u32 %v605_v9, %v604_v62 }
  0x61   : > { %v2508_v45 = vsel %vm2226_vm2, %v604_v62, 0  ;;  %v366_v48 = vadd.f32 %v2262_v17, %v330_v27  ;;  %v2512_v49 = vsel %vm707_vm3, %v846_v32, %v850_v61  ;;  %v397_v57 = vmax.f32 %v365_v28, 0.0 }
  0x62   : > { %v833_v52 = vrot.slane %v831_v30, 1  ;;  %v860_v56 = vshll.u32 %v2508_v45, 16  ;;  %922 = vrot.lane.b32.xlu2 %v2512_v49, %s2179_s28  ;;  %v2519_v59 = vsel %vm2226_vm2, 0, %v607_v44  ;;  %v514_v60 = vpack.c.b16 %v496_v43, %v495_v25 }
  0x63   : > { %v398_v0 = vmax.f32 %v366_v48, 0.0  ;;  %v2113_v6 = vunpack.c.l.bf16 %v2132_v41  ;;  %v853_v12 = vshrl.u32 %v2519_v59, 16  ;;  %v855_v61 = vshll.u32 %v2519_v59, 16 }
  0x64   : > { %v834_v9 = vor.u32 %v833_v52, %v829_v34  ;;  %v862_v16 = vrot.slane %v860_v56, 1  ;;  %v616_v18 = vshrl.u32 %v514_v60, 16  ;;  %v619_v62 = vshll.u32 %v514_v60, 16 }
  0x65   : > { %v429_v20 = vpack.c.bf16 %v397_v57, %v397_v57  ;;  %v430_v27 = vpack.c.bf16 %v398_v0, %v398_v0  ;;  %v857_v32 = vrot.slane %v855_v61, 1  ;;  %v2114_v30 = vunpack.c.h.bf16 %v2132_v41 }
  0x66   : > { %v2524_v28 = vsel %vm707_vm3, %v834_v9, %v838_v31  ;;  %v333_v44 = vmul.f32 %v2254_v10, %v2113_v6  ;;  %v618_v25 = vrot.slane %v616_v18, 7  ;;  %vm1419_vm11 = vcmask 392192  }
  0x67   : > { %920 = vrot.lane.b32.xlu1 %v2524_v28, %s2179_s28  ;;  %v493_v34 = vunpack.c.l.b16 %v429_v20  ;;  %v494_v43 = vunpack.c.l.b16 %v430_v27  ;;  %v858_v48 = vor.u32 %v857_v32, %v853_v12  ;;  %v334_v52 = vmul.f32 %v2254_v10, %v2114_v30 }
  0x68   : > { %v369_v56 = vadd.f32 %v2262_v17, %v333_v44  ;;  %v621_v57 = vor.u32 %v619_v62, %v618_v25  ;;  %v2533_v31 = vsel %vm2226_vm2, %v618_v25, 0  ;;  %vm1452_vm12 = vcmask 457728  }
  0x69   : > { %v513_v60 = vpack.c.b16 %v494_v43, %v493_v34  ;;  %v2536_v41 = vsel %vm707_vm3, %v858_v48, %v862_v16  ;;  %v884_v0 = vshll.u32 %v2533_v31, 16  ;;  %v370_v6 = vadd.f32 %v2262_v17, %v334_v52 }
  0x6a   : > { %v401_v9 = vmax.f32 %v369_v56, 0.0  ;;  %924 = vrot.lane.b32.xlu0 %v2536_v41, %s2179_s28  ;;  %v2544_v10 = vsel %vm2226_vm2, 0, %v621_v57  ;;  %vm1485_vm13 = vcmask 523264   ;;  %vm1554_vm14 = vcmask 588800  }
  0x6b   : > { %v609_v12 = vshrl.u32 %v513_v60, 16  ;;  %v612_v61 = vshll.u32 %v513_v60, 16  ;;  %v877_v18 = vshrl.u32 %v2544_v10, 16  ;;  %v879_v62 = vshll.u32 %v2544_v10, 16 }
  0x6c   : > { %v402_v16 = vmax.f32 %v370_v6, 0.0  ;;  %v433_v27 = vpack.c.bf16 %v401_v9, %v401_v9  ;;  %v886_v30 = vrot.slane %v884_v0, 1  ;;  %vm1886_vm15 = vcmask 60416  }
  0x6d   : > { %v611_v20 = vrot.slane %v609_v12, 7  ;;  %v881_v32 = vrot.slane %v879_v62, 1  ;;  %vm1852_vm1 = vcmask 58368  }
  0x6e   : > { %v434_v17 = vpack.c.bf16 %v402_v16, %v402_v16  ;;  %v497_v34 = vunpack.c.l.b16 %v433_v27 }
  0x6f   : > { %v614_v44 = vor.u32 %v612_v61, %v611_v20  ;;  %v2550_v25 = vsel %vm2226_vm2, %v611_v20, 0  ;;  %v882_v43 = vor.u32 %v881_v32, %v877_v18  ;;  %v968_v61 = vrot.slane %v2325_v51, 1 }
  0x70   : > { %v872_v48 = vshll.u32 %v2550_v25, 16  ;;  %v498_v52 = vunpack.c.l.b16 %v434_v17  ;;  %v969_v18 = vrot.slane %v2313_v42, 1 }
  0x71   : > { %v2555_v56 = vsel %vm2226_vm2, 0, %v614_v44  ;;  %v2558_v57 = vsel %vm707_vm3, %v882_v43, %v886_v30  ;;  %v966_v43 = vrot.slane %v2236_v4, 1 }
  0x72   : > { %v865_v60 = vshrl.u32 %v2555_v56, 16  ;;  %v867_v0 = vshll.u32 %v2555_v56, 16  ;;  %928 = vrot.lane.b32.xlu2 %v2558_v57, %s2179_s28  ;;  %v515_v6 = vpack.c.b16 %v498_v52, %v497_v34  ;;  %v874_v12 = vrot.slane %v872_v48, 1 }
  0x73   : > { %v2570_v30 = vsel %vm964_vm4, %v968_v61, %v969_v18  ;;  %v965_v34 = vrot.slane %v2232_v3, 1 }
  0x74   : > { %v869_v9 = vrot.slane %v867_v0, 1  ;;  %v623_v62 = vshrl.u32 %v515_v6, 16  ;;  %v626_v16 = vshll.u32 %v515_v6, 16  ;;  %v977_v0 = vrot.slane %v2308_v40, 1 }
  0x75   : > { %v978_v6 = vrot.slane %v2299_v33, 1  ;;  %v2592_v4 = vsel %vm964_vm4, %v965_v34, %v966_v43  ;;  %v971_v33 = vrot.slane %v2319_v47, 1 }
  0x76   : > { %v870_v20 = vor.u32 %v869_v9, %v865_v60  ;;  %v625_v27 = vrot.slane %v623_v62, 7 }
  0x77   : > { %v2595_v18 = vsel %vm964_vm4, %v977_v0, %v978_v6  ;;  %v995_v0 = vrot.slane %v2499_v22, 1  ;;  %v996_v6 = vrot.slane %v2494_v8, 1  ;;  %v989_v8 = vrot.slane %v2413_v11, 1 }
  0x78   : > { %v2567_v32 = vsel %vm707_vm3, %v870_v20, %v874_v12  ;;  %v628_v17 = vor.u32 %v626_v16, %v625_v27  ;;  %v2576_v44 = vsel %vm2226_vm2, %v625_v27, 0  ;;  %v974_v16 = vrot.slane %v2382_v15, 1 }
  0x79   : > { %926 = vrot.lane.b32.xlu1 %v2567_v32, %s2179_s28  ;;  %v896_v42 = vshll.u32 %v2576_v44, 16  ;;  %v975_v20 = vrot.slane %v2377_v5, 1  ;;  %v972_v27 = vrot.slane %v2304_v38, 1  ;;  %v980_v38 = vrot.slane %v2337_v1, 1 }
  0x7a   : > { %v2583_v48 = vsel %vm2226_vm2, 0, %v628_v17  ;;  %1015 = vrot.lane.b32.xlu2 %v2570_v30, %s2180_s29  ;;  %v986_v17 = vrot.slane %v2425_v29, 1 }
  0x7b   : > { %v889_v52 = vshrl.u32 %v2583_v48, 16  ;;  %v891_v60 = vshll.u32 %v2583_v48, 16  ;;  %v898_v12 = vrot.slane %v896_v42, 1  ;;  %v987_v42 = vrot.slane %v2420_v21, 1 }
  0x7c   : > { %v2613_v34 = vsel %vm964_vm4, %v974_v16, %v975_v20  ;;  %v973_v43 = vsel %vm964_vm4, %v971_v33, %v972_v27  ;;  %v981_v21 = vrot.slane %v2332_v58, 1  ;;  %v993_v58 = vrot.slane %v2457_v23, 1 }
  0x7d   : > { %v893_v9 = vrot.slane %v891_v60, 1  ;;  %v2617_v5 = vsel %vm964_vm4, %v986_v17, %v987_v42  ;;  %v984_v60 = vrot.slane %v2392_v46, 1  ;;  %v2637_v46 = vsel %vm964_vm4, %v995_v0, %v996_v6 }
  0x7e   : > { %v990_v16 = vrot.slane %v2409_v63, 1  ;;  %v1004_v20 = vrot.slane %v2555_v56, 1  ;;  %v1005_v33 = vrot.slane %v2550_v25, 1  ;;  %v1001_v42 = vrot.slane %v2519_v59, 1 }
  0x7f   : > { %v894_v61 = vor.u32 %v893_v9, %v889_v52  ;;  %v983_v52 = vrot.slane %v2401_v55, 1  ;;  %v1002_v63 = vrot.slane %v2508_v45, 1  ;;  %v998_v25 = vrot.slane %v2487_v50, 1 }
  0x80   : > { %v2655_v17 = vsel %vm964_vm4, %v989_v8, %v990_v16  ;;  %v2658_v23 = vsel %vm964_vm4, %v1004_v20, %v1005_v33  ;;  %v1007_v45 = vrot.slane %v2544_v10, 1 }
  0x81   : > { %1013 = vrot.lane.b32.xlu1 %v2592_v4, %s2180_s29  ;;  %v2600_v62 = vsel %vm707_vm3, %v894_v61, %v898_v12  ;;  %v2631_v9 = vsel %vm964_vm4, %v983_v52, %v984_v60  ;;  %v2634_v12 = vsel %vm964_vm4, %v980_v38, %v981_v21  ;;  %v992_v61 = vrot.slane %v2463_v35, 1 }
  0x82   : > { %930 = vrot.lane.b32.xlu0 %v2600_v62, %s2179_s28  ;;  %1021 = vrot.lane.b32.xlu2 %v2595_v18, %s2180_s29  ;;  %v999_v52 = vrot.slane %v2482_v39, 1  ;;  %v2671_v60 = vsel %vm964_vm4, %v1001_v42, %v1002_v63  ;;  %v1008_v39 = vrot.slane %v2533_v31, 1 }
  0x83   : > { %v2652_v27 = vsel %vm964_vm4, %v992_v61, %v993_v58 }
  0x84   : > { %v2674_v38 = vsel %vm964_vm4, %v998_v25, %v999_v52  ;;  %v2685_v0 = vsel %vm964_vm4, %v1007_v45, %v1008_v39 }
  0x87   : > { %v909_v21 = vpop.permute.xlu2 %908 }
  0x88   : > { %v2709_v6 = vpop.permute.xlu0 %900  ;;  %v1264_v63 = vsel %vm1254_vm6, %v2308_v40, %v909_v21 }
  0x89   : > { %1019 = vrot.lane.b32.xlu1 %v2613_v34, %s2180_s29 }
  0x8a   : > { %1017 = vrot.lane.b32.xlu0 %v973_v43, %s2180_s29  ;;  %1027 = vrot.lane.b32.xlu2 %v2617_v5, %s2180_s29 }
  0x91   : > { %1025 = vrot.lane.b32.xlu1 %v2631_v9, %s2180_s29 }
  0x92   : > { %1023 = vrot.lane.b32.xlu0 %v2634_v12, %s2180_s29  ;;  %1033 = vrot.lane.b32.xlu2 %v2637_v46, %s2180_s29 }
  0x99   : > { %1031 = vrot.lane.b32.xlu1 %v2652_v27, %s2180_s29 }
  0x9a   : > { %1029 = vrot.lane.b32.xlu0 %v2655_v17, %s2180_s29  ;;  %1039 = vrot.lane.b32.xlu2 %v2658_v23, %s2180_s29 }
  0xa1   : > { %1037 = vrot.lane.b32.xlu1 %v2671_v60, %s2180_s29  ;;  %v905_v61 = vpop.permute.xlu1 %904 }
  0xa2   : > { %1035 = vrot.lane.b32.xlu0 %v2674_v38, %s2180_s29  ;;  %1090 = vrot.lane.b32.xlu2 %v2354_v19, %s2181_s30  ;;  %v2693_v19 = vpop.permute.xlu2 %910 }
  0xa9   : > { %1046 = vrot.lane.b32.xlu1 %v2325_v51, %s2182_s6 }
  0xaa   : > { %1041 = vrot.lane.b32.xlu0 %v2685_v0, %s2180_s29  ;;  %1190 = vrot.lane.b32.xlu2 %v2349_v14, %s2183_s7  ;;  %v2703_v31 = vpop.permute.xlu2 %916 }
  0xb1   : > { %1158 = vrot.lane.b32.xlu1 %v2319_v47, %s2184_s8 }
  0xb2   : > { %1126 = vrot.lane.b32.xlu0 %v2570_v30, %s2185_s9  ;;  %1054 = vrot.lane.b32.xlu2 %v2337_v1, %s2182_s6 }
  0xb4   : > { %v907_v8 = vpop.permute.xlu1 %906 }
  0xb9   : > { %1048 = vrot.lane.b32.xlu1 %v2319_v47, %s2182_s6 }
  0xba   : > { %1222 = vrot.lane.b32.xlu0 %v973_v43, %s2186_s10  ;;  %1128 = vrot.lane.b32.xlu2 %v973_v43, %s2185_s9  ;;  %v903_v43 = vpop.permute.xlu0 %902 }
  0xbc   : > { %v2715_v30 = vpop.permute.xlu2 %922 }
  0xc1   : > { %1098 = vrot.lane.b32.xlu1 %v2365_v37, %s2181_s30  ;;  %v915_v42 = vpop.permute.xlu1 %914 }
  0xc2   : > { %1092 = vrot.lane.b32.xlu0 %v2349_v14, %s2181_s30  ;;  %1166 = vrot.lane.b32.xlu2 %v2401_v55, %s2184_s8  ;;  %v1258_v14 = vsel %vm1254_vm6, %v2325_v51, %v903_v43  ;;  %v913_v33 = vpop.permute.xlu0 %912  ;;  %v1270_v39 = vsel %vm1254_vm6, %v2425_v29, %v915_v42 }
  0xc9   : > { %1160 = vrot.lane.b32.xlu1 %v2382_v15, %s2184_s8 }
  0xca   : > { %1134 = vrot.lane.b32.xlu0 %v2634_v12, %s2185_s9  ;;  %1224 = vrot.lane.b32.xlu2 %v2613_v34, %s2186_s10 }
  0xcb   : > { %v2747_v52 = vpop.permute.xlu0 %918 }
  0xcc   : > { %v2723_v58 = vpop.permute.xlu2 %928 }
  0xd1   : > { %1198 = vrot.lane.b32.xlu1 %v2431_v36, %s2183_s7 }
  0xd2   : > { %1192 = vrot.lane.b32.xlu0 %v2397_v54, %s2183_s7  ;;  %1106 = vrot.lane.b32.xlu2 %v2474_v26, %s2181_s30 }
  0xd4   : > { %v1016_v16 = vpop.permute.xlu2 %1015 }
  0xd5   : > { %v2734_v20 = vsel %vm1287_vm5, %v1258_v14, %v1016_v16 }
  0xd9   : > { %1062 = vrot.lane.b32.xlu1 %v2463_v35, %s2182_s6  ;;  %v921_v45 = vpop.permute.xlu1 %920 }
  0xda   : > { %1230 = vrot.lane.b32.xlu0 %v2631_v9, %s2186_s10  ;;  %1206 = vrot.lane.b32.xlu2 %v2524_v28, %s2183_s7 }
  0xdc   : > { %v1022_v25 = vpop.permute.xlu2 %1021  ;;  %v2764_v14 = vpop.permute.xlu0 %924 }
  0xdd   : > { %v2745_v51 = vsel %vm1287_vm5, %v1264_v63, %v1022_v25  ;;  %v1276_v63 = vsel %vm1254_vm6, %v2499_v22, %v921_v45 }
  0xe1   : > { %1174 = vrot.lane.b32.xlu1 %v2499_v22, %s2184_s8 }
  0xe2   : > { %1142 = vrot.lane.b32.xlu0 %v2652_v27, %s2185_s9  ;;  %1056 = vrot.lane.b32.xlu2 %v2401_v55, %s2182_s6 }
  0xe4   : > { %v1028_v21 = vpop.permute.xlu2 %1027 }
  0xe5   : > { %v2758_v43 = vsel %vm1287_vm5, %v1270_v39, %v1028_v21 }
  0xe6   : > { %3400 = vst [vmem:[#allocation2_spill] sm:$0xff] %v2758_v43 }
  0xe9   : > { %1050 = vrot.lane.b32.xlu1 %v2382_v15, %s2182_s6 }
  0xea   : > { %1238 = vrot.lane.b32.xlu0 %v2637_v46, %s2186_s10  ;;  %1130 = vrot.lane.b32.xlu2 %v2613_v34, %s2185_s9 }
  0xeb   : > { %v927_v16 = vpop.permute.xlu1 %926 }
  0xec   : > { %v1034_v42 = vpop.permute.xlu2 %1033  ;;  %v1282_v34 = vsel %vm1254_vm6, %v2555_v56, %v927_v16 }
  0xed   : > { %v2771_v25 = vsel %vm1287_vm5, %v1276_v63, %v1034_v42  ;;  %v1262_v42 = vsel %vm1254_vm6, %v2382_v15, %v907_v8  ;;  %v2053_v8 = vld [vmem:[%s3395_s3 + $0x10] sm:$0xff] }
  0xf1   : > { %1100 = vrot.lane.b32.xlu1 %v2431_v36, %s2181_s30  ;;  %v1526_v36 = vld [vmem:[%s3395_s3 + $0x20] sm:$0xf] }
  0xf2   : > { %1094 = vrot.lane.b32.xlu0 %v2397_v54, %s2181_s30  ;;  %1168 = vrot.lane.b32.xlu2 %v2425_v29, %s2184_s8  ;;  %v1544_v54 = vunpack.c.l.b16 %v1526_v36 }
  0xf3   : > { %v2777_v39 = vpop.permute.xlu1 %1013 }
  0xf4   : > { %v2783_v21 = vpop.permute.xlu0 %930  ;;  %v1040_v45 = vpop.permute.xlu2 %1039 }
  0xf5   : > { %3401 = vst [vmem:[#allocation3_spill] sm:$0xff] %v2783_v21  ;;  %v2786_v63 = vsel %vm1287_vm5, %v1282_v34, %v1040_v45  ;;  %v1549_v34 = vpack.c.b16 %v1544_v54, %v1544_v54  ;;  %v1260_v21 = vsel %vm1254_vm6, %v2319_v47, %v905_v61  ;;  %v1268_v47 = vsel %vm1254_vm6, %v2401_v55, %v913_v33  ;;  %v2052_v54 = vld [vmem:[%s3395_s3 + $0x8] sm:$0xff] }
  0xf6   : > { %3402 = vst [vmem:[#allocation4_spill] sm:$0xff] %v2786_v63  ;;  %v1266_v55 = vsel %vm1254_vm6, %v2337_v1, %v2693_v19  ;;  %v1274_v19 = vsel %vm1254_vm6, %v2463_v35, %v2747_v52 }
  0xf7   : > { %v1589_v63 = vsel %vm1587_vm7, %v1549_v34, 0 }
  0xf8   : > { %1594 = vmatpush.bf16.msra.mxu0 %v1589_v63  ;;  %2134 = vmatpush.bf16.msra.mxu1 %v1589_v63 }
  0xf9   : > { %1162 = vrot.lane.b32.xlu1 %v2308_v40, %s2184_s8  ;;  %2135 = vmatpush.bf16.msra.mxu2 %v1589_v63 }
  0xfa   : > { %1136 = vrot.lane.b32.xlu0 %v2631_v9, %s2185_s9  ;;  %1226 = vrot.lane.b32.xlu2 %v2595_v18, %s2186_s10  ;;  %v2054_v9 = vld [vmem:[%s3395_s3 + $0x18] sm:$0xff] }
  0xfb   : > { %v1020_v16 = vpop.permute.xlu1 %1019  ;;  %2136 = vmatpush.bf16.msra.mxu3 %v1589_v63 }
  0xfc   : > { %v2800_v45 = vsel %vm1287_vm5, %v1262_v42, %v1020_v16  ;;  %v1018_v43 = vpop.permute.xlu0 %1017  ;;  %v2804_v36 = vpop.permute.xlu2 %1090  ;;  %1595 = vmatpush.bf16.msra.mxu0 %v2054_v9  ;;  %2137 = vmatpush.bf16.msra.mxu1 %v2054_v9  ;;  %v2051_v16 = vld [vmem:[%s3395_s3] sm:$0xff] }
  0xfd   : > { %v2807_v15 = vsel %vm1287_vm5, %v1260_v21, %v1018_v43  ;;  %2138 = vmatpush.bf16.msra.mxu2 %v2054_v9 }
  0xff   : > { %2139 = vmatpush.bf16.msra.mxu3 %v2054_v9 }
 0x100   : > { %1596 = vmatpush.bf16.msra.mxu0 %v2053_v8  ;;  %2140 = vmatpush.bf16.msra.mxu1 %v2053_v8 }
 0x101   : > { %1200 = vrot.lane.b32.xlu1 %v2449_v13, %s2183_s7  ;;  %2141 = vmatpush.bf16.msra.mxu2 %v2053_v8 }
 0x102   : > { %1194 = vrot.lane.b32.xlu0 %v2340_v7, %s2183_s7  ;;  %1070 = vrot.lane.b32.xlu2 %v2555_v56, %s2182_s6 }
 0x103   : > { %v1026_v61 = vpop.permute.xlu1 %1025  ;;  %2142 = vmatpush.bf16.msra.mxu3 %v2053_v8  ;;  %v1278_v8 = vsel %vm1254_vm6, %v2487_v50, %v2715_v30 }
 0x104   : > { %v2824_v43 = vsel %vm1287_vm5, %v1268_v47, %v1026_v61  ;;  %v1024_v33 = vpop.permute.xlu0 %1023  ;;  %v2829_v21 = vpop.permute.xlu2 %1190  ;;  %1597 = vmatpush.bf16.msra.mxu0 %v2052_v54  ;;  %2143 = vmatpush.bf16.msra.mxu1 %v2052_v54 }
 0x105   : > { %v2832_v63 = vsel %vm1287_vm5, %v1266_v55, %v1024_v33  ;;  %2144 = vmatpush.bf16.msra.mxu2 %v2052_v54 }
 0x107   : > { %2145 = vmatpush.bf16.msra.mxu3 %v2052_v54 }
 0x108   : > { %1598 = vmatpush.bf16.msra.mxu0 %v2051_v16  ;;  %2146 = vmatpush.bf16.msra.mxu1 %v2051_v16 }
 0x109   : > { %1064 = vrot.lane.b32.xlu1 %v2499_v22, %s2182_s6  ;;  %v1272_v22 = vsel %vm1254_vm6, %v2413_v11, %v2703_v31  ;;  %2147 = vmatpush.bf16.msra.mxu2 %v2051_v16 }
 0x10a   : > { %1232 = vrot.lane.b32.xlu0 %v2617_v5, %s2186_s10  ;;  %1144 = vrot.lane.b32.xlu2 %v2637_v46, %s2185_s9  ;;  %v1280_v46 = vsel %vm1254_vm6, %v2519_v59, %v2764_v14  ;;  %v1284_v14 = vsel %vm1254_vm6, %v2544_v10, %v2723_v58 }
 0x10b   : > { %v1032_v42 = vpop.permute.xlu1 %1031  ;;  %2148 = vmatpush.bf16.msra.mxu3 %v2051_v16  ;;  %v1256_v16 = vsel %vm1254_vm6, %v2232_v3, %v2709_v6 }
 0x10c   : > { %v2850_v34 = vsel %vm1287_vm5, %v1274_v19, %v1032_v42  ;;  %v1030_v52 = vpop.permute.xlu0 %1029  ;;  %v2855_v9 = vpop.permute.xlu2 %1054 }
 0x10d   : > { %v2858_v47 = vsel %vm1287_vm5, %v1272_v22, %v1030_v52  ;;  %v1289_v22 = vsel %vm1287_vm5, %v1256_v16, %v2777_v39 }
 0x111   : > { %1114 = vrot.lane.b32.xlu1 %v2567_v32, %s2181_s30 }
 0x112   : > { %1108 = vrot.lane.b32.xlu0 %v2524_v28, %s2181_s30  ;;  %1182 = vrot.lane.b32.xlu2 %v2544_v10, %s2184_s8 }
 0x113   : > { %v1038_v31 = vpop.permute.xlu1 %1037 }
 0x114   : > { %v2870_v61 = vsel %vm1287_vm5, %v1280_v46, %v1038_v31  ;;  %v1036_v55 = vpop.permute.xlu0 %1035  ;;  %v1129_v33 = vpop.permute.xlu2 %1128 }
 0x115   : > { %v2876_v54 = vsel %vm1287_vm5, %v1278_v8, %v1036_v55 }
 0x119   : > { %1176 = vrot.lane.b32.xlu1 %v2487_v50, %s2184_s8 }
 0x11a   : > { %1150 = vrot.lane.b32.xlu0 %v2658_v23, %s2185_s9  ;;  %1240 = vrot.lane.b32.xlu2 %v2674_v38, %s2186_s10 }
 0x11b   : > { %v1047_v28 = vpop.permute.xlu1 %1046 }
 0x11c   : > { %v1042_v30 = vpop.permute.xlu0 %1041  ;;  %v1167_v19 = vpop.permute.xlu2 %1166  ;;  %v1322_v52 = vsel %vm1320_vm8, %v1289_v22, %v1047_v28 }
 0x11d   : > { %v2888_v42 = vsel %vm1287_vm5, %v1284_v14, %v1042_v30  ;;  %v1355_v6 = vsel %vm1353_vm9, %v1322_v52, %v2804_v36 }
 0x121   : > { %1214 = vrot.lane.b32.xlu1 %v2558_v57, %s2183_s7 }
 0x122   : > { %1208 = vrot.lane.b32.xlu0 %v2512_v49, %s2183_s7  ;;  %1058 = vrot.lane.b32.xlu2 %v2425_v29, %s2182_s6 }
 0x123   : > { %v1159_v58 = vpop.permute.xlu1 %1158 }
 0x124   : > { %v1127_v46 = vpop.permute.xlu0 %1126  ;;  %v1225_v39 = vpop.permute.xlu2 %1224 }
 0x125   : > { %v1388_v31 = vsel %vm1386_vm10, %v1355_v6, %v1127_v46 }
 0x126   : > { %v1421_v8 = vsel %vm1419_vm11, %v1388_v31, %v1159_v58 }
 0x127   : > { %v1454_v29 = vsel %vm1452_vm12, %v1421_v8, %v2829_v21 }
 0x129   : > { %1052 = vrot.lane.b32.xlu1 %v2308_v40, %s2182_s6 }
 0x12a   : > { %1246 = vrot.lane.b32.xlu0 %v2685_v0, %s2186_s10  ;;  %1132 = vrot.lane.b32.xlu2 %v2595_v18, %s2185_s9 }
 0x12b   : > { %v1049_v36 = vpop.permute.xlu1 %1048 }
 0x12c   : > { %v1223_v55 = vpop.permute.xlu0 %1222  ;;  %v1107_v28 = vpop.permute.xlu2 %1106 }
 0x12d   : > { %v1487_v14 = vsel %vm1485_vm13, %v1454_v29, %v1223_v55 }
 0x12e   : > { %2031 = vmatmul.msk.bf16.vlgmr.msra.gmra.mxu0 %vm1554_vm14, %v1487_v14 }
 0x131   : > { %1102 = vrot.lane.b32.xlu1 %v2449_v13, %s2181_s30  ;;  %v1324_v13 = vsel %vm1320_vm8, %v2734_v20, %v1049_v36 }
 0x132   : > { %1096 = vrot.lane.b32.xlu0 %v2340_v7, %s2181_s30  ;;  %1170 = vrot.lane.b32.xlu2 %v2413_v11, %s2184_s8 }
 0x133   : > { %v1099_v40 = vpop.permute.xlu1 %1098 }
 0x134   : > { %v1093_v21 = vpop.permute.xlu0 %1092  ;;  %v1207_v30 = vpop.permute.xlu2 %1206 }
 0x135   : > { %v1357_v22 = vsel %vm1353_vm9, %v1324_v13, %v1093_v21  ;;  %v2133_v21 = vld [vmem:[%s2249_s23 + $0x78] sm:$0xff]  }
 0x136   : > { %v2118_v13 = vunpack.c.h.bf16 %v2133_v21 }
 0x139   : > { %1164 = vrot.lane.b32.xlu1 %v2337_v1, %s2184_s8  ;;  %v1390_v1 = vsel %vm1386_vm10, %v1357_v22, %v1129_v33 }
 0x13a   : > { %1138 = vrot.lane.b32.xlu0 %v2617_v5, %s2185_s9  ;;  %1228 = vrot.lane.b32.xlu2 %v2634_v12, %s2186_s10  ;;  %v1330_v5 = vsel %vm1320_vm8, %v2745_v51, %v2855_v9 }
 0x13b   : > { %v1161_v18 = vpop.permute.xlu1 %1160  ;;  %v1363_v52 = vsel %vm1353_vm9, %v1330_v5, %v1099_v40 }
 0x13c   : > { %v1135_v7 = vpop.permute.xlu0 %1134  ;;  %v2930_v16 = vpop.permute.xlu2 %1056  ;;  %v1423_v12 = vsel %vm1419_vm11, %v1390_v1, %v1161_v18  ;;  %v2117_v18 = vunpack.c.l.bf16 %v2133_v21  ;;  %v2169_v1 = vld [vmem:[%s3394_s2] ss:$0 sm:$0xff] }
 0x13d   : > { %v1396_v46 = vsel %vm1386_vm10, %v1363_v52, %v1135_v7  ;;  %v1011_v52 = vrot.slane %v2576_v44, 1 }
 0x141   : > { %1202 = vrot.lane.b32.xlu1 %v2440_v53, %s2183_s7 }
 0x142   : > { %1196 = vrot.lane.b32.xlu0 %v2365_v37, %s2183_s7  ;;  %1072 = vrot.lane.b32.xlu2 %v2544_v10, %s2182_s6  ;;  %v1429_v37 = vsel %vm1419_vm11, %v1396_v46, %v1167_v19 }
 0x143   : > { %v1199_v20 = vpop.permute.xlu1 %1198 }
 0x144   : > { %v1193_v58 = vpop.permute.xlu0 %1192  ;;  %v2945_v6 = vpop.permute.xlu2 %1130  ;;  %v1462_v10 = vsel %vm1452_vm12, %v1429_v37, %v1199_v20  ;;  %v1010_v20 = vrot.slane %v2583_v48, 1 }
 0x145   : > { %v1456_v33 = vsel %vm1452_vm12, %v1423_v12, %v1193_v58 }
 0x146   : > { %v1489_v51 = vsel %vm1485_vm13, %v1456_v33, %v1225_v39 }
 0x147   : > { %2032 = vmatmul.msk.bf16.gmra.mxu0 %vm1554_vm14, %v1489_v51 }
 0x149   : > { %1066 = vrot.lane.b32.xlu1 %v2487_v50, %s2182_s6 }
 0x14a   : > { %1234 = vrot.lane.b32.xlu0 %v2655_v17, %s2186_s10  ;;  %1146 = vrot.lane.b32.xlu2 %v2674_v38, %s2185_s9 }
 0x14b   : > { %v1063_v9 = vpop.permute.xlu1 %1062 }
 0x14c   : > { %v1231_v31 = vpop.permute.xlu0 %1230  ;;  %v2959_v8 = vpop.permute.xlu2 %1168  ;;  %v1338_v50 = vsel %vm1320_vm8, %v2858_v47, %v1063_v9  ;;  %v3003_v9 = vsel %vm964_vm4, %v1010_v20, %v1011_v52 }
 0x14d   : > { %v1495_v39 = vsel %vm1485_vm13, %v1462_v10, %v1231_v31  ;;  %v1371_v38 = vsel %vm1353_vm9, %v1338_v50, %v1107_v28 }
 0x14e   : > { %2035 = vmatmul.msk.bf16.vlgmr.msra.gmra.mxu1 %vm1554_vm14, %v1495_v39 }
 0x151   : > { %1116 = vrot.lane.b32.xlu1 %v2558_v57, %s2181_s30 }
 0x152   : > { %1110 = vrot.lane.b32.xlu0 %v2512_v49, %s2181_s30  ;;  %1184 = vrot.lane.b32.xlu2 %v2583_v48, %s2184_s8 }
 0x153   : > { %v1175_v19 = vpop.permute.xlu1 %1174 }
 0x154   : > { %v1143_v29 = vpop.permute.xlu0 %1142  ;;  %v1227_v36 = vpop.permute.xlu2 %1226 }
 0x155   : > { %v1404_v55 = vsel %vm1386_vm10, %v1371_v38, %v1143_v29 }
 0x156   : > { %v1437_v14 = vsel %vm1419_vm11, %v1404_v55, %v1175_v19 }
 0x157   : > { %v1470_v49 = vsel %vm1452_vm12, %v1437_v14, %v1207_v30 }
 0x159   : > { %1178 = vrot.lane.b32.xlu1 %v2519_v59, %s2184_s8 }
 0x15a   : > { %1152 = vrot.lane.b32.xlu0 %v2685_v0, %s2185_s9  ;;  %1242 = vrot.lane.b32.xlu2 %v2671_v60, %s2186_s10  ;;  %v2168_v0 = vld [vmem:[%s3393_s1] ss:$0 sm:$0xff] }
 0x15b   : > { %v1051_v57 = vpop.permute.xlu1 %1050  ;;  %v335_v30 = vmul.f32 %v2168_v0, %v2117_v18  ;;  %v336_v7 = vmul.f32 %v2168_v0, %v2118_v13 }
 0x15c   : > { %v1239_v47 = vpop.permute.xlu0 %1238  ;;  %v2981_v28 = vpop.permute.xlu2 %1070  ;;  %v1326_v39 = vsel %vm1320_vm8, %v2807_v15, %v1051_v57 }
 0x15d   : > { %v1503_v40 = vsel %vm1485_vm13, %v1470_v49, %v1239_v47  ;;  %v371_v5 = vadd.f32 %v2169_v1, %v335_v30  ;;  %v372_v12 = vadd.f32 %v2169_v1, %v336_v7 }
 0x15e   : > { %2039 = vmatmul.msk.bf16.vlgmr.msra.gmra.mxu2 %vm1554_vm14, %v1503_v40 }
 0x15f   : > { %v403_v33 = vmax.f32 %v371_v5, 0.0  ;;  %v404_v46 = vmax.f32 %v372_v12, 0.0 }
 0x161   : > { %1216 = vrot.lane.b32.xlu1 %v2600_v62, %s2183_s7  ;;  %v435_v37 = vpack.c.bf16 %v403_v33, %v403_v33  ;;  %v436_v10 = vpack.c.bf16 %v404_v46, %v404_v46  ;;  %v1346_v46 = vsel %vm1320_vm8, %v2870_v61, %v2981_v28 }
 0x162   : > { %1210 = vrot.lane.b32.xlu0 %v2536_v41, %s2183_s7  ;;  %1104 = vrot.lane.b32.xlu2 %v2440_v53, %s2181_s30 }
 0x163   : > { %v1101_v22 = vpop.permute.xlu1 %1100  ;;  %v499_v44 = vunpack.c.l.b16 %v435_v37  ;;  %v500_v31 = vunpack.c.l.b16 %v436_v10 }
 0x164   : > { %v1095_v58 = vpop.permute.xlu0 %1094  ;;  %v3000_v51 = vpop.permute.xlu2 %1144 }
 0x165   : > { %v1359_v19 = vsel %vm1353_vm9, %v1326_v39, %v1095_v58  ;;  %v516_v38 = vpack.c.b16 %v500_v31, %v499_v44 }
 0x167   : > { %v630_v14 = vshrl.u32 %v516_v38, 16 }
 0x169   : > { %1060 = vrot.lane.b32.xlu1 %v2413_v11, %s2182_s6  ;;  %v1392_v11 = vsel %vm1386_vm10, %v1359_v19, %v2945_v6 }
 0x16a   : > { %1248 = vrot.lane.b32.xlu0 %v3003_v9, %s2186_s10  ;;  %1204 = vrot.lane.b32.xlu2 %v2474_v26, %s2183_s7  ;;  %v1332_v26 = vsel %vm1320_vm8, %v2832_v63, %v2930_v16  ;;  %v632_v63 = vrot.slane %v630_v14, 7  ;;  %v633_v16 = vshll.u32 %v516_v38, 16 }
 0x16b   : > { %v1163_v53 = vpop.permute.xlu1 %1162  ;;  %v1365_v49 = vsel %vm1353_vm9, %v1332_v26, %v1101_v22 }
 0x16c   : > { %v1137_v50 = vpop.permute.xlu0 %1136  ;;  %v3014_v29 = vpop.permute.xlu2 %1182  ;;  %v1425_v15 = vsel %vm1419_vm11, %v1392_v11, %v1163_v53  ;;  %v635_v13 = vor.u32 %v633_v16, %v632_v63  ;;  %v706_v30 = vsel %vm2226_vm2, %v632_v63, 0 }
 0x16d   : > { %v1398_v6 = vsel %vm1386_vm10, %v1365_v49, %v1137_v50  ;;  %v1086_v5 = vshll.u32 %v706_v30, 16  ;;  %v1124_v53 = vrot.slane %v706_v30, 1 }
 0x171   : > { %1172 = vrot.lane.b32.xlu1 %v2463_v35, %s2184_s8 }
 0x172   : > { %1140 = vrot.lane.b32.xlu0 %v2655_v17, %s2185_s9  ;;  %1074 = vrot.lane.b32.xlu2 %v2583_v48, %s2182_s6  ;;  %v1431_v17 = vsel %vm1419_vm11, %v1398_v6, %v2959_v8 }
 0x173   : > { %v1201_v55 = vpop.permute.xlu1 %1200 }
 0x174   : > { %v1195_v35 = vpop.permute.xlu0 %1194  ;;  %v1241_v40 = vpop.permute.xlu2 %1240  ;;  %v1464_v21 = vsel %vm1452_vm12, %v1431_v17, %v1201_v55 }
 0x175   : > { %v1458_v57 = vsel %vm1452_vm12, %v1425_v15, %v1195_v35 }
 0x176   : > { %v1491_v47 = vsel %vm1485_vm13, %v1458_v57, %v1227_v36 }
 0x177   : > { %2033 = vmatmul.msk.bf16.gmra.mxu0 %vm1554_vm14, %v1491_v47 }
 0x179   : > { %1068 = vrot.lane.b32.xlu1 %v2519_v59, %s2182_s6  ;;  %v689_v59 = vsel %vm2226_vm2, 0, %v635_v13 }
 0x17a   : > { %1236 = vrot.lane.b32.xlu0 %v2652_v27, %s2186_s10  ;;  %1148 = vrot.lane.b32.xlu2 %v2671_v60, %s2185_s9  ;;  %v1081_v8 = vshll.u32 %v689_v59, 16  ;;  %v1079_v22 = vshrl.u32 %v689_v59, 16  ;;  %v1123_v10 = vrot.slane %v689_v59, 1 }
 0x17b   : > { %v1065_v18 = vpop.permute.xlu1 %1064 }
 0x17c   : > { %v1233_v36 = vpop.permute.xlu0 %1232  ;;  %v1059_v60 = vpop.permute.xlu2 %1058  ;;  %v1083_v1 = vrot.slane %v1081_v8, 1  ;;  %v1340_v2 = vsel %vm1320_vm8, %v2850_v34, %v1065_v18 }
 0x17d   : > { %v1497_v0 = vsel %vm1485_vm13, %v1464_v21, %v1233_v36  ;;  %v1334_v57 = vsel %vm1320_vm8, %v2824_v43, %v1059_v60 }
 0x17e   : > { %2036 = vmatmul.msk.bf16.gmra.mxu1 %vm1554_vm14, %v1497_v0  ;;  %v1084_v12 = vor.u32 %v1083_v1, %v1079_v22 }
 0x181   : > { %1118 = vrot.lane.b32.xlu1 %v2600_v62, %s2181_s30  ;;  %v1088_v62 = vrot.slane %v1086_v5, 1 }
 0x182   : > { %1112 = vrot.lane.b32.xlu0 %v2536_v41, %s2181_s30  ;;  %1186 = vrot.lane.b32.xlu2 %v689_v59, %s2184_s8 }
 0x183   : > { %v1115_v27 = vpop.permute.xlu1 %1114  ;;  %v1089_v58 = vsel %vm707_vm3, %v1084_v12, %v1088_v62 }
 0x184   : > { %v1109_v7 = vpop.permute.xlu0 %1108  ;;  %v1133_v52 = vpop.permute.xlu2 %1132  ;;  %v1379_v37 = vsel %vm1353_vm9, %v1346_v46, %v1115_v27 }
 0x185   : > { %v1373_v33 = vsel %vm1353_vm9, %v1340_v2, %v1109_v7 }
 0x189   : > { %1180 = vrot.lane.b32.xlu1 %v2555_v56, %s2184_s8  ;;  %v1406_v56 = vsel %vm1386_vm10, %v1373_v33, %v3000_v51 }
 0x18a   : > { %1154 = vrot.lane.b32.xlu0 %v3003_v9, %s2185_s9  ;;  %1244 = vrot.lane.b32.xlu2 %v2658_v23, %s2186_s10 }
 0x18b   : > { %v1177_v41 = vpop.permute.xlu1 %1176 }
 0x18c   : > { %v1151_v20 = vpop.permute.xlu0 %1150  ;;  %v1439_v23 = vsel %vm1419_vm11, %v1406_v56, %v1177_v41  ;;  %v1171_v61 = vpop.permute.xlu2 %1170 }
 0x18d   : > { %v1412_v51 = vsel %vm1386_vm10, %v1379_v37, %v1151_v20 }
 0x18e   : > { %v1445_v28 = vsel %vm1419_vm11, %v1412_v51, %v3014_v29 }
 0x191   : > { %1218 = vrot.lane.b32.xlu1 %v1089_v58, %s2183_s7 }
 0x192   : > { %1212 = vrot.lane.b32.xlu0 %v2567_v32, %s2183_s7  ;;  %1076 = vrot.lane.b32.xlu2 %v689_v59, %s2182_s6  ;;  %v1125_v32 = vsel %vm964_vm4, %v1123_v10, %v1124_v53  ;;  %s3100_s6 = scalar_lea.vmem %s3396_s4, %s2049_s20  ;;  %s2014_s20 = sshll.u32 %s3407_s19, 1 }
 0x193   : > { %v1215_v34 = vpop.permute.xlu1 %1214 }
 0x194   : > { %v1209_v44 = vpop.permute.xlu0 %1208  ;;  %v1478_v50 = vsel %vm1452_vm12, %v1445_v28, %v1215_v34 }
 0x195   : > { %v1472_v31 = vsel %vm1452_vm12, %v1439_v23, %v1209_v44 }
 0x196   : > { %v1505_v39 = vsel %vm1485_vm13, %v1472_v31, %v1241_v40 }
 0x197   : > { %2040 = vmatmul.msk.bf16.gmra.mxu2 %vm1554_vm14, %v1505_v39 }
 0x199   : > { %1043 = vrot.lane.b32.xlu1 %v3003_v9, %s2180_s29  ;;  %v1229_v9 = vpop.permute.xlu2 %1228 }
 0x19a   : > { %1250 = vrot.lane.b32.xlu0 %v1125_v32, %s2186_s10  ;;  %1188 = vrot.lane.b32.xlu2 %v2232_v3, %s2184_s8  ;;  %s235_s8 = scalar_lea.vmem %s3397_s5, %s2014_s20 }
 0x19b   : > { %v1053_v19 = vpop.permute.xlu1 %1052 }
 0x19c   : > { %v1247_v38 = vpop.permute.xlu0 %1246  ;;  %v1328_v3 = vsel %vm1320_vm8, %v2800_v45, %v1053_v19 }
 0x19d   : > { %v1511_v11 = vsel %vm1485_vm13, %v1478_v50, %v1247_v38 }
 0x19e   : > { %2043 = vmatmul.msk.bf16.vlgmr.msra.gmra.mxu3 %vm1554_vm14, %v1511_v11  ;;  %v3403_v11 = vld [vmem:[#allocation4_spill] sm:$0xff] }
 0x1a1   : > { %1156 = vrot.lane.b32.xlu1 %v1125_v32, %s2185_s9  ;;  %v3104_v55 = vpop.permute.xlu2 %1072 }
 0x1a2   : > { %1120 = vrot.lane.b32.xlu0 %v1089_v58, %s2181_s30 }
 0x1a3   : > { %v1103_v29 = vpop.permute.xlu1 %1102 }
 0x1a4   : > { %v1097_v26 = vpop.permute.xlu0 %1096  ;;  %v1367_v63 = vsel %vm1353_vm9, %v1334_v57, %v1103_v29 }
 0x1a5   : > { %v1361_v35 = vsel %vm1353_vm9, %v1328_v3, %v1097_v26 }
 0x1a9   : > { %1252 = vrot.lane.b32.xlu1 %v2592_v4, %s2186_s10  ;;  %v1147_v36 = vpop.permute.xlu2 %1146 }
 0x1aa   : > { %1220 = vrot.lane.b32.xlu0 %v2266_v24, %s2183_s7  ;;  %v1394_v24 = vsel %vm1386_vm10, %v1361_v35, %v1133_v52 }
 0x1ab   : > { %v1165_v15 = vpop.permute.xlu1 %1164  ;;  %v1600_v14 = vpop.f32.mrf.mxu0 }
 0x1ac   : > { %v1854_v49 = vpack.c.bf16 %v1600_v14, %v1600_v14  ;;  %v1139_v4 = vpop.permute.xlu0 %1138  ;;  %v1749_v6 = vmul.f32 %v1600_v14, %v1600_v14  ;;  %v1427_v47 = vsel %vm1419_vm11, %v1394_v24, %v1165_v15  ;;  %v1680_v17 = vsel %vm1254_vm6, %v1600_v14, 0.0 }
 0x1ad   : > { %v1400_v8 = vsel %vm1386_vm10, %v1367_v63, %v1139_v4 }
 0x1ae   : > { %1887 = vst.msk [vmem:[%s3100_s6] sm:$0xf] %vm1886_vm15, %v1854_v49  ;;  %v1781_v43 = vsel %vm1254_vm6, %v1749_v6, 0.0  ;;  %v1433_v7 = vsel %vm1419_vm11, %v1400_v8, %v1171_v61 }
 0x1b1   : > { %v1185_v62 = vpop.permute.xlu2 %1184 }
 0x1b3   : > { %v1203_v45 = vpop.permute.xlu1 %1202  ;;  %v1602_v16 = vpop.f32.mrf.mxu0 }
 0x1b4   : > { %v1681_v40 = vsel %vm1254_vm6, %v1602_v16, 0.0  ;;  %v1750_v21 = vmul.f32 %v1602_v16, %v1602_v16  ;;  %v1855_v18 = vpack.c.bf16 %v1602_v16, %v1602_v16  ;;  %v1197_v13 = vpop.permute.xlu0 %1196  ;;  %v1466_v22 = vsel %vm1452_vm12, %v1433_v7, %v1203_v45 }
 0x1b5   : > { %v1682_v0 = vadd.f32 %v1681_v40, %v1680_v17  ;;  %v1460_v59 = vsel %vm1452_vm12, %v1427_v47, %v1197_v13  ;;  %v3404_v17 = vld [vmem:[#allocation2_spill] sm:$0xff] }
 0x1b6   : > { %v1782_v27 = vsel %vm1254_vm6, %v1750_v21, 0.0  ;;  %1888 = vst.msk [vmem:[%s3100_s6 + $0x4] sm:$0xf] %vm1886_vm15, %v1855_v18  ;;  %v1493_v30 = vsel %vm1485_vm13, %v1460_v59, %v1229_v9  ;;  %v1348_v9 = vsel %vm1320_vm8, %v3403_v11, %v3104_v55 }
 0x1b7   : > { %v1783_v60 = vadd.f32 %v1782_v27, %v1781_v43  ;;  %2034 = vmatmul.msk.bf16.gmra.mxu0 %vm1554_vm14, %v1493_v30 }
 0x1b9   : > { %v1243_v34 = vpop.permute.xlu2 %1242 }
 0x1bb   : > { %v1067_v1 = vpop.permute.xlu1 %1066 }
 0x1bc   : > { %v1235_v5 = vpop.permute.xlu0 %1234  ;;  %v1342_v10 = vsel %vm1320_vm8, %v2771_v25, %v1067_v1 }
 0x1bd   : > { %v1499_v12 = vsel %vm1485_vm13, %v1466_v22, %v1235_v5 }
 0x1be   : > { %2037 = vmatmul.msk.bf16.gmra.mxu1 %vm1554_vm14, %v1499_v12 }
 0x1c1   : > { %v1105_v3 = vpop.permute.xlu2 %1104 }
 0x1c3   : > { %v1117_v41 = vpop.permute.xlu1 %1116 }
 0x1c4   : > { %v1605_v2 = vpop.f32.mrf.mxu0  ;;  %v1111_v20 = vpop.permute.xlu0 %1110  ;;  %v1381_v15 = vsel %vm1353_vm9, %v1348_v9, %v1117_v41 }
 0x1c5   : > { %v1683_v52 = vsel %vm1254_vm6, %v1605_v2, 0.0  ;;  %v1751_v58 = vmul.f32 %v1605_v2, %v1605_v2  ;;  %v1856_v33 = vpack.c.bf16 %v1605_v2, %v1605_v2  ;;  %v1375_v28 = vsel %vm1353_vm9, %v1342_v10, %v1111_v20 }
 0x1c6   : > { %v1684_v56 = vadd.f32 %v1683_v52, %v1682_v0  ;;  %v1408_v38 = vsel %vm1386_vm10, %v1375_v28, %v1147_v36 }
 0x1c7   : > { %v1784_v46 = vsel %vm1254_vm6, %v1751_v58, 0.0  ;;  %1889 = vst.msk [vmem:[%s3100_s6 + $0x8] sm:$0xf] %vm1886_vm15, %v1856_v33 }
 0x1c8   : > { %v1785_v23 = vadd.f32 %v1784_v46, %v1783_v60 }
 0x1c9   : > { %v1205_v63 = vpop.permute.xlu2 %1204 }
 0x1cb   : > { %v1179_v37 = vpop.permute.xlu1 %1178  ;;  %v3134_v53 = vpop.f32.mrf.mxu1 }
 0x1cc   : > { %v1862_v44 = vpack.c.bf16 %v3134_v53, %v3134_v53  ;;  %v1607_v31 = vpop.f32.mrf.mxu0  ;;  %v1153_v51 = vpop.permute.xlu0 %1152  ;;  %v1441_v29 = vsel %vm1419_vm11, %v1408_v38, %v1179_v37 }
 0x1cd   : > { %v1685_v39 = vsel %vm1254_vm6, %v1607_v31, 0.0  ;;  %v1752_v32 = vmul.f32 %v1607_v31, %v1607_v31  ;;  %v1857_v61 = vpack.c.bf16 %v1607_v31, %v1607_v31  ;;  %v1414_v24 = vsel %vm1386_vm10, %v1381_v15, %v1153_v51 }
 0x1ce   : > { %1895 = vst.msk [vmem:[%s3100_s6 + $0x20] sm:$0xf] %vm1886_vm15, %v1862_v44  ;;  %v1686_v50 = vadd.f32 %v1685_v39, %v1684_v56  ;;  %v1447_v57 = vsel %vm1419_vm11, %v1414_v24, %v1185_v62 }
 0x1cf   : > { %v1786_v19 = vsel %vm1254_vm6, %v1752_v32, 0.0  ;;  %1890 = vst.msk [vmem:[%s3100_s6 + $0xc] sm:$0xf] %vm1886_vm15, %v1857_v61 }
 0x1d0   : > { %v1787_v25 = vadd.f32 %v1786_v19, %v1785_v23 }
 0x1d1   : > { %v1075_v43 = vpop.permute.xlu2 %1074 }
 0x1d3   : > { %v1217_v26 = vpop.permute.xlu1 %1216  ;;  %v3151_v14 = vpop.f32.mrf.mxu1 }
 0x1d4   : > { %v1863_v49 = vpack.c.bf16 %v3151_v14, %v3151_v14  ;;  %v1211_v4 = vpop.permute.xlu0 %1210  ;;  %v1480_v6 = vsel %vm1452_vm12, %v1447_v57, %v1217_v26 }
 0x1d5   : > { %v1474_v35 = vsel %vm1452_vm12, %v1441_v29, %v1211_v4 }
 0x1d6   : > { %1896 = vst.msk [vmem:[%s3100_s6 + $0x24] sm:$0xf] %vm1886_vm15, %v1863_v49  ;;  %v1507_v55 = vsel %vm1485_vm13, %v1474_v35, %v1243_v34 }
 0x1d7   : > { %2041 = vmatmul.msk.bf16.gmra.mxu2 %vm1554_vm14, %v1507_v55 }
 0x1d9   : > { %v1149_v5 = vpop.permute.xlu2 %1148 }
 0x1db   : > { %v1061_v47 = vpop.permute.xlu1 %1060 }
 0x1dc   : > { %v1249_v45 = vpop.permute.xlu0 %1248  ;;  %v1336_v40 = vsel %vm1320_vm8, %v3404_v17, %v1061_v47 }
 0x1dd   : > { %v1513_v16 = vsel %vm1485_vm13, %v1480_v6, %v1249_v45  ;;  %v1369_v36 = vsel %vm1353_vm9, %v1336_v40, %v1105_v3  ;;  %v3405_v45 = vld [vmem:[#allocation3_spill] sm:$0xff] }
 0x1de   : > { %2044 = vmatmul.msk.bf16.gmra.mxu3 %vm1554_vm14, %v1513_v16 }
 0x1e1   : > { %v3167_v21 = vpop.f32.mrf.mxu2  ;;  %v1187_v46 = vpop.permute.xlu2 %1186 }
 0x1e2   : > { %v1870_v18 = vpack.c.bf16 %v3167_v21, %v3167_v21 }
 0x1e3   : > { %v1173_v13 = vpop.permute.xlu1 %1172 }
 0x1e4   : > { %1903 = vst.msk [vmem:[%s3100_s6 + $0x40] sm:$0xf] %vm1886_vm15, %v1870_v18  ;;  %v1141_v0 = vpop.permute.xlu0 %1140 }
 0x1e5   : > { %v1402_v59 = vsel %vm1386_vm10, %v1369_v36, %v1141_v0 }
 0x1e6   : > { %v1435_v8 = vsel %vm1419_vm11, %v1402_v59, %v1173_v13 }
 0x1e7   : > { %v1468_v60 = vsel %vm1452_vm12, %v1435_v8, %v1205_v63  ;;  %v1286_v63 = vsel %vm1254_vm6, %v2583_v48, %v3405_v45 }
 0x1e9   : > { %v3176_v27 = vpop.f32.mrf.mxu2  ;;  %v1245_v26 = vpop.permute.xlu2 %1244 }
 0x1ea   : > { %v1871_v30 = vpack.c.bf16 %v3176_v27, %v3176_v27 }
 0x1eb   : > { %v1069_v7 = vpop.permute.xlu1 %1068 }
 0x1ec   : > { %1904 = vst.msk [vmem:[%s3100_s6 + $0x44] sm:$0xf] %vm1886_vm15, %v1871_v30  ;;  %v1237_v22 = vpop.permute.xlu0 %1236  ;;  %v1344_v34 = vsel %vm1320_vm8, %v2876_v54, %v1069_v7 }
 0x1ed   : > { %v1501_v1 = vsel %vm1485_vm13, %v1468_v60, %v1237_v22 }
 0x1ee   : > { %2038 = vmatmul.msk.bf16.gmra.mxu1 %vm1554_vm14, %v1501_v1 }
 0x1f1   : > { %v1077_v47 = vpop.permute.xlu2 %1076 }
 0x1f3   : > { %v1119_v12 = vpop.permute.xlu1 %1118 }
 0x1f4   : > { %v1610_v62 = vpop.f32.mrf.mxu0  ;;  %v1113_v41 = vpop.permute.xlu0 %1112 }
 0x1f5   : > { %v1687_v2 = vsel %vm1254_vm6, %v1610_v62, 0.0  ;;  %v1753_v20 = vmul.f32 %v1610_v62, %v1610_v62  ;;  %v1858_v52 = vpack.c.bf16 %v1610_v62, %v1610_v62  ;;  %v1377_v61 = vsel %vm1353_vm9, %v1344_v34, %v1113_v41 }
 0x1f6   : > { %v1688_v58 = vadd.f32 %v1687_v2, %v1686_v50  ;;  %v1410_v19 = vsel %vm1386_vm10, %v1377_v61, %v1149_v5  ;;  %v1695_v61 = vsel %vm1254_vm6, %v3134_v53, 0.0 }
 0x1f7   : > { %v1788_v33 = vsel %vm1254_vm6, %v1753_v20, 0.0  ;;  %1891 = vst.msk [vmem:[%s3100_s6 + $0x10] sm:$0xf] %vm1886_vm15, %v1858_v52 }
 0x1f8   : > { %v1789_v56 = vadd.f32 %v1788_v33, %v1787_v25  ;;  %v1350_v25 = vsel %vm1320_vm8, %v2888_v42, %v1075_v43 }
 0x1f9   : > { %v1383_v9 = vsel %vm1353_vm9, %v1350_v25, %v1119_v12  ;;  %v1189_v0 = vpop.permute.xlu2 %1188 }
 0x1fb   : > { %v1181_v23 = vpop.permute.xlu1 %1180  ;;  %v3191_v37 = vpop.f32.mrf.mxu1 }
 0x1fc   : > { %v1864_v10 = vpack.c.bf16 %v3191_v37, %v3191_v37  ;;  %v1612_v44 = vpop.f32.mrf.mxu0  ;;  %v1155_v31 = vpop.permute.xlu0 %1154  ;;  %v1443_v38 = vsel %vm1419_vm11, %v1410_v19, %v1181_v23 }
 0x1fd   : > { %v1689_v51 = vsel %vm1254_vm6, %v1612_v44, 0.0  ;;  %v1754_v39 = vmul.f32 %v1612_v44, %v1612_v44  ;;  %v1859_v32 = vpack.c.bf16 %v1612_v44, %v1612_v44  ;;  %v1416_v4 = vsel %vm1386_vm10, %v1383_v9, %v1155_v31 }
 0x1fe   : > { %1897 = vst.msk [vmem:[%s3100_s6 + $0x28] sm:$0xf] %vm1886_vm15, %v1864_v10  ;;  %v1690_v28 = vadd.f32 %v1689_v51, %v1688_v58  ;;  %v1449_v35 = vsel %vm1419_vm11, %v1416_v4, %v1187_v46  ;;  %v1757_v44 = vmul.f32 %v3134_v53, %v3134_v53 }
 0x1ff   : > { %v1790_v50 = vsel %vm1254_vm6, %v1754_v39, 0.0  ;;  %1892 = vst.msk [vmem:[%s3100_s6 + $0x14] sm:$0xf] %vm1886_vm15, %v1859_v32 }
 0x200   : > { %v1791_v54 = vadd.f32 %v1790_v50, %v1789_v56  ;;  %v1796_v25 = vsel %vm1254_vm6, %v1757_v44, 0.0 }
 0x203   : > { %v1219_v11 = vpop.permute.xlu1 %1218  ;;  %v3207_v29 = vpop.f32.mrf.mxu1 }
 0x204   : > { %v1865_v15 = vpack.c.bf16 %v3207_v29, %v3207_v29  ;;  %v1213_v3 = vpop.permute.xlu0 %1212  ;;  %v1482_v24 = vsel %vm1452_vm12, %v1449_v35, %v1219_v11  ;;  %v1759_v11 = vmul.f32 %v3191_v37, %v3191_v37 }
 0x205   : > { %v1476_v49 = vsel %vm1452_vm12, %v1443_v38, %v1213_v3  ;;  %v1697_v38 = vsel %vm1254_vm6, %v3151_v14, 0.0  ;;  %v1760_v3 = vmul.f32 %v3207_v29, %v3207_v29 }
 0x206   : > { %1898 = vst.msk [vmem:[%s3100_s6 + $0x2c] sm:$0xf] %vm1886_vm15, %v1865_v15  ;;  %v1509_v42 = vsel %vm1485_vm13, %v1476_v49, %v1245_v26  ;;  %v1699_v15 = vsel %vm1254_vm6, %v3191_v37, 0.0  ;;  %v1800_v35 = vsel %vm1254_vm6, %v1759_v11, 0.0 }
 0x207   : > { %2042 = vmatmul.msk.bf16.gmra.mxu2 %vm1554_vm14, %v1509_v42 }
 0x20b   : > { %v1044_v55 = vpop.permute.xlu1 %1043 }
 0x20c   : > { %v1251_v57 = vpop.permute.xlu0 %1250  ;;  %v1319_v16 = vsel %vm1287_vm5, %v1286_v63, %v1044_v55 }
 0x20d   : > { %v1515_v6 = vsel %vm1485_vm13, %v1482_v24, %v1251_v57  ;;  %v1352_v40 = vsel %vm1320_vm8, %v1319_v16, %v1077_v47  ;;  %v1802_v47 = vsel %vm1254_vm6, %v1760_v3, 0.0 }
 0x20e   : > { %2045 = vmatmul.msk.bf16.gmra.mxu3 %vm1554_vm14, %v1515_v6 }
 0x213   : > { %v1157_v17 = vpop.permute.xlu1 %1156 }
 0x214   : > { %v1121_v18 = vpop.permute.xlu0 %1120 }
 0x215   : > { %v1385_v13 = vsel %vm1353_vm9, %v1352_v40, %v1121_v18 }
 0x216   : > { %v1418_v36 = vsel %vm1386_vm10, %v1385_v13, %v1157_v17 }
 0x217   : > { %v1451_v43 = vsel %vm1419_vm11, %v1418_v36, %v1189_v0 }
 0x21a   : > { %v3228_v59 = vpop.f32.mrf.mxu2 }
 0x21b   : > { %v1872_v48 = vpack.c.bf16 %v3228_v59, %v3228_v59  ;;  %v1253_v8 = vpop.permute.xlu1 %1252 }
 0x21c   : > { %v1221_v30 = vpop.permute.xlu0 %1220 }
 0x21d   : > { %1905 = vst.msk [vmem:[%s3100_s6 + $0x48] sm:$0xf] %vm1886_vm15, %v1872_v48  ;;  %v1484_v60 = vsel %vm1452_vm12, %v1451_v43, %v1221_v30 }
 0x21e   : > { %v1517_v7 = vsel %vm1485_vm13, %v1484_v60, %v1253_v8 }
 0x21f   : > { %2046 = vmatmul.msk.bf16.gmra.mxu3 %vm1554_vm14, %v1517_v7 }
 0x221   : > { %v3238_v22 = vpop.f32.mrf.mxu3 }
 0x222   : > { %v1878_v1 = vpack.c.bf16 %v3238_v22, %v3238_v22  ;;  %v3242_v5 = vpop.f32.mrf.mxu2 }
 0x223   : > { %v1873_v12 = vpack.c.bf16 %v3242_v5, %v3242_v5  ;;  %v1768_v11 = vmul.f32 %v3242_v5, %v3242_v5 }
 0x224   : > { %1911 = vst.msk [vmem:[%s3100_s6 + $0x60] sm:$0xf] %vm1886_vm15, %v1878_v1 }
 0x225   : > { %1906 = vst.msk [vmem:[%s3100_s6 + $0x4c] sm:$0xf] %vm1886_vm15, %v1873_v12 }
 0x229   : > { %v3250_v62 = vpop.f32.mrf.mxu3 }
 0x22a   : > { %v1879_v41 = vpack.c.bf16 %v3250_v62, %v3250_v62 }
 0x22c   : > { %1912 = vst.msk [vmem:[%s3100_s6 + $0x64] sm:$0xf] %vm1886_vm15, %v1879_v41 }
 0x234   : > { %v1615_v2 = vpop.f32.mrf.mxu0 }
 0x235   : > { %v1691_v20 = vsel %vm1254_vm6, %v1615_v2, 0.0  ;;  %v1755_v52 = vmul.f32 %v1615_v2, %v1615_v2  ;;  %v1860_v58 = vpack.c.bf16 %v1615_v2, %v1615_v2 }
 0x236   : > { %v1692_v33 = vadd.f32 %v1691_v20, %v1690_v28  ;;  %v1758_v28 = vmul.f32 %v3151_v14, %v3151_v14  ;;  %v1701_v14 = vsel %vm1254_vm6, %v3207_v29, 0.0 }
 0x237   : > { %v1792_v56 = vsel %vm1254_vm6, %v1755_v52, 0.0  ;;  %1893 = vst.msk [vmem:[%s3100_s6 + $0x18] sm:$0xf] %vm1886_vm15, %v1860_v58 }
 0x238   : > { %v1793_v46 = vadd.f32 %v1792_v56, %v1791_v54  ;;  %v1798_v53 = vsel %vm1254_vm6, %v1758_v28, 0.0  ;;  %v1765_v56 = vmul.f32 %v3167_v21, %v3167_v21 }
 0x23a   : > { %v1812_v28 = vsel %vm1254_vm6, %v1765_v56, 0.0 }
 0x23b   : > { %v1630_v23 = vpop.f32.mrf.mxu1 }
 0x23c   : > { %v1866_v34 = vpack.c.bf16 %v1630_v23, %v1630_v23  ;;  %v1617_v10 = vpop.f32.mrf.mxu0  ;;  %v1761_v24 = vmul.f32 %v1630_v23, %v1630_v23  ;;  %v1703_v37 = vsel %vm1254_vm6, %v1630_v23, 0.0 }
 0x23d   : > { %v1693_v31 = vsel %vm1254_vm6, %v1617_v10, 0.0  ;;  %v1756_v51 = vmul.f32 %v1617_v10, %v1617_v10  ;;  %v1861_v39 = vpack.c.bf16 %v1617_v10, %v1617_v10 }
 0x23e   : > { %1899 = vst.msk [vmem:[%s3100_s6 + $0x30] sm:$0xf] %vm1886_vm15, %v1866_v34  ;;  %v1694_v32 = vadd.f32 %v1693_v31, %v1692_v33  ;;  %v1804_v17 = vsel %vm1254_vm6, %v1761_v24, 0.0  ;;  %v1711_v31 = vsel %vm1254_vm6, %v3167_v21, 0.0 }
 0x23f   : > { %v1794_v50 = vsel %vm1254_vm6, %v1756_v51, 0.0  ;;  %1894 = vst.msk [vmem:[%s3100_s6 + $0x1c] sm:$0xf] %vm1886_vm15, %v1861_v39  ;;  %v1766_v51 = vmul.f32 %v3176_v27, %v3176_v27 }
 0x240   : > { %v1696_v54 = vadd.f32 %v1695_v61, %v1694_v32  ;;  %v1795_v19 = vadd.f32 %v1794_v50, %v1793_v46  ;;  %v1713_v50 = vsel %vm1254_vm6, %v3176_v27, 0.0  ;;  %v1717_v27 = vsel %vm1254_vm6, %v3242_v5, 0.0 }
 0x241   : > { %v1814_v21 = vsel %vm1254_vm6, %v1766_v51, 0.0 }
 0x242   : > { %v1698_v9 = vadd.f32 %v1697_v38, %v1696_v54  ;;  %v1797_v26 = vadd.f32 %v1796_v25, %v1795_v19  ;;  %v1767_v54 = vmul.f32 %v3228_v59, %v3228_v59  ;;  %v1715_v38 = vsel %vm1254_vm6, %v3228_v59, 0.0 }
 0x243   : > { %v1632_v49 = vpop.f32.mrf.mxu1 }
 0x244   : > { %v1700_v4 = vadd.f32 %v1699_v15, %v1698_v9  ;;  %v1799_v42 = vadd.f32 %v1798_v53, %v1797_v26  ;;  %v1867_v55 = vpack.c.bf16 %v1632_v49, %v1632_v49  ;;  %v1762_v45 = vmul.f32 %v1632_v49, %v1632_v49 }
 0x245   : > { %v1705_v29 = vsel %vm1254_vm6, %v1632_v49, 0.0  ;;  %v1816_v53 = vsel %vm1254_vm6, %v1767_v54, 0.0  ;;  %v1818_v49 = vsel %vm1254_vm6, %v1768_v11, 0.0 }
 0x246   : > { %v1801_v57 = vadd.f32 %v1800_v35, %v1799_v42  ;;  %v1702_v6 = vadd.f32 %v1701_v14, %v1700_v4  ;;  %1900 = vst.msk [vmem:[%s3100_s6 + $0x34] sm:$0xf] %vm1886_vm15, %v1867_v55  ;;  %v1806_v13 = vsel %vm1254_vm6, %v1762_v45, 0.0 }
 0x248   : > { %v1704_v63 = vadd.f32 %v1703_v37, %v1702_v6  ;;  %v1803_v16 = vadd.f32 %v1802_v47, %v1801_v57 }
 0x24a   : > { %v1706_v40 = vadd.f32 %v1705_v29, %v1704_v63  ;;  %v1805_v18 = vadd.f32 %v1804_v17, %v1803_v16 }
 0x24c   : > { %v1807_v36 = vadd.f32 %v1806_v13, %v1805_v18 }
 0x25a   : > { %v1650_v0 = vpop.f32.mrf.mxu2 }
 0x25b   : > { %v1874_v43 = vpack.c.bf16 %v1650_v0, %v1650_v0  ;;  %v1769_v42 = vmul.f32 %v1650_v0, %v1650_v0  ;;  %v1719_v59 = vsel %vm1254_vm6, %v1650_v0, 0.0 }
 0x25d   : > { %1907 = vst.msk [vmem:[%s3100_s6 + $0x50] sm:$0xf] %vm1886_vm15, %v1874_v43  ;;  %v1820_v55 = vsel %vm1254_vm6, %v1769_v42, 0.0 }
 0x261   : > { %v3294_v48 = vpop.f32.mrf.mxu3 }
 0x262   : > { %v1880_v8 = vpack.c.bf16 %v3294_v48, %v3294_v48  ;;  %v1652_v30 = vpop.f32.mrf.mxu2 }
 0x263   : > { %v1875_v60 = vpack.c.bf16 %v1652_v30, %v1652_v30  ;;  %v1770_v57 = vmul.f32 %v1652_v30, %v1652_v30  ;;  %v1721_v5 = vsel %vm1254_vm6, %v1652_v30, 0.0 }
 0x264   : > { %1913 = vst.msk [vmem:[%s3100_s6 + $0x68] sm:$0xf] %vm1886_vm15, %v1880_v8 }
 0x265   : > { %1908 = vst.msk [vmem:[%s3100_s6 + $0x54] sm:$0xf] %vm1886_vm15, %v1875_v60  ;;  %v1822_v63 = vsel %vm1254_vm6, %v1770_v57, 0.0 }
 0x269   : > { %v3302_v7 = vpop.f32.mrf.mxu3 }
 0x26a   : > { %v1881_v1 = vpack.c.bf16 %v3302_v7, %v3302_v7 }
 0x26b   : > { %v1635_v12 = vpop.f32.mrf.mxu1 }
 0x26c   : > { %1914 = vst.msk [vmem:[%s3100_s6 + $0x6c] sm:$0xf] %vm1886_vm15, %v1881_v1  ;;  %v1868_v41 = vpack.c.bf16 %v1635_v12, %v1635_v12  ;;  %v1763_v2 = vmul.f32 %v1635_v12, %v1635_v12  ;;  %v1707_v20 = vsel %vm1254_vm6, %v1635_v12, 0.0  ;;  %v1727_v1 = vsel %vm1254_vm6, %v3238_v22, 0.0 }
 0x26d   : > { %v1708_v58 = vadd.f32 %v1707_v20, %v1706_v40  ;;  %v1774_v12 = vmul.f32 %v3250_v62, %v3250_v62 }
 0x26e   : > { %1901 = vst.msk [vmem:[%s3100_s6 + $0x38] sm:$0xf] %vm1886_vm15, %v1868_v41  ;;  %v1808_v52 = vsel %vm1254_vm6, %v1763_v2, 0.0 }
 0x26f   : > { %v1809_v10 = vadd.f32 %v1808_v52, %v1807_v36  ;;  %v1773_v36 = vmul.f32 %v3238_v22, %v3238_v22  ;;  %v1731_v22 = vsel %vm1254_vm6, %v3294_v48, 0.0 }
 0x271   : > { %v1828_v52 = vsel %vm1254_vm6, %v1773_v36, 0.0 }
 0x273   : > { %v1637_v33 = vpop.f32.mrf.mxu1 }
 0x274   : > { %v1709_v46 = vsel %vm1254_vm6, %v1637_v33, 0.0  ;;  %v1764_v23 = vmul.f32 %v1637_v33, %v1637_v33  ;;  %v1869_v34 = vpack.c.bf16 %v1637_v33, %v1637_v33 }
 0x275   : > { %v1710_v44 = vadd.f32 %v1709_v46, %v1708_v58  ;;  %v1729_v58 = vsel %vm1254_vm6, %v3250_v62, 0.0  ;;  %v1830_v46 = vsel %vm1254_vm6, %v1774_v12, 0.0  ;;  %v1776_v62 = vmul.f32 %v3302_v7, %v3302_v7 }
 0x276   : > { %v1810_v39 = vsel %vm1254_vm6, %v1764_v23, 0.0  ;;  %1902 = vst.msk [vmem:[%s3100_s6 + $0x3c] sm:$0xf] %vm1886_vm15, %v1869_v34  ;;  %v1775_v23 = vmul.f32 %v3294_v48, %v3294_v48 }
 0x277   : > { %v1712_v32 = vadd.f32 %v1711_v31, %v1710_v44  ;;  %v1811_v61 = vadd.f32 %v1810_v39, %v1809_v10 }
 0x278   : > { %v1832_v51 = vsel %vm1254_vm6, %v1775_v23, 0.0 }
 0x279   : > { %v1714_v19 = vadd.f32 %v1713_v50, %v1712_v32  ;;  %v1813_v25 = vadd.f32 %v1812_v28, %v1811_v61  ;;  %v1733_v32 = vsel %vm1254_vm6, %v3302_v7, 0.0  ;;  %v1834_v28 = vsel %vm1254_vm6, %v1776_v62, 0.0 }
 0x27b   : > { %v1716_v9 = vadd.f32 %v1715_v38, %v1714_v19  ;;  %v1815_v26 = vadd.f32 %v1814_v21, %v1813_v25 }
 0x27d   : > { %v1817_v15 = vadd.f32 %v1816_v53, %v1815_v26  ;;  %v1718_v3 = vadd.f32 %v1717_v27, %v1716_v9 }
 0x27f   : > { %v1819_v4 = vadd.f32 %v1818_v49, %v1817_v15  ;;  %v1720_v24 = vadd.f32 %v1719_v59, %v1718_v3 }
 0x281   : > { %v1821_v47 = vadd.f32 %v1820_v55, %v1819_v4  ;;  %v1722_v45 = vadd.f32 %v1721_v5, %v1720_v24 }
 0x283   : > { %v1823_v40 = vadd.f32 %v1822_v63, %v1821_v47 }
 0x28a   : > { %v1655_v35 = vpop.f32.mrf.mxu2 }
 0x28b   : > { %v1876_v14 = vpack.c.bf16 %v1655_v35, %v1655_v35  ;;  %v1771_v6 = vmul.f32 %v1655_v35, %v1655_v35  ;;  %v1723_v37 = vsel %vm1254_vm6, %v1655_v35, 0.0 }
 0x28c   : > { %v1724_v29 = vadd.f32 %v1723_v37, %v1722_v45 }
 0x28d   : > { %1909 = vst.msk [vmem:[%s3100_s6 + $0x58] sm:$0xf] %vm1886_vm15, %v1876_v14  ;;  %v1824_v16 = vsel %vm1254_vm6, %v1771_v6, 0.0 }
 0x28e   : > { %v1825_v30 = vadd.f32 %v1824_v16, %v1823_v40 }
 0x291   : > { %v1670_v17 = vpop.f32.mrf.mxu3 }
 0x292   : > { %v1882_v18 = vpack.c.bf16 %v1670_v17, %v1670_v17  ;;  %v1657_v13 = vpop.f32.mrf.mxu2  ;;  %v1777_v48 = vmul.f32 %v1670_v17, %v1670_v17  ;;  %v1735_v19 = vsel %vm1254_vm6, %v1670_v17, 0.0 }
 0x293   : > { %v1725_v0 = vsel %vm1254_vm6, %v1657_v13, 0.0  ;;  %v1772_v43 = vmul.f32 %v1657_v13, %v1657_v13  ;;  %v1877_v8 = vpack.c.bf16 %v1657_v13, %v1657_v13 }
 0x294   : > { %1915 = vst.msk [vmem:[%s3100_s6 + $0x70] sm:$0xf] %vm1886_vm15, %v1882_v18  ;;  %v1726_v60 = vadd.f32 %v1725_v0, %v1724_v29  ;;  %v1836_v38 = vsel %vm1254_vm6, %v1777_v48, 0.0 }
 0x295   : > { %v1826_v41 = vsel %vm1254_vm6, %v1772_v43, 0.0  ;;  %1910 = vst.msk [vmem:[%s3100_s6 + $0x5c] sm:$0xf] %vm1886_vm15, %v1877_v8 }
 0x296   : > { %v1728_v2 = vadd.f32 %v1727_v1, %v1726_v60  ;;  %v1827_v20 = vadd.f32 %v1826_v41, %v1825_v30 }
 0x298   : > { %v1730_v33 = vadd.f32 %v1729_v58, %v1728_v2  ;;  %v1829_v56 = vadd.f32 %v1828_v52, %v1827_v20 }
 0x299   : > { %v1672_v34 = vpop.f32.mrf.mxu3 }
 0x29a   : > { %v1732_v10 = vadd.f32 %v1731_v22, %v1730_v33  ;;  %v1831_v44 = vadd.f32 %v1830_v46, %v1829_v56  ;;  %v1883_v31 = vpack.c.bf16 %v1672_v34, %v1672_v34  ;;  %v1778_v11 = vmul.f32 %v1672_v34, %v1672_v34 }
 0x29b   : > { %v1737_v7 = vsel %vm1254_vm6, %v1672_v34, 0.0 }
 0x29c   : > { %1916 = vst.msk [vmem:[%s3100_s6 + $0x74] sm:$0xf] %vm1886_vm15, %v1883_v31  ;;  %v1833_v39 = vadd.f32 %v1832_v51, %v1831_v44  ;;  %v1734_v61 = vadd.f32 %v1733_v32, %v1732_v10  ;;  %v1838_v15 = vsel %vm1254_vm6, %v1778_v11, 0.0 }
 0x29e   : > { %v1835_v50 = vadd.f32 %v1834_v28, %v1833_v39  ;;  %v1736_v21 = vadd.f32 %v1735_v19, %v1734_v61 }
 0x2a0   : > { %v1837_v26 = vadd.f32 %v1836_v38, %v1835_v50  ;;  %v1738_v27 = vadd.f32 %v1737_v7, %v1736_v21 }
 0x2a2   : > { %v1675_v54 = vpop.f32.mrf.mxu3  ;;  %v1839_v49 = vadd.f32 %v1838_v15, %v1837_v26 }
 0x2a3   : > { %v1884_v25 = vpack.c.bf16 %v1675_v54, %v1675_v54  ;;  %v1779_v9 = vmul.f32 %v1675_v54, %v1675_v54  ;;  %v1739_v53 = vsel %vm1254_vm6, %v1675_v54, 0.0 }
 0x2a4   : > { %v1740_v4 = vadd.f32 %v1739_v53, %v1738_v27 }
 0x2a5   : > { %1917 = vst.msk [vmem:[%s3100_s6 + $0x78] sm:$0xf] %vm1886_vm15, %v1884_v25  ;;  %v1840_v3 = vsel %vm1254_vm6, %v1779_v9, 0.0 }
 0x2a6   : > { %v1841_v24 = vadd.f32 %v1840_v3, %v1839_v49 }
 0x2aa   : > { %v1677_v42 = vpop.f32.mrf.mxu3 }
 0x2ab   : > { %v1741_v35 = vsel %vm1254_vm6, %v1677_v42, 0.0  ;;  %v1780_v59 = vmul.f32 %v1677_v42, %v1677_v42  ;;  %v1885_v14 = vpack.c.bf16 %v1677_v42, %v1677_v42 }
 0x2ac   : > { %v1742_v55 = vadd.f32 %v1741_v35, %v1740_v4 }
 0x2ad   : > { %v1842_v57 = vsel %vm1254_vm6, %v1780_v59, 0.0  ;;  %1918 = vst.msk [vmem:[%s3100_s6 + $0x7c] sm:$0xf] %vm1886_vm15, %v1885_v14 }
 0x2ae   : > { %v1743_v6 = vrot.slane %v1742_v55, 4  ;;  %v1843_v47 = vadd.f32 %v1842_v57, %v1841_v24 }
 0x2b0   : > { %v1744_v5 = vadd.f32 %v1743_v6, %v1742_v55  ;;  %v1844_v37 = vrot.slane %v1843_v47, 4 }
 0x2b2   : > { %v1745_v45 = vrot.slane %v1744_v5, 2  ;;  %v1845_v63 = vadd.f32 %v1844_v37, %v1843_v47 }
 0x2b4   : > { %v1746_v16 = vadd.f32 %v1745_v45, %v1744_v5  ;;  %v1846_v17 = vrot.slane %v1845_v63, 2 }
 0x2b6   : > { %v1747_v29 = vrot.slane %v1746_v16, 1  ;;  %v1847_v40 = vadd.f32 %v1846_v17, %v1845_v63 }
 0x2b8   : > { %v1848_v18 = vrot.slane %v1847_v40, 1  ;;  %v1748_v13 = vadd.f32 %v1747_v29, %v1746_v16 }
 0x2ba   : > { %v1849_v36 = vadd.f32 %v1848_v18, %v1847_v40 }
 0x2bc   : > { %v1851_v0 = vsel %vm670_vm0, %v1748_v13, %v1849_v36 }
 0x2bd   : > { %1853 = vst.msk [vmem:[%s235_s8] sm:$0x3] %vm1852_vm1, %v1851_v0 }
 0x2be PF: > { %s16_s18 = sadd.s32 1, %s2176_s18  }
 0x2bf   : > { %p13_p4 = scmp.ge.s32.totalorder %s16_s18, 4  }
 0x2c1   :  { %15 = sbr.rel (!%p13_p4) target bundleno = 1 (0x1), region = 78 }

</bundles_post_ra>
